<compile_context>
chip_gen: v6e
topology: v6e:2x2x1
jax: 0.10.0
libtpu: 0.0.40
codegen_flags: <defaults>
</compile_context>

<pallas_src>
import functools

import jax
import jax.numpy as jnp
from jax.experimental import pallas as pl
from jax.experimental.pallas import tpu as pltpu

EPS = 1e-5
_MAX_ROW_TILE = 512        # rows per block for the M-tiled kernels (mult of 8)

_CPARAMS = pltpu.CompilerParams(
    dimension_semantics=("parallel",),          # megacore splits the grid (v7x)
    vmem_limit_bytes=48 * 1024 * 1024)          # < v7x 64 MiB physical; safe everywhere


def _row_tile(m):
    """Row tile: multiple of 8, <= _MAX_ROW_TILE, divides m, >= 2 grid steps."""
    if m <= 16 or m % 8 != 0:
        return m, 1
    cap = max(8, min(_MAX_ROW_TILE, (m // 2) // 8 * 8))
    for tm in range(cap, 7, -8):
        if m % tm == 0:
            return tm, m // tm
    return 8, m // 8           # (m % 8 == 0 here, so this always divides)


def _pack_factor(m, c):
    """Lane-pack factor p so (M, C) -> (M/p, C*p) stores are 128-lane dense."""
    if c <= 128 and 128 % c == 0:
        p = 128 // c
        if m % p == 0:
            return p
    return 1


# --------------------------- Pallas kernels ---------------------------------

def _conv3x3_kernel(x_ref, w_ref, o_ref, *, wp, h, w):
    """Fused [l2l|l2g|g2l] 3x3 conv of one zero-padded batch image.

    x_ref: (1, (H+2)*Wp + 8, Cin) bf16, padded image flattened with row
           stride Wp (multiple of 8).
    w_ref: (9*Cin, Ctot) bf16, rows ordered (ky, kx, ci); block-structured so
           local-in channels feed only the [l2l|l2g] columns and global-in
           channels feed only the g2l columns.
    o_ref: (1, H*W, Ctot) bf16 — dense; the Wp-W garbage columns of the
           matmul result are compacted away in-kernel.
    """
    mo = h * wp
    x = x_ref[0]
    taps = [x[ky * wp + kx: ky * wp + kx + mo, :]
            for ky in range(3) for kx in range(3)]
    x2d = jnp.concatenate(taps, axis=-1)                 # (mo, 9*Cin) bf16
    y = jnp.dot(x2d, w_ref[...], preferred_element_type=jnp.float32)
    y = y.astype(o_ref.dtype)
    for i in range(h):                                   # compact to dense rows
        o_ref[0, i * w:(i + 1) * w, :] = y[i * wp:i * wp + w, :]


def _mm_affine_kernel(x_ref, w_ref, s_ref, b_ref, o_ref, *, relu):
    """Fused 1x1 conv + folded BN (+ ReLU): o = act((x @ w) * s + b)."""
    y = jnp.dot(x_ref[...], w_ref[...], preferred_element_type=jnp.float32)
    y = y * s_ref[...] + b_ref[...]
    if relu:
        y = jnp.maximum(y, 0.0)
    o_ref[...] = y.astype(o_ref.dtype)


def _mm_sum3_kernel(a_ref, b_ref, c_ref, w_ref, o_ref):
    """SpectralTransform conv2: o = (a + b + c) @ w (3-way sum fused, no BN)."""
    x = (a_ref[...].astype(jnp.float32) + b_ref[...].astype(jnp.float32)
         + c_ref[...].astype(jnp.float32)).astype(jnp.bfloat16)
    o_ref[...] = jnp.dot(
        x, w_ref[...], preferred_element_type=jnp.float32).astype(o_ref.dtype)


def _combine_kernel(lg_ref, g_ref, s_ref, b_ref, o_ref):
    """FFC_BN_ACT tail: relu((lg + g) * scale + bias) on lane-packed rows."""
    y = lg_ref[...].astype(jnp.float32) + g_ref[...].astype(jnp.float32)
    y = y * s_ref[...] + b_ref[...]
    o_ref[...] = jnp.maximum(y, 0.0).astype(o_ref.dtype)


def _combine_res_kernel(lg_ref, g_ref, id_ref, s_ref, b_ref, o_ref):
    """Stage-2 tail with fused residual: relu(relu((lg+g)*s+b) + identity)."""
    y = lg_ref[...].astype(jnp.float32) + g_ref[...].astype(jnp.float32)
    y = jnp.maximum(y * s_ref[...] + b_ref[...], 0.0)
    y = y + id_ref[...].astype(jnp.float32)
    o_ref[...] = jnp.maximum(y, 0.0).astype(o_ref.dtype)


# --------------------------- Pallas wrappers ---------------------------------

def conv3x3_fused(x, w):
    """x: (N,H,W,Cin) NHWC bf16; w: (3,3,Cin,Ctot) block-structured; pad=1."""
    N, H, W, Cin = x.shape
    Ctot = w.shape[-1]
    Wp = ((W + 2 + 7) // 8) * 8                  # padded row stride, mult of 8
    xp = jnp.pad(x.astype(jnp.bfloat16),
                 ((0, 0), (1, 1), (1, Wp - W - 1), (0, 0)))
    xp = xp.reshape(N, (H + 2) * Wp, Cin)
    xp = jnp.pad(xp, ((0, 0), (0, 8), (0, 0)))   # tail guard for last taps
    Ptot = (H + 2) * Wp + 8
    w2 = w.reshape(9 * Cin, Ctot).astype(jnp.bfloat16)
    return pl.pallas_call(
        functools.partial(_conv3x3_kernel, wp=Wp, h=H, w=W),
        grid=(N,),
        out_shape=jax.ShapeDtypeStruct((N, H * W, Ctot), jnp.bfloat16),
        in_specs=[pl.BlockSpec((1, Ptot, Cin), lambda n: (n, 0, 0)),
                  pl.BlockSpec((9 * Cin, Ctot), lambda n: (0, 0))],
        out_specs=pl.BlockSpec((1, H * W, Ctot), lambda n: (n, 0, 0)),
        compiler_params=_CPARAMS,
    )(xp, w2)                                     # dense (N, H*W, Ctot)


def matmul_affine(x2d, w, scale, bias, relu):
    """(M, Ci) @ (Ci, Co) with fused per-channel scale/bias (+ReLU), bf16 out."""
    M, Ci = x2d.shape
    Co = w.shape[-1]
    tm, g = _row_tile(M)
    return pl.pallas_call(
        functools.partial(_mm_affine_kernel, relu=relu),
        grid=(g,),
        out_shape=jax.ShapeDtypeStruct((M, Co), jnp.bfloat16),
        in_specs=[pl.BlockSpec((tm, Ci), lambda i: (i, 0)),
                  pl.BlockSpec((Ci, Co), lambda i: (0, 0)),
                  pl.BlockSpec((1, Co), lambda i: (0, 0)),
                  pl.BlockSpec((1, Co), lambda i: (0, 0))],
        out_specs=pl.BlockSpec((tm, Co), lambda i: (i, 0)),
        compiler_params=_CPARAMS,
    )(x2d.astype(jnp.bfloat16), w.astype(jnp.bfloat16),
      scale.reshape(1, Co).astype(jnp.float32),
      bias.reshape(1, Co).astype(jnp.float32))


def matmul_sum3(a2d, b2d, c2d, w):
    """(a + b + c) @ w with the 3-way sum fused into the matmul kernel."""
    M, Ci = a2d.shape
    Co = w.shape[-1]
    tm, g = _row_tile(M)
    row = pl.BlockSpec((tm, Ci), lambda i: (i, 0))
    return pl.pallas_call(
        _mm_sum3_kernel,
        grid=(g,),
        out_shape=jax.ShapeDtypeStruct((M, Co), jnp.bfloat16),
        in_specs=[row, row, row, pl.BlockSpec((Ci, Co), lambda i: (0, 0))],
        out_specs=pl.BlockSpec((tm, Co), lambda i: (i, 0)),
        compiler_params=_CPARAMS,
    )(a2d.astype(jnp.bfloat16), b2d.astype(jnp.bfloat16),
      c2d.astype(jnp.bfloat16), w.astype(jnp.bfloat16))


def ffc_combine(lg2d, g2d, scale, bias, identity=None):
    """relu((lg + g) * scale + bias) (+ fused residual) on lane-packed rows."""
    M, C = lg2d.shape
    p = _pack_factor(M, C)                        # (M, C) -> (M/p, C*p)
    Mp, Cp = M // p, C * p
    lgp = lg2d.astype(jnp.bfloat16).reshape(Mp, Cp)
    gp = g2d.astype(jnp.bfloat16).reshape(Mp, Cp)
    sc = jnp.tile(scale.astype(jnp.float32), p).reshape(1, Cp)
    bi = jnp.tile(bias.astype(jnp.float32), p).reshape(1, Cp)
    tm, g = _row_tile(Mp)
    row = pl.BlockSpec((tm, Cp), lambda i: (i, 0))
    vec = pl.BlockSpec((1, Cp), lambda i: (0, 0))
    out_spec = pl.BlockSpec((tm, Cp), lambda i: (i, 0))
    out_shape = jax.ShapeDtypeStruct((Mp, Cp), jnp.bfloat16)
    if identity is None:
        out = pl.pallas_call(
            _combine_kernel, grid=(g,), out_shape=out_shape,
            in_specs=[row, row, vec, vec], out_specs=out_spec,
            compiler_params=_CPARAMS,
        )(lgp, gp, sc, bi)
    else:
        idp = identity.astype(jnp.bfloat16).reshape(Mp, Cp)
        out = pl.pallas_call(
            _combine_res_kernel, grid=(g,), out_shape=out_shape,
            in_specs=[row, row, row, vec, vec], out_specs=out_spec,
            compiler_params=_CPARAMS,
        )(lgp, gp, idp, sc, bi)
    return out.reshape(M, C)


# ------------------------------ BatchNorm ------------------------------------

def bn_scale_bias(bn):
    """Eval-mode BN folded to per-channel scale / bias (applied in-kernel)."""
    scale = bn["gamma"] / jnp.sqrt(bn["var"] + EPS)
    bias = bn["beta"] - bn["mean"] * scale
    return scale, bias


# ------------------------------ FFC modules ----------------------------------

def fourier_unit(x, p):
    """FourierUnit: rfft2 -> fused (1x1 conv + BN + ReLU) on spectrum -> irfft2."""
    N, H, W, C = x.shape
    # TODO(synk): rfft2/irfft2 have no Pallas TPU equivalent; jnp.fft (XLA) here.
    f = jnp.fft.rfft2(x.astype(jnp.float32), axes=(1, 2), norm="ortho")
    Wf = f.shape[2]
    # pre-concatenated [re | im] slab (block channel convention, see header)
    spec = jnp.concatenate([jnp.real(f), jnp.imag(f)],
                           axis=-1).astype(jnp.bfloat16).reshape(-1, 2 * C)
    sc, bi = bn_scale_bias(p["bn"])
    y = matmul_affine(spec, p["w"], sc, bi, relu=True)        # (M, 2C) bf16
    y = y.reshape(N, H, Wf, 2 * C).astype(jnp.float32)
    fc = jax.lax.complex(y[..., :C], y[..., C:])
    out = jnp.fft.irfft2(fc, s=(H, W), axes=(1, 2), norm="ortho")
    return out.astype(jnp.bfloat16)


def spectral_transform(x_g, p):
    """SpectralTransform (stride=1, groups=1, enable_lfu=True)."""
    N, H, W, Cin = x_g.shape
    ch = p["conv1_w"].shape[-1]

    # conv1: 1x1 (Cin -> Cout//2) + BN + ReLU, fused in one kernel.
    sc1, bi1 = bn_scale_bias(p["conv1_bn"])
    h2d = matmul_affine(x_g.reshape(-1, Cin), p["conv1_w"], sc1, bi1, relu=True)
    h = h2d.reshape(N, H, W, ch)

    fu = fourier_unit(h, p["fu"])

    # LFU: first ch//4 channels, fold the H and W halves into channels.
    sh, sw = H // 2, W // 2
    xs = h[..., : ch // 4]
    xs = jnp.concatenate([xs[:, :sh], xs[:, sh:]], axis=-1)        # H halves -> C
    xs = jnp.concatenate([xs[:, :, :sw], xs[:, :, sw:]], axis=-1)  # W halves -> C
    xs = fourier_unit(xs, p["lfu"])
    # TODO(synk): the 2x2 spatial repeat could be avoided via a spatial
    # index_map in matmul_sum3; it is tiny (bf16) at these sizes.
    xs = jnp.tile(xs, (1, 2, 2, 1))

    # conv2(h + fu + xs): 3-way sum fused into the 1x1-conv kernel, no BN.
    g2g = matmul_sum3(h2d, fu.reshape(-1, ch), xs.reshape(-1, ch), p["conv2_w"])
    return g2g.reshape(N, H, W, -1)


def ffc_bn_act(x_lg, p, in_cl, identity=None):
    """FFC_BN_ACT, ratio_gin = ratio_gout = 0.5; x_lg = [local | global] NHWC.

    If `identity` is given, the BasicBlock residual add + ReLU is fused into
    the combine kernel of this stage.
    """
    N, H, W, _ = x_lg.shape
    out_cl = p["bn_l"]["gamma"].shape[0]
    out_cg = p["bn_g"]["gamma"].shape[0]
    C = out_cl + out_cg
    M = N * H * W

    # ONE fused 3x3 conv for [l2l|l2g] and g2l (block-structured weight).
    conv = conv3x3_fused(x_lg, p["w_conv"]).reshape(M, C + out_cl)
    lg = conv[:, :C]                      # [l2l | l2g]
    gl = conv[:, C:]                      # g2l

    x_g = x_lg[..., in_cl:]
    gg = spectral_transform(x_g, p["st"])               # g2g  (N,H,W,out_cg)

    g = jnp.concatenate([gl, gg.reshape(M, out_cg)], axis=-1)   # [g2l | g2g]

    sc_l, bi_l = bn_scale_bias(p["bn_l"])
    sc_g, bi_g = bn_scale_bias(p["bn_g"])
    scale = jnp.concatenate([sc_l, sc_g])
    bias = jnp.concatenate([bi_l, bi_g])

    out = ffc_combine(lg, g, scale, bias,
                      identity=None if identity is None
                      else identity.reshape(M, C))
    return out.reshape(N, H, W, C)


def basic_block(x_lg, params, in_cl):
    """BasicBlock.forward; x_lg is the lane-concatenated [local|global] NHWC input."""
    x_lg = x_lg.astype(jnp.bfloat16)
    identity = x_lg
    y = ffc_bn_act(x_lg, params["conv1"], in_cl)
    mid_cl = params["conv1"]["bn_l"]["gamma"].shape[0]
    # se_block = Identity; residual add + ReLU fused into the stage-2 combine.
    y = ffc_bn_act(y, params["conv2"], mid_cl, identity=identity)
    return y


# --------------------------- parameter init ----------------------------------

def init_bn(key, c):
    k1, k2, k3, k4 = jax.random.split(key, 4)
    return dict(
        gamma=1.0 + 0.1 * jax.random.normal(k1, (c,), jnp.float32),
        beta=0.1 * jax.random.normal(k2, (c,), jnp.float32),
        mean=0.1 * jax.random.normal(k3, (c,), jnp.float32),
        var=0.5 + jnp.abs(jax.random.normal(k4, (c,), jnp.float32)),
    )


def init_conv(key, shape):
    fan_in = 1
    for d in shape[:-1]:
        fan_in *= d
    return jax.random.normal(key, shape, jnp.float32) / jnp.sqrt(float(fan_in))


def init_spectral(key, in_c, out_c):
    ch = out_c // 2
    ks = jax.random.split(key, 7)
    # FourierUnit weights use the [re | im] block channel convention (see
    # fourier_unit) — an equivalent re-parameterisation of the interleaved
    # (c, 2) PyTorch layout; only valid for synthetic weights.
    return dict(
        conv1_w=init_conv(ks[0], (in_c, ch)),
        conv1_bn=init_bn(ks[1], ch),
        fu=dict(w=init_conv(ks[2], (2 * ch, 2 * ch)), bn=init_bn(ks[3], 2 * ch)),
        lfu=dict(w=init_conv(ks[4], (2 * ch, 2 * ch)), bn=init_bn(ks[5], 2 * ch)),
        conv2_w=init_conv(ks[6], (ch, out_c)),
    )


def init_ffc_bn_act(key, in_c, out_c, ratio=0.5):
    in_cg = int(in_c * ratio)
    in_cl = in_c - in_cg
    out_cg = int(out_c * ratio)
    out_cl = out_c - out_cg
    ks = jax.random.split(key, 6)
    w_l2l = init_conv(ks[0], (3, 3, in_cl, out_cl))
    w_l2g = init_conv(ks[1], (3, 3, in_cl, out_cg))
    w_g2l = init_conv(ks[2], (3, 3, in_cg, out_cl))
    # Block-structured fused weight, output columns = [l2l | l2g | g2l];
    # cross terms (global-in -> l2l/l2g, local-in -> g2l) are zero.
    ctot = out_cl + out_cg + out_cl
    w_conv = jnp.zeros((3, 3, in_cl + in_cg, ctot), jnp.float32)
    w_conv = w_conv.at[:, :, :in_cl, :out_cl + out_cg].set(
        jnp.concatenate([w_l2l, w_l2g], axis=-1))
    w_conv = w_conv.at[:, :, in_cl:, out_cl + out_cg:].set(w_g2l)
    return dict(
        w_conv=w_conv,
        st=init_spectral(ks[3], in_cg, out_cg),
        bn_l=init_bn(ks[4], out_cl),
        bn_g=init_bn(ks[5], out_cg),
    )


# ---------------------------------- main --------------------------------------

if __name__ == "__main__":
    key = jax.random.PRNGKey(0)
    k_in, k_p1, k_p2 = jax.random.split(key, 3)

    # Small deterministic example: inplanes = planes = 16, H = W = 16, N = 2.
    N, C, H, W = 2, 16, 16, 16
    c_g = int(C * 0.5)
    c_l = C - c_g

    x_nchw = jax.random.normal(k_in, (N, C, H, W), jnp.float32)   # PyTorch layout
    # NHWC with channels ordered [local | global] (= NCHW split x[:, :c_l] / x[:, c_l:]).
    x_nhwc = jnp.transpose(x_nchw, (0, 2, 3, 1))

    params = dict(
        conv1=init_ffc_bn_act(k_p1, C, C),
        conv2=init_ffc_bn_act(k_p2, C, C),
    )

    fwd = jax.jit(functools.partial(basic_block, params=params, in_cl=c_l))
    out = fwd(x_nhwc)
    jax.block_until_ready(out)

    # back to PyTorch NCHW convention, split into (x_l, x_g)
    out_l = jnp.transpose(out[..., :c_l], (0, 3, 1, 2))
    out_g = jnp.transpose(out[..., c_l:], (0, 3, 1, 2))

    assert out_l.shape == (N, c_l, H, W) and out_g.shape == (N, c_g, H, W)
    assert bool(jnp.all(jnp.isfinite(out_l.astype(jnp.float32))))
    assert bool(jnp.all(jnp.isfinite(out_g.astype(jnp.float32))))
    print("KERNEL_OK")
</pallas_src>

<mosaic_0001>
module attributes {stable_mosaic.version = 11 : i64} {
  func.func @_mm_affine_kernel(%arg0: i32, %arg1: memref<256x8xbf16, #tpu.memory_space<vmem>>, %arg2: memref<8x4xbf16, #tpu.memory_space<vmem>>, %arg3: memref<1x4xf32, #tpu.memory_space<vmem>>, %arg4: memref<1x4xf32, #tpu.memory_space<vmem>>, %arg5: memref<256x4xbf16, #tpu.memory_space<vmem>>) attributes {dimension_semantics = [#tpu.dimension_semantics<parallel>], iteration_bounds = array<i64: 2>, scalar_prefetch = 0 : i64, scratch_operands = 0 : i64, tpu.core_type = #tpu.core_type<tc>, window_params = [{transform_indices = @transform_0, window_bounds = array<i64: 256, 8>}, {pipeline_mode = #tpu.pipeline_mode<synchronous>, transform_indices = @transform_1, window_bounds = array<i64: 8, 4>}, {pipeline_mode = #tpu.pipeline_mode<synchronous>, transform_indices = @transform_2, window_bounds = array<i64: 1, 4>}, {pipeline_mode = #tpu.pipeline_mode<synchronous>, transform_indices = @transform_3, window_bounds = array<i64: 1, 4>}, {transform_indices = @transform_4, window_bounds = array<i64: 256, 4>}]} {
    %c0 = arith.constant 0 : index
    %c0_0 = arith.constant 0 : index
    %0 = vector.load %arg1[%c0, %c0_0] : memref<256x8xbf16, #tpu.memory_space<vmem>>, vector<256x8xbf16>
    %c0_1 = arith.constant 0 : index
    %c0_2 = arith.constant 0 : index
    %1 = vector.load %arg2[%c0_1, %c0_2] : memref<8x4xbf16, #tpu.memory_space<vmem>>, vector<8x4xbf16>
    %cst = arith.constant dense<0.000000e+00> : vector<256x4xf32>
    %2 = tpu.matmul %0, %1, %cst {dimension_numbers = #tpu.dot_dimension_numbers<[1], [0], [0], [1], [0, 0, 1, 1], [], []>} : vector<256x8xbf16>, vector<8x4xbf16>, vector<256x4xf32> -> vector<256x4xf32>
    %c0_3 = arith.constant 0 : index
    %c0_4 = arith.constant 0 : index
    %3 = vector.load %arg3[%c0_3, %c0_4] : memref<1x4xf32, #tpu.memory_space<vmem>>, vector<1x4xf32>
    %4 = vector.broadcast %3 : vector<1x4xf32> to vector<256x4xf32>
    %5 = arith.mulf %2, %4 : vector<256x4xf32>
    %c0_5 = arith.constant 0 : index
    %c0_6 = arith.constant 0 : index
    %6 = vector.load %arg4[%c0_5, %c0_6] : memref<1x4xf32, #tpu.memory_space<vmem>>, vector<1x4xf32>
    %7 = vector.broadcast %6 : vector<1x4xf32> to vector<256x4xf32>
    %8 = arith.addf %5, %7 : vector<256x4xf32>
    %cst_7 = arith.constant 0.000000e+00 : f32
    %9 = vector.broadcast %cst_7 : f32 to vector<256x4xf32>
    %10 = arith.maximumf %8, %9 : vector<256x4xf32>
    %11 = arith.truncf %10 : vector<256x4xf32> to vector<256x4xbf16>
    %c0_8 = arith.constant 0 : index
    %c0_9 = arith.constant 0 : index
    %12 = vector.load %arg5[%c0_8, %c0_9] : memref<256x4xbf16, #tpu.memory_space<vmem>>, vector<256x4xbf16>
    tpu.vector_store %arg5[%c0_8, %c0_9], %11 {strides = array<i32>} : memref<256x4xbf16, #tpu.memory_space<vmem>>, vector<256x4xbf16>,
    return
  }
  func.func @transform_0(%arg0: i32) -> (i32, i32) {
    %c0_i32 = arith.constant 0 : i32
    %c0_i32_0 = arith.constant 0 : i32
    return %arg0, %c0_i32 : i32, i32
  }
  func.func @transform_1(%arg0: i32) -> (i32, i32) {
    %c0_i32 = arith.constant 0 : i32
    %c0_i32_0 = arith.constant 0 : i32
    %c0_i32_1 = arith.constant 0 : i32
    return %c0_i32, %c0_i32_0 : i32, i32
  }
  func.func @transform_2(%arg0: i32) -> (i32, i32) {
    %c0_i32 = arith.constant 0 : i32
    %c0_i32_0 = arith.constant 0 : i32
    %c0_i32_1 = arith.constant 0 : i32
    return %c0_i32, %c0_i32_0 : i32, i32
  }
  func.func @transform_3(%arg0: i32) -> (i32, i32) {
    %c0_i32 = arith.constant 0 : i32
    %c0_i32_0 = arith.constant 0 : i32
    %c0_i32_1 = arith.constant 0 : i32
    return %c0_i32, %c0_i32_0 : i32, i32
  }
  func.func @transform_4(%arg0: i32) -> (i32, i32) {
    %c0_i32 = arith.constant 0 : i32
    %c0_i32_0 = arith.constant 0 : i32
    return %arg0, %c0_i32 : i32, i32
  }
}

module attributes {stable_mosaic.version = 11 : i64} {
  func.func @_mm_affine_kernel(%arg0: i32, %arg1: memref<40x8xbf16, #tpu.memory_space<vmem>>, %arg2: memref<8x8xbf16, #tpu.memory_space<vmem>>, %arg3: memref<1x8xf32, #tpu.memory_space<vmem>>, %arg4: memref<1x8xf32, #tpu.memory_space<vmem>>, %arg5: memref<40x8xbf16, #tpu.memory_space<vmem>>) attributes {dimension_semantics = [#tpu.dimension_semantics<parallel>], iteration_bounds = array<i64: 2>, scalar_prefetch = 0 : i64, scratch_operands = 0 : i64, tpu.core_type = #tpu.core_type<tc>, window_params = [{transform_indices = @transform_0, window_bounds = array<i64: 40, 8>}, {pipeline_mode = #tpu.pipeline_mode<synchronous>, transform_indices = @transform_1, window_bounds = array<i64: 8, 8>}, {pipeline_mode = #tpu.pipeline_mode<synchronous>, transform_indices = @transform_2, window_bounds = array<i64: 1, 8>}, {pipeline_mode = #tpu.pipeline_mode<synchronous>, transform_indices = @transform_3, window_bounds = array<i64: 1, 8>}, {transform_indices = @transform_4, window_bounds = array<i64: 40, 8>}]} {
    %c0 = arith.constant 0 : index
    %c0_0 = arith.constant 0 : index
    %0 = vector.load %arg1[%c0, %c0_0] : memref<40x8xbf16, #tpu.memory_space<vmem>>, vector<40x8xbf16>
    %c0_1 = arith.constant 0 : index
    %c0_2 = arith.constant 0 : index
    %1 = vector.load %arg2[%c0_1, %c0_2] : memref<8x8xbf16, #tpu.memory_space<vmem>>, vector<8x8xbf16>
    %cst = arith.constant dense<0.000000e+00> : vector<40x8xf32>
    %2 = tpu.matmul %0, %1, %cst {dimension_numbers = #tpu.dot_dimension_numbers<[1], [0], [0], [1], [0, 0, 1, 1], [], []>} : vector<40x8xbf16>, vector<8x8xbf16>, vector<40x8xf32> -> vector<40x8xf32>
    %c0_3 = arith.constant 0 : index
    %c0_4 = arith.constant 0 : index
    %3 = vector.load %arg3[%c0_3, %c0_4] : memref<1x8xf32, #tpu.memory_space<vmem>>, vector<1x8xf32>
    %4 = vector.broadcast %3 : vector<1x8xf32> to vector<40x8xf32>
    %5 = arith.mulf %2, %4 : vector<40x8xf32>
    %c0_5 = arith.constant 0 : index
    %c0_6 = arith.constant 0 : index
    %6 = vector.load %arg4[%c0_5, %c0_6] : memref<1x8xf32, #tpu.memory_space<vmem>>, vector<1x8xf32>
    %7 = vector.broadcast %6 : vector<1x8xf32> to vector<40x8xf32>
    %8 = arith.addf %5, %7 : vector<40x8xf32>
    %cst_7 = arith.constant 0.000000e+00 : f32
    %9 = vector.broadcast %cst_7 : f32 to vector<40x8xf32>
    %10 = arith.maximumf %8, %9 : vector<40x8xf32>
    %11 = arith.truncf %10 : vector<40x8xf32> to vector<40x8xbf16>
    %c0_8 = arith.constant 0 : index
    %c0_9 = arith.constant 0 : index
    %12 = vector.load %arg5[%c0_8, %c0_9] : memref<40x8xbf16, #tpu.memory_space<vmem>>, vector<40x8xbf16>
    tpu.vector_store %arg5[%c0_8, %c0_9], %11 {strides = array<i32>} : memref<40x8xbf16, #tpu.memory_space<vmem>>, vector<40x8xbf16>,
    return
  }
  func.func @transform_0(%arg0: i32) -> (i32, i32) {
    %c0_i32 = arith.constant 0 : i32
    %c0_i32_0 = arith.constant 0 : i32
    return %arg0, %c0_i32 : i32, i32
  }
  func.func @transform_1(%arg0: i32) -> (i32, i32) {
    %c0_i32 = arith.constant 0 : i32
    %c0_i32_0 = arith.constant 0 : i32
    %c0_i32_1 = arith.constant 0 : i32
    return %c0_i32, %c0_i32_0 : i32, i32
  }
  func.func @transform_2(%arg0: i32) -> (i32, i32) {
    %c0_i32 = arith.constant 0 : i32
    %c0_i32_0 = arith.constant 0 : i32
    %c0_i32_1 = arith.constant 0 : i32
    return %c0_i32, %c0_i32_0 : i32, i32
  }
  func.func @transform_3(%arg0: i32) -> (i32, i32) {
    %c0_i32 = arith.constant 0 : i32
    %c0_i32_0 = arith.constant 0 : i32
    %c0_i32_1 = arith.constant 0 : i32
    return %c0_i32, %c0_i32_0 : i32, i32
  }
  func.func @transform_4(%arg0: i32) -> (i32, i32) {
    %c0_i32 = arith.constant 0 : i32
    %c0_i32_0 = arith.constant 0 : i32
    return %arg0, %c0_i32 : i32, i32
  }
}

module attributes {stable_mosaic.version = 11 : i64} {
  func.func @_mm_affine_kernel(%arg0: i32, %arg1: memref<144x8xbf16, #tpu.memory_space<vmem>>, %arg2: memref<8x8xbf16, #tpu.memory_space<vmem>>, %arg3: memref<1x8xf32, #tpu.memory_space<vmem>>, %arg4: memref<1x8xf32, #tpu.memory_space<vmem>>, %arg5: memref<144x8xbf16, #tpu.memory_space<vmem>>) attributes {dimension_semantics = [#tpu.dimension_semantics<parallel>], iteration_bounds = array<i64: 2>, scalar_prefetch = 0 : i64, scratch_operands = 0 : i64, tpu.core_type = #tpu.core_type<tc>, window_params = [{transform_indices = @transform_0, window_bounds = array<i64: 144, 8>}, {pipeline_mode = #tpu.pipeline_mode<synchronous>, transform_indices = @transform_1, window_bounds = array<i64: 8, 8>}, {pipeline_mode = #tpu.pipeline_mode<synchronous>, transform_indices = @transform_2, window_bounds = array<i64: 1, 8>}, {pipeline_mode = #tpu.pipeline_mode<synchronous>, transform_indices = @transform_3, window_bounds = array<i64: 1, 8>}, {transform_indices = @transform_4, window_bounds = array<i64: 144, 8>}]} {
    %c0 = arith.constant 0 : index
    %c0_0 = arith.constant 0 : index
    %0 = vector.load %arg1[%c0, %c0_0] : memref<144x8xbf16, #tpu.memory_space<vmem>>, vector<144x8xbf16>
    %c0_1 = arith.constant 0 : index
    %c0_2 = arith.constant 0 : index
    %1 = vector.load %arg2[%c0_1, %c0_2] : memref<8x8xbf16, #tpu.memory_space<vmem>>, vector<8x8xbf16>
    %cst = arith.constant dense<0.000000e+00> : vector<144x8xf32>
    %2 = tpu.matmul %0, %1, %cst {dimension_numbers = #tpu.dot_dimension_numbers<[1], [0], [0], [1], [0, 0, 1, 1], [], []>} : vector<144x8xbf16>, vector<8x8xbf16>, vector<144x8xf32> -> vector<144x8xf32>
    %c0_3 = arith.constant 0 : index
    %c0_4 = arith.constant 0 : index
    %3 = vector.load %arg3[%c0_3, %c0_4] : memref<1x8xf32, #tpu.memory_space<vmem>>, vector<1x8xf32>
    %4 = vector.broadcast %3 : vector<1x8xf32> to vector<144x8xf32>
    %5 = arith.mulf %2, %4 : vector<144x8xf32>
    %c0_5 = arith.constant 0 : index
    %c0_6 = arith.constant 0 : index
    %6 = vector.load %arg4[%c0_5, %c0_6] : memref<1x8xf32, #tpu.memory_space<vmem>>, vector<1x8xf32>
    %7 = vector.broadcast %6 : vector<1x8xf32> to vector<144x8xf32>
    %8 = arith.addf %5, %7 : vector<144x8xf32>
    %cst_7 = arith.constant 0.000000e+00 : f32
    %9 = vector.broadcast %cst_7 : f32 to vector<144x8xf32>
    %10 = arith.maximumf %8, %9 : vector<144x8xf32>
    %11 = arith.truncf %10 : vector<144x8xf32> to vector<144x8xbf16>
    %c0_8 = arith.constant 0 : index
    %c0_9 = arith.constant 0 : index
    %12 = vector.load %arg5[%c0_8, %c0_9] : memref<144x8xbf16, #tpu.memory_space<vmem>>, vector<144x8xbf16>
    tpu.vector_store %arg5[%c0_8, %c0_9], %11 {strides = array<i32>} : memref<144x8xbf16, #tpu.memory_space<vmem>>, vector<144x8xbf16>,
    return
  }
  func.func @transform_0(%arg0: i32) -> (i32, i32) {
    %c0_i32 = arith.constant 0 : i32
    %c0_i32_0 = arith.constant 0 : i32
    return %arg0, %c0_i32 : i32, i32
  }
  func.func @transform_1(%arg0: i32) -> (i32, i32) {
    %c0_i32 = arith.constant 0 : i32
    %c0_i32_0 = arith.constant 0 : i32
    %c0_i32_1 = arith.constant 0 : i32
    return %c0_i32, %c0_i32_0 : i32, i32
  }
  func.func @transform_2(%arg0: i32) -> (i32, i32) {
    %c0_i32 = arith.constant 0 : i32
    %c0_i32_0 = arith.constant 0 : i32
    %c0_i32_1 = arith.constant 0 : i32
    return %c0_i32, %c0_i32_0 : i32, i32
  }
  func.func @transform_3(%arg0: i32) -> (i32, i32) {
    %c0_i32 = arith.constant 0 : i32
    %c0_i32_0 = arith.constant 0 : i32
    %c0_i32_1 = arith.constant 0 : i32
    return %c0_i32, %c0_i32_0 : i32, i32
  }
  func.func @transform_4(%arg0: i32) -> (i32, i32) {
    %c0_i32 = arith.constant 0 : i32
    %c0_i32_0 = arith.constant 0 : i32
    return %arg0, %c0_i32 : i32, i32
  }
}

module attributes {stable_mosaic.version = 11 : i64} {
  func.func @_mm_sum3_kernel(%arg0: i32, %arg1: memref<256x4xbf16, #tpu.memory_space<vmem>>, %arg2: memref<256x4xbf16, #tpu.memory_space<vmem>>, %arg3: memref<256x4xbf16, #tpu.memory_space<vmem>>, %arg4: memref<4x8xbf16, #tpu.memory_space<vmem>>, %arg5: memref<256x8xbf16, #tpu.memory_space<vmem>>) attributes {dimension_semantics = [#tpu.dimension_semantics<parallel>], iteration_bounds = array<i64: 2>, scalar_prefetch = 0 : i64, scratch_operands = 0 : i64, tpu.core_type = #tpu.core_type<tc>, window_params = [{transform_indices = @transform_0, window_bounds = array<i64: 256, 4>}, {transform_indices = @transform_1, window_bounds = array<i64: 256, 4>}, {transform_indices = @transform_2, window_bounds = array<i64: 256, 4>}, {pipeline_mode = #tpu.pipeline_mode<synchronous>, transform_indices = @transform_3, window_bounds = array<i64: 4, 8>}, {transform_indices = @transform_4, window_bounds = array<i64: 256, 8>}]} {
    %c0 = arith.constant 0 : index
    %c0_0 = arith.constant 0 : index
    %0 = vector.load %arg1[%c0, %c0_0] : memref<256x4xbf16, #tpu.memory_space<vmem>>, vector<256x4xbf16>
    %1 = arith.extf %0 : vector<256x4xbf16> to vector<256x4xf32>
    %c0_1 = arith.constant 0 : index
    %c0_2 = arith.constant 0 : index
    %2 = vector.load %arg2[%c0_1, %c0_2] : memref<256x4xbf16, #tpu.memory_space<vmem>>, vector<256x4xbf16>
    %3 = arith.extf %2 : vector<256x4xbf16> to vector<256x4xf32>
    %4 = arith.addf %1, %3 : vector<256x4xf32>
    %c0_3 = arith.constant 0 : index
    %c0_4 = arith.constant 0 : index
    %5 = vector.load %arg3[%c0_3, %c0_4] : memref<256x4xbf16, #tpu.memory_space<vmem>>, vector<256x4xbf16>
    %6 = arith.extf %5 : vector<256x4xbf16> to vector<256x4xf32>
    %7 = arith.addf %4, %6 : vector<256x4xf32>
    %8 = arith.truncf %7 : vector<256x4xf32> to vector<256x4xbf16>
    %c0_5 = arith.constant 0 : index
    %c0_6 = arith.constant 0 : index
    %9 = vector.load %arg4[%c0_5, %c0_6] : memref<4x8xbf16, #tpu.memory_space<vmem>>, vector<4x8xbf16>
    %cst = arith.constant dense<0.000000e+00> : vector<256x8xf32>
    %10 = tpu.matmul %8, %9, %cst {dimension_numbers = #tpu.dot_dimension_numbers<[1], [0], [0], [1], [0, 0, 1, 1], [], []>} : vector<256x4xbf16>, vector<4x8xbf16>, vector<256x8xf32> -> vector<256x8xf32>
    %11 = arith.truncf %10 : vector<256x8xf32> to vector<256x8xbf16>
    %c0_7 = arith.constant 0 : index
    %c0_8 = arith.constant 0 : index
    %12 = vector.load %arg5[%c0_7, %c0_8] : memref<256x8xbf16, #tpu.memory_space<vmem>>, vector<256x8xbf16>
    tpu.vector_store %arg5[%c0_7, %c0_8], %11 {strides = array<i32>} : memref<256x8xbf16, #tpu.memory_space<vmem>>, vector<256x8xbf16>,
    return
  }
  func.func @transform_0(%arg0: i32) -> (i32, i32) {
    %c0_i32 = arith.constant 0 : i32
    %c0_i32_0 = arith.constant 0 : i32
    return %arg0, %c0_i32 : i32, i32
  }
  func.func @transform_1(%arg0: i32) -> (i32, i32) {
    %c0_i32 = arith.constant 0 : i32
    %c0_i32_0 = arith.constant 0 : i32
    return %arg0, %c0_i32 : i32, i32
  }
  func.func @transform_2(%arg0: i32) -> (i32, i32) {
    %c0_i32 = arith.constant 0 : i32
    %c0_i32_0 = arith.constant 0 : i32
    return %arg0, %c0_i32 : i32, i32
  }
  func.func @transform_3(%arg0: i32) -> (i32, i32) {
    %c0_i32 = arith.constant 0 : i32
    %c0_i32_0 = arith.constant 0 : i32
    %c0_i32_1 = arith.constant 0 : i32
    return %c0_i32, %c0_i32_0 : i32, i32
  }
  func.func @transform_4(%arg0: i32) -> (i32, i32) {
    %c0_i32 = arith.constant 0 : i32
    %c0_i32_0 = arith.constant 0 : i32
    return %arg0, %c0_i32 : i32, i32
  }
}

module attributes {stable_mosaic.version = 11 : i64} {
  func.func @_conv3x3_kernel(%arg0: i32, %arg1: memref<1x440x16xbf16, #tpu.memory_space<vmem>>, %arg2: memref<144x24xbf16, #tpu.memory_space<vmem>>, %arg3: memref<1x256x24xbf16, #tpu.memory_space<vmem>>) attributes {dimension_semantics = [#tpu.dimension_semantics<parallel>], iteration_bounds = array<i64: 2>, scalar_prefetch = 0 : i64, scratch_operands = 0 : i64, tpu.core_type = #tpu.core_type<tc>, window_params = [{transform_indices = @transform_0, window_bounds = array<i64: 1, 440, 16>}, {pipeline_mode = #tpu.pipeline_mode<synchronous>, transform_indices = @transform_1, window_bounds = array<i64: 144, 24>}, {transform_indices = @transform_2, window_bounds = array<i64: 1, 256, 24>}]} {
    %c0 = arith.constant 0 : index
    %c0_0 = arith.constant 0 : index
    %c0_1 = arith.constant 0 : index
    %0 = vector.load %arg1[%c0, %c0_0, %c0_1] : memref<1x440x16xbf16, #tpu.memory_space<vmem>>, vector<1x440x16xbf16>
    %1 = vector.shape_cast %0 : vector<1x440x16xbf16> to vector<440x16xbf16>
    %2 = vector.extract_strided_slice %1 {offsets = [0, 0], sizes = [384, 16], strides = [1, 1]} : vector<440x16xbf16> to vector<384x16xbf16>
    %3 = vector.extract_strided_slice %1 {offsets = [1, 0], sizes = [384, 16], strides = [1, 1]} : vector<440x16xbf16> to vector<384x16xbf16>
    %4 = vector.extract_strided_slice %1 {offsets = [2, 0], sizes = [384, 16], strides = [1, 1]} : vector<440x16xbf16> to vector<384x16xbf16>
    %5 = vector.extract_strided_slice %1 {offsets = [24, 0], sizes = [384, 16], strides = [1, 1]} : vector<440x16xbf16> to vector<384x16xbf16>
    %6 = vector.extract_strided_slice %1 {offsets = [25, 0], sizes = [384, 16], strides = [1, 1]} : vector<440x16xbf16> to vector<384x16xbf16>
    %7 = vector.extract_strided_slice %1 {offsets = [26, 0], sizes = [384, 16], strides = [1, 1]} : vector<440x16xbf16> to vector<384x16xbf16>
    %8 = vector.extract_strided_slice %1 {offsets = [48, 0], sizes = [384, 16], strides = [1, 1]} : vector<440x16xbf16> to vector<384x16xbf16>
    %9 = vector.extract_strided_slice %1 {offsets = [49, 0], sizes = [384, 16], strides = [1, 1]} : vector<440x16xbf16> to vector<384x16xbf16>
    %10 = vector.extract_strided_slice %1 {offsets = [50, 0], sizes = [384, 16], strides = [1, 1]} : vector<440x16xbf16> to vector<384x16xbf16>
    %11 = tpu.concatenate %2, %3, %4, %5, %6, %7, %8, %9, %10 in 1 : vector<384x16xbf16>, vector<384x16xbf16>, vector<384x16xbf16>, vector<384x16xbf16>, vector<384x16xbf16>, vector<384x16xbf16>, vector<384x16xbf16>, vector<384x16xbf16>, vector<384x16xbf16> -> vector<384x144xbf16>
    %c0_2 = arith.constant 0 : index
    %c0_3 = arith.constant 0 : index
    %12 = vector.load %arg2[%c0_2, %c0_3] : memref<144x24xbf16, #tpu.memory_space<vmem>>, vector<144x24xbf16>
    %cst = arith.constant dense<0.000000e+00> : vector<384x24xf32>
    %13 = tpu.matmul %11, %12, %cst {dimension_numbers = #tpu.dot_dimension_numbers<[1], [0], [0], [1], [0, 0, 1, 1], [], []>} : vector<384x144xbf16>, vector<144x24xbf16>, vector<384x24xf32> -> vector<384x24xf32>
    %14 = arith.truncf %13 : vector<384x24xf32> to vector<384x24xbf16>
    %15 = vector.extract_strided_slice %14 {offsets = [0, 0], sizes = [16, 24], strides = [1, 1]} : vector<384x24xbf16> to vector<16x24xbf16>
    %c0_4 = arith.constant 0 : index
    %c0_5 = arith.constant 0 : index
    %c0_6 = arith.constant 0 : index
    %16 = vector.load %arg3[%c0_4, %c0_5, %c0_6] : memref<1x256x24xbf16, #tpu.memory_space<vmem>>, vector<1x16x24xbf16>
    %17 = vector.shape_cast %16 : vector<1x16x24xbf16> to vector<16x24xbf16>
    %18 = vector.shape_cast %15 : vector<16x24xbf16> to vector<1x16x24xbf16>
    tpu.vector_store %arg3[%c0_4, %c0_5, %c0_6], %18 {strides = array<i32>} : memref<1x256x24xbf16, #tpu.memory_space<vmem>>, vector<1x16x24xbf16>,
    %19 = vector.extract_strided_slice %14 {offsets = [24, 0], sizes = [16, 24], strides = [1, 1]} : vector<384x24xbf16> to vector<16x24xbf16>
    %c0_7 = arith.constant 0 : index
    %c16 = arith.constant 16 : index
    %c0_8 = arith.constant 0 : index
    %20 = vector.load %arg3[%c0_7, %c16, %c0_8] : memref<1x256x24xbf16, #tpu.memory_space<vmem>>, vector<1x16x24xbf16>
    %21 = vector.shape_cast %20 : vector<1x16x24xbf16> to vector<16x24xbf16>
    %22 = vector.shape_cast %19 : vector<16x24xbf16> to vector<1x16x24xbf16>
    tpu.vector_store %arg3[%c0_7, %c16, %c0_8], %22 {strides = array<i32>} : memref<1x256x24xbf16, #tpu.memory_space<vmem>>, vector<1x16x24xbf16>,
    %23 = vector.extract_strided_slice %14 {offsets = [48, 0], sizes = [16, 24], strides = [1, 1]} : vector<384x24xbf16> to vector<16x24xbf16>
    %c0_9 = arith.constant 0 : index
    %c32 = arith.constant 32 : index
    %c0_10 = arith.constant 0 : index
    %24 = vector.load %arg3[%c0_9, %c32, %c0_10] : memref<1x256x24xbf16, #tpu.memory_space<vmem>>, vector<1x16x24xbf16>
    %25 = vector.shape_cast %24 : vector<1x16x24xbf16> to vector<16x24xbf16>
    %26 = vector.shape_cast %23 : vector<16x24xbf16> to vector<1x16x24xbf16>
    tpu.vector_store %arg3[%c0_9, %c32, %c0_10], %26 {strides = array<i32>} : memref<1x256x24xbf16, #tpu.memory_space<vmem>>, vector<1x16x24xbf16>,
    %27 = vector.extract_strided_slice %14 {offsets = [72, 0], sizes = [16, 24], strides = [1, 1]} : vector<384x24xbf16> to vector<16x24xbf16>
    %c0_11 = arith.constant 0 : index
    %c48 = arith.constant 48 : index
    %c0_12 = arith.constant 0 : index
    %28 = vector.load %arg3[%c0_11, %c48, %c0_12] : memref<1x256x24xbf16, #tpu.memory_space<vmem>>, vector<1x16x24xbf16>
    %29 = vector.shape_cast %28 : vector<1x16x24xbf16> to vector<16x24xbf16>
    %30 = vector.shape_cast %27 : vector<16x24xbf16> to vector<1x16x24xbf16>
    tpu.vector_store %arg3[%c0_11, %c48, %c0_12], %30 {strides = array<i32>} : memref<1x256x24xbf16, #tpu.memory_space<vmem>>, vector<1x16x24xbf16>,
    %31 = vector.extract_strided_slice %14 {offsets = [96, 0], sizes = [16, 24], strides = [1, 1]} : vector<384x24xbf16> to vector<16x24xbf16>
    %c0_13 = arith.constant 0 : index
    %c64 = arith.constant 64 : index
    %c0_14 = arith.constant 0 : index
    %32 = vector.load %arg3[%c0_13, %c64, %c0_14] : memref<1x256x24xbf16, #tpu.memory_space<vmem>>, vector<1x16x24xbf16>
    %33 = vector.shape_cast %32 : vector<1x16x24xbf16> to vector<16x24xbf16>
    %34 = vector.shape_cast %31 : vector<16x24xbf16> to vector<1x16x24xbf16>
    tpu.vector_store %arg3[%c0_13, %c64, %c0_14], %34 {strides = array<i32>} : memref<1x256x24xbf16, #tpu.memory_space<vmem>>, vector<1x16x24xbf16>,
    %35 = vector.extract_strided_slice %14 {offsets = [120, 0], sizes = [16, 24], strides = [1, 1]} : vector<384x24xbf16> to vector<16x24xbf16>
    %c0_15 = arith.constant 0 : index
    %c80 = arith.constant 80 : index
    %c0_16 = arith.constant 0 : index
    %36 = vector.load %arg3[%c0_15, %c80, %c0_16] : memref<1x256x24xbf16, #tpu.memory_space<vmem>>, vector<1x16x24xbf16>
    %37 = vector.shape_cast %36 : vector<1x16x24xbf16> to vector<16x24xbf16>
    %38 = vector.shape_cast %35 : vector<16x24xbf16> to vector<1x16x24xbf16>
    tpu.vector_store %arg3[%c0_15, %c80, %c0_16], %38 {strides = array<i32>} : memref<1x256x24xbf16, #tpu.memory_space<vmem>>, vector<1x16x24xbf16>,
    %39 = vector.extract_strided_slice %14 {offsets = [144, 0], sizes = [16, 24], strides = [1, 1]} : vector<384x24xbf16> to vector<16x24xbf16>
    %c0_17 = arith.constant 0 : index
    %c96 = arith.constant 96 : index
    %c0_18 = arith.constant 0 : index
    %40 = vector.load %arg3[%c0_17, %c96, %c0_18] : memref<1x256x24xbf16, #tpu.memory_space<vmem>>, vector<1x16x24xbf16>
    %41 = vector.shape_cast %40 : vector<1x16x24xbf16> to vector<16x24xbf16>
    %42 = vector.shape_cast %39 : vector<16x24xbf16> to vector<1x16x24xbf16>
    tpu.vector_store %arg3[%c0_17, %c96, %c0_18], %42 {strides = array<i32>} : memref<1x256x24xbf16, #tpu.memory_space<vmem>>, vector<1x16x24xbf16>,
    %43 = vector.extract_strided_slice %14 {offsets = [168, 0], sizes = [16, 24], strides = [1, 1]} : vector<384x24xbf16> to vector<16x24xbf16>
    %c0_19 = arith.constant 0 : index
    %c112 = arith.constant 112 : index
    %c0_20 = arith.constant 0 : index
    %44 = vector.load %arg3[%c0_19, %c112, %c0_20] : memref<1x256x24xbf16, #tpu.memory_space<vmem>>, vector<1x16x24xbf16>
    %45 = vector.shape_cast %44 : vector<1x16x24xbf16> to vector<16x24xbf16>
    %46 = vector.shape_cast %43 : vector<16x24xbf16> to vector<1x16x24xbf16>
    tpu.vector_store %arg3[%c0_19, %c112, %c0_20], %46 {strides = array<i32>} : memref<1x256x24xbf16, #tpu.memory_space<vmem>>, vector<1x16x24xbf16>,
    %47 = vector.extract_strided_slice %14 {offsets = [192, 0], sizes = [16, 24], strides = [1, 1]} : vector<384x24xbf16> to vector<16x24xbf16>
    %c0_21 = arith.constant 0 : index
    %c128 = arith.constant 128 : index
    %c0_22 = arith.constant 0 : index
    %48 = vector.load %arg3[%c0_21, %c128, %c0_22] : memref<1x256x24xbf16, #tpu.memory_space<vmem>>, vector<1x16x24xbf16>
    %49 = vector.shape_cast %48 : vector<1x16x24xbf16> to vector<16x24xbf16>
    %50 = vector.shape_cast %47 : vector<16x24xbf16> to vector<1x16x24xbf16>
    tpu.vector_store %arg3[%c0_21, %c128, %c0_22], %50 {strides = array<i32>} : memref<1x256x24xbf16, #tpu.memory_space<vmem>>, vector<1x16x24xbf16>,
    %51 = vector.extract_strided_slice %14 {offsets = [216, 0], sizes = [16, 24], strides = [1, 1]} : vector<384x24xbf16> to vector<16x24xbf16>
    %c0_23 = arith.constant 0 : index
    %c144 = arith.constant 144 : index
    %c0_24 = arith.constant 0 : index
    %52 = vector.load %arg3[%c0_23, %c144, %c0_24] : memref<1x256x24xbf16, #tpu.memory_space<vmem>>, vector<1x16x24xbf16>
    %53 = vector.shape_cast %52 : vector<1x16x24xbf16> to vector<16x24xbf16>
    %54 = vector.shape_cast %51 : vector<16x24xbf16> to vector<1x16x24xbf16>
    tpu.vector_store %arg3[%c0_23, %c144, %c0_24], %54 {strides = array<i32>} : memref<1x256x24xbf16, #tpu.memory_space<vmem>>, vector<1x16x24xbf16>,
    %55 = vector.extract_strided_slice %14 {offsets = [240, 0], sizes = [16, 24], strides = [1, 1]} : vector<384x24xbf16> to vector<16x24xbf16>
    %c0_25 = arith.constant 0 : index
    %c160 = arith.constant 160 : index
    %c0_26 = arith.constant 0 : index
    %56 = vector.load %arg3[%c0_25, %c160, %c0_26] : memref<1x256x24xbf16, #tpu.memory_space<vmem>>, vector<1x16x24xbf16>
    %57 = vector.shape_cast %56 : vector<1x16x24xbf16> to vector<16x24xbf16>
    %58 = vector.shape_cast %55 : vector<16x24xbf16> to vector<1x16x24xbf16>
    tpu.vector_store %arg3[%c0_25, %c160, %c0_26], %58 {strides = array<i32>} : memref<1x256x24xbf16, #tpu.memory_space<vmem>>, vector<1x16x24xbf16>,
    %59 = vector.extract_strided_slice %14 {offsets = [264, 0], sizes = [16, 24], strides = [1, 1]} : vector<384x24xbf16> to vector<16x24xbf16>
    %c0_27 = arith.constant 0 : index
    %c176 = arith.constant 176 : index
    %c0_28 = arith.constant 0 : index
    %60 = vector.load %arg3[%c0_27, %c176, %c0_28] : memref<1x256x24xbf16, #tpu.memory_space<vmem>>, vector<1x16x24xbf16>
    %61 = vector.shape_cast %60 : vector<1x16x24xbf16> to vector<16x24xbf16>
    %62 = vector.shape_cast %59 : vector<16x24xbf16> to vector<1x16x24xbf16>
    tpu.vector_store %arg3[%c0_27, %c176, %c0_28], %62 {strides = array<i32>} : memref<1x256x24xbf16, #tpu.memory_space<vmem>>, vector<1x16x24xbf16>,
    %63 = vector.extract_strided_slice %14 {offsets = [288, 0], sizes = [16, 24], strides = [1, 1]} : vector<384x24xbf16> to vector<16x24xbf16>
    %c0_29 = arith.constant 0 : index
    %c192 = arith.constant 192 : index
    %c0_30 = arith.constant 0 : index
    %64 = vector.load %arg3[%c0_29, %c192, %c0_30] : memref<1x256x24xbf16, #tpu.memory_space<vmem>>, vector<1x16x24xbf16>
    %65 = vector.shape_cast %64 : vector<1x16x24xbf16> to vector<16x24xbf16>
    %66 = vector.shape_cast %63 : vector<16x24xbf16> to vector<1x16x24xbf16>
    tpu.vector_store %arg3[%c0_29, %c192, %c0_30], %66 {strides = array<i32>} : memref<1x256x24xbf16, #tpu.memory_space<vmem>>, vector<1x16x24xbf16>,
    %67 = vector.extract_strided_slice %14 {offsets = [312, 0], sizes = [16, 24], strides = [1, 1]} : vector<384x24xbf16> to vector<16x24xbf16>
    %c0_31 = arith.constant 0 : index
    %c208 = arith.constant 208 : index
    %c0_32 = arith.constant 0 : index
    %68 = vector.load %arg3[%c0_31, %c208, %c0_32] : memref<1x256x24xbf16, #tpu.memory_space<vmem>>, vector<1x16x24xbf16>
    %69 = vector.shape_cast %68 : vector<1x16x24xbf16> to vector<16x24xbf16>
    %70 = vector.shape_cast %67 : vector<16x24xbf16> to vector<1x16x24xbf16>
    tpu.vector_store %arg3[%c0_31, %c208, %c0_32], %70 {strides = array<i32>} : memref<1x256x24xbf16, #tpu.memory_space<vmem>>, vector<1x16x24xbf16>,
    %71 = vector.extract_strided_slice %14 {offsets = [336, 0], sizes = [16, 24], strides = [1, 1]} : vector<384x24xbf16> to vector<16x24xbf16>
    %c0_33 = arith.constant 0 : index
    %c224 = arith.constant 224 : index
    %c0_34 = arith.constant 0 : index
    %72 = vector.load %arg3[%c0_33, %c224, %c0_34] : memref<1x256x24xbf16, #tpu.memory_space<vmem>>, vector<1x16x24xbf16>
    %73 = vector.shape_cast %72 : vector<1x16x24xbf16> to vector<16x24xbf16>
    %74 = vector.shape_cast %71 : vector<16x24xbf16> to vector<1x16x24xbf16>
    tpu.vector_store %arg3[%c0_33, %c224, %c0_34], %74 {strides = array<i32>} : memref<1x256x24xbf16, #tpu.memory_space<vmem>>, vector<1x16x24xbf16>,
    %75 = vector.extract_strided_slice %14 {offsets = [360, 0], sizes = [16, 24], strides = [1, 1]} : vector<384x24xbf16> to vector<16x24xbf16>
    %c0_35 = arith.constant 0 : index
    %c240 = arith.constant 240 : index
    %c0_36 = arith.constant 0 : index
    %76 = vector.load %arg3[%c0_35, %c240, %c0_36] : memref<1x256x24xbf16, #tpu.memory_space<vmem>>, vector<1x16x24xbf16>
    %77 = vector.shape_cast %76 : vector<1x16x24xbf16> to vector<16x24xbf16>
    %78 = vector.shape_cast %75 : vector<16x24xbf16> to vector<1x16x24xbf16>
    tpu.vector_store %arg3[%c0_35, %c240, %c0_36], %78 {strides = array<i32>} : memref<1x256x24xbf16, #tpu.memory_space<vmem>>, vector<1x16x24xbf16>,
    return
  }
  func.func @transform_0(%arg0: i32) -> (i32, i32, i32) {
    %c0_i32 = arith.constant 0 : i32
    %c0_i32_0 = arith.constant 0 : i32
    %c0_i32_1 = arith.constant 0 : i32
    return %arg0, %c0_i32, %c0_i32_0 : i32, i32, i32
  }
  func.func @transform_1(%arg0: i32) -> (i32, i32) {
    %c0_i32 = arith.constant 0 : i32
    %c0_i32_0 = arith.constant 0 : i32
    %c0_i32_1 = arith.constant 0 : i32
    return %c0_i32, %c0_i32_0 : i32, i32
  }
  func.func @transform_2(%arg0: i32) -> (i32, i32, i32) {
    %c0_i32 = arith.constant 0 : i32
    %c0_i32_0 = arith.constant 0 : i32
    %c0_i32_1 = arith.constant 0 : i32
    return %arg0, %c0_i32, %c0_i32_0 : i32, i32, i32
  }
}

module attributes {stable_mosaic.version = 11 : i64} {
  func.func @_combine_kernel(%arg0: i32, %arg1: memref<32x128xbf16, #tpu.memory_space<vmem>>, %arg2: memref<32x128xbf16, #tpu.memory_space<vmem>>, %arg3: memref<1x128xf32, #tpu.memory_space<vmem>>, %arg4: memref<1x128xf32, #tpu.memory_space<vmem>>, %arg5: memref<32x128xbf16, #tpu.memory_space<vmem>>) attributes {dimension_semantics = [#tpu.dimension_semantics<parallel>], iteration_bounds = array<i64: 2>, scalar_prefetch = 0 : i64, scratch_operands = 0 : i64, tpu.core_type = #tpu.core_type<tc>, window_params = [{transform_indices = @transform_0, window_bounds = array<i64: 32, 128>}, {transform_indices = @transform_1, window_bounds = array<i64: 32, 128>}, {pipeline_mode = #tpu.pipeline_mode<synchronous>, transform_indices = @transform_2, window_bounds = array<i64: 1, 128>}, {pipeline_mode = #tpu.pipeline_mode<synchronous>, transform_indices = @transform_3, window_bounds = array<i64: 1, 128>}, {transform_indices = @transform_4, window_bounds = array<i64: 32, 128>}]} {
    %c0 = arith.constant 0 : index
    %c0_0 = arith.constant 0 : index
    %0 = vector.load %arg1[%c0, %c0_0] : memref<32x128xbf16, #tpu.memory_space<vmem>>, vector<32x128xbf16>
    %1 = arith.extf %0 : vector<32x128xbf16> to vector<32x128xf32>
    %c0_1 = arith.constant 0 : index
    %c0_2 = arith.constant 0 : index
    %2 = vector.load %arg2[%c0_1, %c0_2] : memref<32x128xbf16, #tpu.memory_space<vmem>>, vector<32x128xbf16>
    %3 = arith.extf %2 : vector<32x128xbf16> to vector<32x128xf32>
    %4 = arith.addf %1, %3 : vector<32x128xf32>
    %c0_3 = arith.constant 0 : index
    %c0_4 = arith.constant 0 : index
    %5 = vector.load %arg3[%c0_3, %c0_4] : memref<1x128xf32, #tpu.memory_space<vmem>>, vector<1x128xf32>
    %6 = vector.broadcast %5 : vector<1x128xf32> to vector<32x128xf32>
    %7 = arith.mulf %4, %6 : vector<32x128xf32>
    %c0_5 = arith.constant 0 : index
    %c0_6 = arith.constant 0 : index
    %8 = vector.load %arg4[%c0_5, %c0_6] : memref<1x128xf32, #tpu.memory_space<vmem>>, vector<1x128xf32>
    %9 = vector.broadcast %8 : vector<1x128xf32> to vector<32x128xf32>
    %10 = arith.addf %7, %9 : vector<32x128xf32>
    %cst = arith.constant 0.000000e+00 : f32
    %11 = vector.broadcast %cst : f32 to vector<32x128xf32>
    %12 = arith.maximumf %10, %11 : vector<32x128xf32>
    %13 = arith.truncf %12 : vector<32x128xf32> to vector<32x128xbf16>
    %c0_7 = arith.constant 0 : index
    %c0_8 = arith.constant 0 : index
    %14 = vector.load %arg5[%c0_7, %c0_8] : memref<32x128xbf16, #tpu.memory_space<vmem>>, vector<32x128xbf16>
    tpu.vector_store %arg5[%c0_7, %c0_8], %13 {strides = array<i32>} : memref<32x128xbf16, #tpu.memory_space<vmem>>, vector<32x128xbf16>,
    return
  }
  func.func @transform_0(%arg0: i32) -> (i32, i32) {
    %c0_i32 = arith.constant 0 : i32
    %c0_i32_0 = arith.constant 0 : i32
    return %arg0, %c0_i32 : i32, i32
  }
  func.func @transform_1(%arg0: i32) -> (i32, i32) {
    %c0_i32 = arith.constant 0 : i32
    %c0_i32_0 = arith.constant 0 : i32
    return %arg0, %c0_i32 : i32, i32
  }
  func.func @transform_2(%arg0: i32) -> (i32, i32) {
    %c0_i32 = arith.constant 0 : i32
    %c0_i32_0 = arith.constant 0 : i32
    %c0_i32_1 = arith.constant 0 : i32
    return %c0_i32, %c0_i32_0 : i32, i32
  }
  func.func @transform_3(%arg0: i32) -> (i32, i32) {
    %c0_i32 = arith.constant 0 : i32
    %c0_i32_0 = arith.constant 0 : i32
    %c0_i32_1 = arith.constant 0 : i32
    return %c0_i32, %c0_i32_0 : i32, i32
  }
  func.func @transform_4(%arg0: i32) -> (i32, i32) {
    %c0_i32 = arith.constant 0 : i32
    %c0_i32_0 = arith.constant 0 : i32
    return %arg0, %c0_i32 : i32, i32
  }
}

module attributes {stable_mosaic.version = 11 : i64} {
  func.func @_combine_res_kernel(%arg0: i32, %arg1: memref<32x128xbf16, #tpu.memory_space<vmem>>, %arg2: memref<32x128xbf16, #tpu.memory_space<vmem>>, %arg3: memref<32x128xbf16, #tpu.memory_space<vmem>>, %arg4: memref<1x128xf32, #tpu.memory_space<vmem>>, %arg5: memref<1x128xf32, #tpu.memory_space<vmem>>, %arg6: memref<32x128xbf16, #tpu.memory_space<vmem>>) attributes {dimension_semantics = [#tpu.dimension_semantics<parallel>], iteration_bounds = array<i64: 2>, scalar_prefetch = 0 : i64, scratch_operands = 0 : i64, tpu.core_type = #tpu.core_type<tc>, window_params = [{transform_indices = @transform_0, window_bounds = array<i64: 32, 128>}, {transform_indices = @transform_1, window_bounds = array<i64: 32, 128>}, {transform_indices = @transform_2, window_bounds = array<i64: 32, 128>}, {pipeline_mode = #tpu.pipeline_mode<synchronous>, transform_indices = @transform_3, window_bounds = array<i64: 1, 128>}, {pipeline_mode = #tpu.pipeline_mode<synchronous>, transform_indices = @transform_4, window_bounds = array<i64: 1, 128>}, {transform_indices = @transform_5, window_bounds = array<i64: 32, 128>}]} {
    %c0 = arith.constant 0 : index
    %c0_0 = arith.constant 0 : index
    %0 = vector.load %arg1[%c0, %c0_0] : memref<32x128xbf16, #tpu.memory_space<vmem>>, vector<32x128xbf16>
    %1 = arith.extf %0 : vector<32x128xbf16> to vector<32x128xf32>
    %c0_1 = arith.constant 0 : index
    %c0_2 = arith.constant 0 : index
    %2 = vector.load %arg2[%c0_1, %c0_2] : memref<32x128xbf16, #tpu.memory_space<vmem>>, vector<32x128xbf16>
    %3 = arith.extf %2 : vector<32x128xbf16> to vector<32x128xf32>
    %4 = arith.addf %1, %3 : vector<32x128xf32>
    %c0_3 = arith.constant 0 : index
    %c0_4 = arith.constant 0 : index
    %5 = vector.load %arg4[%c0_3, %c0_4] : memref<1x128xf32, #tpu.memory_space<vmem>>, vector<1x128xf32>
    %6 = vector.broadcast %5 : vector<1x128xf32> to vector<32x128xf32>
    %7 = arith.mulf %4, %6 : vector<32x128xf32>
    %c0_5 = arith.constant 0 : index
    %c0_6 = arith.constant 0 : index
    %8 = vector.load %arg5[%c0_5, %c0_6] : memref<1x128xf32, #tpu.memory_space<vmem>>, vector<1x128xf32>
    %9 = vector.broadcast %8 : vector<1x128xf32> to vector<32x128xf32>
    %10 = arith.addf %7, %9 : vector<32x128xf32>
    %cst = arith.constant 0.000000e+00 : f32
    %11 = vector.broadcast %cst : f32 to vector<32x128xf32>
    %12 = arith.maximumf %10, %11 : vector<32x128xf32>
    %c0_7 = arith.constant 0 : index
    %c0_8 = arith.constant 0 : index
    %13 = vector.load %arg3[%c0_7, %c0_8] : memref<32x128xbf16, #tpu.memory_space<vmem>>, vector<32x128xbf16>
    %14 = arith.extf %13 : vector<32x128xbf16> to vector<32x128xf32>
    %15 = arith.addf %12, %14 : vector<32x128xf32>
    %cst_9 = arith.constant 0.000000e+00 : f32
    %16 = vector.broadcast %cst_9 : f32 to vector<32x128xf32>
    %17 = arith.maximumf %15, %16 : vector<32x128xf32>
    %18 = arith.truncf %17 : vector<32x128xf32> to vector<32x128xbf16>
    %c0_10 = arith.constant 0 : index
    %c0_11 = arith.constant 0 : index
    %19 = vector.load %arg6[%c0_10, %c0_11] : memref<32x128xbf16, #tpu.memory_space<vmem>>, vector<32x128xbf16>
    tpu.vector_store %arg6[%c0_10, %c0_11], %18 {strides = array<i32>} : memref<32x128xbf16, #tpu.memory_space<vmem>>, vector<32x128xbf16>,
    return
  }
  func.func @transform_0(%arg0: i32) -> (i32, i32) {
    %c0_i32 = arith.constant 0 : i32
    %c0_i32_0 = arith.constant 0 : i32
    return %arg0, %c0_i32 : i32, i32
  }
  func.func @transform_1(%arg0: i32) -> (i32, i32) {
    %c0_i32 = arith.constant 0 : i32
    %c0_i32_0 = arith.constant 0 : i32
    return %arg0, %c0_i32 : i32, i32
  }
  func.func @transform_2(%arg0: i32) -> (i32, i32) {
    %c0_i32 = arith.constant 0 : i32
    %c0_i32_0 = arith.constant 0 : i32
    return %arg0, %c0_i32 : i32, i32
  }
  func.func @transform_3(%arg0: i32) -> (i32, i32) {
    %c0_i32 = arith.constant 0 : i32
    %c0_i32_0 = arith.constant 0 : i32
    %c0_i32_1 = arith.constant 0 : i32
    return %c0_i32, %c0_i32_0 : i32, i32
  }
  func.func @transform_4(%arg0: i32) -> (i32, i32) {
    %c0_i32 = arith.constant 0 : i32
    %c0_i32_0 = arith.constant 0 : i32
    %c0_i32_1 = arith.constant 0 : i32
    return %c0_i32, %c0_i32_0 : i32, i32
  }
  func.func @transform_5(%arg0: i32) -> (i32, i32) {
    %c0_i32 = arith.constant 0 : i32
    %c0_i32_0 = arith.constant 0 : i32
    return %arg0, %c0_i32 : i32, i32
  }
}

</mosaic_0001>

<bundles_post_ra>
// kernel: basic_block.13
= control target key start
LH: loop header
LB: loop body
LE: loop exit
PB: predicated region body
PF: predicated region fallthrough
CT: control target
= control target key end

     0   :  { %s1077_s15 = smov 0   ;;  %s1278_s0 = inlined_call_operand.vmem [shape: bf16[512,8], index: 0, kind: input, shape index: {}]   ;;  %s1279_s1 = inlined_call_operand.vmem [shape: bf16[8,4], index: 1, kind: input, shape index: {}]   ;;  %s1280_s2 = inlined_call_operand.vmem [shape: f32[1,4], index: 2, kind: input, shape index: {}]   ;;  %s1281_s3 = inlined_call_operand.vmem [shape: f32[1,4], index: 3, kind: input, shape index: {}]   ;;  %s1282_s4 = inlined_call_operand.vmem [shape: bf16[512,4], index: 4, kind: output, shape index: {}]  }
   0x1 LB: > { %s856_s16 = sadd.s32 4294967295, %s1050_s15   ;;  %p860_p0 = scmp.ge.s32.totalorder %s1050_s15, 1  ;;  %s1050_s15 = sphi %s1077_s15, %s14_s15  }
   0x2   : > { %p163_p1 = scmp.lt.s32.totalorder %s1050_s15, 3 }
   0x4   : > { %p164_p2 = pnand %p860_p0, %p163_p1 }
   0x5   : > { %s861_s19 = sshll.u32 (!%p164_p2), %s856_s16, 5 }
   0x6   : > { %167 = sbr.rel (%p164_p2) target bundleno = 249 (0xf9), region = 36  ;;  %p190_p3 = scmp.lt.s32.totalorder (!%p164_p2), %s861_s19, 63 }
   0xb   : > { %v234_v0 = vld [vmem:[%s1279_s1] sm:$0xf]  ;;  %vm364_vm0 = vcmask 1043456   ;;  %s1284_s19 = smov (!%p190_p3, %s861_s19), 63  ;;  %vm315_vm1 = vcmask 64512   ;;  %vm767_vm2 = vcmask 27648  }
   0xc   : > { %1018 = vmatprep.subr.msk.bf16.mxu0 %vm364_vm0, %v234_v0  ;;  %1019 = vmatprep.subr.msk.bf16.mxu1 %vm364_vm0, %v234_v0  ;;  %v366_v1 = vsel %vm364_vm0, %v234_v0, 0  ;;  %s862_s20 = sshll.u32 %s1284_s19, 2  ;;  %v1133_v18 = vld [vmem:[%s1280_s2] ss:$0 sm:$0xff] }
   0xd   : > { %983 = vmatpush3.bf16.msra.mxu0 %v366_v1  ;;  %1017 = vmatpush3.bf16.msra.mxu1 %v366_v1  ;;  %s1096_s23 = scalar_lea.vmem %s1278_s0, %s862_s20  ;;  %v1138_v20 = vld [vmem:[%s1281_s3] ss:$0 sm:$0xff]  ;;  %s1153_s30 = scalar_lea.vmem %s1282_s4, %s862_s20 }
   0xe   : > { %v1028_v2 = vld [vmem:[%s1096_s23] sm:$0xff]   ;;  %v1030_v4 = vld [vmem:[%s1096_s23 + $0x8] sm:$0xff]   ;;  %v1032_v6 = vld [vmem:[%s1096_s23 + $0x10] sm:$0xff]  }
   0xf   : > { %v1029_v3 = vld [vmem:[%s1096_s23 + $0x40] sm:$0xff]   ;;  %984 = vmatprep.mubr.msk.bf16.mxu0 %vm315_vm1, %v1028_v2  ;;  %v1031_v5 = vld [vmem:[%s1096_s23 + $0x48] sm:$0xff]   ;;  %v1033_v7 = vld [vmem:[%s1096_s23 + $0x50] sm:$0xff]  }
  0x10   : > { %1000 = vmatprep.mubr.msk.bf16.mxu1 %vm315_vm1, %v1029_v3  ;;  %985 = vmatmul.mubr.msk.bf16.vlgmr.msra.gmra.mxu0 %vm315_vm1, %v1030_v4  ;;  %v1034_v8 = vld [vmem:[%s1096_s23 + $0x18] sm:$0xff]   ;;  %v1036_v10 = vld [vmem:[%s1096_s23 + $0x20] sm:$0xff]   ;;  %v1038_v12 = vld [vmem:[%s1096_s23 + $0x28] sm:$0xff]  }
  0x11   : > { %1001 = vmatmul.mubr.msk.bf16.vlgmr.msra.gmra.mxu1 %vm315_vm1, %v1031_v5  ;;  %988 = vmatprep.mubr.msk.bf16.mxu0 %vm315_vm1, %v1032_v6  ;;  %v1035_v9 = vld [vmem:[%s1096_s23 + $0x58] sm:$0xff]   ;;  %v1037_v11 = vld [vmem:[%s1096_s23 + $0x60] sm:$0xff]   ;;  %v1039_v13 = vld [vmem:[%s1096_s23 + $0x68] sm:$0xff]  }
  0x12   : > { %1004 = vmatprep.mubr.msk.bf16.mxu1 %vm315_vm1, %v1033_v7  ;;  %v1040_v14 = vld [vmem:[%s1096_s23 + $0x30] sm:$0xff]   ;;  %v1042_v16 = vld [vmem:[%s1096_s23 + $0x38] sm:$0xff]  }
  0x13   : > { %v1041_v15 = vld [vmem:[%s1096_s23 + $0x70] sm:$0xff]   ;;  %v1043_v17 = vld [vmem:[%s1096_s23 + $0x78] sm:$0xff]  }
  0x18   : > { %989 = vmatmul.mubr.msk.bf16.gmra.mxu0 %vm315_vm1, %v1034_v8 }
  0x19   : > { %1005 = vmatmul.mubr.msk.bf16.gmra.mxu1 %vm315_vm1, %v1035_v9  ;;  %992 = vmatprep.mubr.msk.bf16.mxu0 %vm315_vm1, %v1036_v10 }
  0x1a   : > { %1008 = vmatprep.mubr.msk.bf16.mxu1 %vm315_vm1, %v1037_v11 }
  0x20   : > { %993 = vmatmul.mubr.msk.bf16.gmra.mxu0 %vm315_vm1, %v1038_v12 }
  0x21   : > { %1009 = vmatmul.mubr.msk.bf16.gmra.mxu1 %vm315_vm1, %v1039_v13  ;;  %996 = vmatprep.mubr.msk.bf16.mxu0 %vm315_vm1, %v1040_v14 }
  0x22   : > { %1012 = vmatprep.mubr.msk.bf16.mxu1 %vm315_vm1, %v1041_v15 }
  0x28   : > { %997 = vmatmul.mubr.msk.bf16.gmra.mxu0 %vm315_vm1, %v1042_v16 }
  0x29   : > { %1013 = vmatmul.mubr.msk.bf16.gmra.mxu1 %vm315_vm1, %v1043_v17 }
  0xd0   : > { %v986_v19 = vpop.f32.mrf.mxu0 }
  0xd1   : > { %v538_v21 = vmul.f32 %v986_v19, %v1133_v18  ;;  %v1002_v22 = vpop.f32.mrf.mxu1 }
  0xd2   : > { %v554_v23 = vmul.f32 %v1002_v22, %v1133_v18  ;;  %v402_v24 = vpop.f32.mrf.mxu0 }
  0xd3   : > { %v577_v25 = vadd.f32 %v1138_v20, %v538_v21  ;;  %v536_v26 = vmul.f32 %v1133_v18, %v402_v24  ;;  %v466_v27 = vpop.f32.mrf.mxu1 }
  0xd4   : > { %v593_v28 = vadd.f32 %v1138_v20, %v554_v23  ;;  %v552_v29 = vmul.f32 %v1133_v18, %v466_v27  ;;  %v987_v30 = vpop.f32.mrf.mxu0 }
  0xd5   : > { %v609_v31 = vmax.f32 %v577_v25, 0.0  ;;  %v575_v32 = vadd.f32 %v1138_v20, %v536_v26  ;;  %v539_v33 = vmul.f32 %v987_v30, %v1133_v18  ;;  %v1003_v34 = vpop.f32.mrf.mxu1 }
  0xd6   : > { %v625_v35 = vmax.f32 %v593_v28, 0.0  ;;  %v591_v36 = vadd.f32 %v1138_v20, %v552_v29  ;;  %v555_v37 = vmul.f32 %v1003_v34, %v1133_v18  ;;  %v405_v38 = vpop.f32.mrf.mxu0 }
  0xd7   : > { %v935_v39 = vpack.c.bf16 %v609_v31, %v609_v31  ;;  %v607_v40 = vmax.f32 %v575_v32, 0.0  ;;  %v578_v41 = vadd.f32 %v1138_v20, %v539_v33  ;;  %v537_v42 = vmul.f32 %v1133_v18, %v405_v38  ;;  %v469_v43 = vpop.f32.mrf.mxu1 }
  0xd8   : > { %v951_v44 = vpack.c.bf16 %v625_v35, %v625_v35  ;;  %v623_v45 = vmax.f32 %v591_v36, 0.0  ;;  %v594_v46 = vadd.f32 %v1138_v20, %v555_v37  ;;  %v553_v47 = vmul.f32 %v1133_v18, %v469_v43  ;;  %v990_v48 = vpop.f32.mrf.mxu0 }
  0xd9   : > { %770 = vst.msk [vmem:[%s1153_s30 + $0x8] sm:$0xf] %vm767_vm2, %v935_v39  ;;  %v933_v49 = vpack.c.bf16 %v607_v40, %v607_v40  ;;  %v610_v50 = vmax.f32 %v578_v41, 0.0  ;;  %v576_v51 = vadd.f32 %v1138_v20, %v537_v42  ;;  %v542_v52 = vmul.f32 %v990_v48, %v1133_v18  ;;  %v1006_v53 = vpop.f32.mrf.mxu1 }
  0xda   : > { %786 = vst.msk [vmem:[%s1153_s30 + $0x48] sm:$0xf] %vm767_vm2, %v951_v44  ;;  %v949_v54 = vpack.c.bf16 %v623_v45, %v623_v45  ;;  %v626_v55 = vmax.f32 %v594_v46, 0.0  ;;  %v592_v56 = vadd.f32 %v1138_v20, %v553_v47  ;;  %v558_v57 = vmul.f32 %v1006_v53, %v1133_v18  ;;  %v418_v58 = vpop.f32.mrf.mxu0 }
  0xdb   : > { %768 = vst.msk [vmem:[%s1153_s30] sm:$0xf] %vm767_vm2, %v933_v49  ;;  %v936_v59 = vpack.c.bf16 %v610_v50, %v610_v50  ;;  %v608_v60 = vmax.f32 %v576_v51, 0.0  ;;  %v581_v61 = vadd.f32 %v1138_v20, %v542_v52  ;;  %v540_v62 = vmul.f32 %v1133_v18, %v418_v58  ;;  %v482_v63 = vpop.f32.mrf.mxu1 }
  0xdc   : > { %784 = vst.msk [vmem:[%s1153_s30 + $0x40] sm:$0xf] %vm767_vm2, %v949_v54  ;;  %v952_v0 = vpack.c.bf16 %v626_v55, %v626_v55  ;;  %v624_v1 = vmax.f32 %v592_v56, 0.0  ;;  %v597_v2 = vadd.f32 %v1138_v20, %v558_v57  ;;  %v556_v3 = vmul.f32 %v1133_v18, %v482_v63  ;;  %v991_v4 = vpop.f32.mrf.mxu0 }
  0xdd   : > { %771 = vst.msk [vmem:[%s1153_s30 + $0xc] sm:$0xf] %vm767_vm2, %v936_v59  ;;  %v934_v5 = vpack.c.bf16 %v608_v60, %v608_v60  ;;  %v613_v6 = vmax.f32 %v581_v61, 0.0  ;;  %v579_v7 = vadd.f32 %v1138_v20, %v540_v62  ;;  %v543_v8 = vmul.f32 %v991_v4, %v1133_v18  ;;  %v1007_v9 = vpop.f32.mrf.mxu1 }
  0xde   : > { %787 = vst.msk [vmem:[%s1153_s30 + $0x4c] sm:$0xf] %vm767_vm2, %v952_v0  ;;  %v950_v10 = vpack.c.bf16 %v624_v1, %v624_v1  ;;  %v629_v11 = vmax.f32 %v597_v2, 0.0  ;;  %v595_v12 = vadd.f32 %v1138_v20, %v556_v3  ;;  %v559_v13 = vmul.f32 %v1007_v9, %v1133_v18  ;;  %v421_v14 = vpop.f32.mrf.mxu0 }
  0xdf   : > { %769 = vst.msk [vmem:[%s1153_s30 + $0x4] sm:$0xf] %vm767_vm2, %v934_v5  ;;  %v939_v15 = vpack.c.bf16 %v613_v6, %v613_v6  ;;  %v611_v16 = vmax.f32 %v579_v7, 0.0  ;;  %v582_v17 = vadd.f32 %v1138_v20, %v543_v8  ;;  %v541_v19 = vmul.f32 %v1133_v18, %v421_v14  ;;  %v485_v21 = vpop.f32.mrf.mxu1 }
  0xe0   : > { %785 = vst.msk [vmem:[%s1153_s30 + $0x44] sm:$0xf] %vm767_vm2, %v950_v10  ;;  %v955_v22 = vpack.c.bf16 %v629_v11, %v629_v11  ;;  %v627_v23 = vmax.f32 %v595_v12, 0.0  ;;  %v598_v24 = vadd.f32 %v1138_v20, %v559_v13  ;;  %v557_v25 = vmul.f32 %v1133_v18, %v485_v21  ;;  %v994_v26 = vpop.f32.mrf.mxu0 }
  0xe1   : > { %774 = vst.msk [vmem:[%s1153_s30 + $0x18] sm:$0xf] %vm767_vm2, %v939_v15  ;;  %v937_v27 = vpack.c.bf16 %v611_v16, %v611_v16  ;;  %v614_v28 = vmax.f32 %v582_v17, 0.0  ;;  %v580_v29 = vadd.f32 %v1138_v20, %v541_v19  ;;  %v546_v30 = vmul.f32 %v994_v26, %v1133_v18  ;;  %v1010_v31 = vpop.f32.mrf.mxu1 }
  0xe2   : > { %790 = vst.msk [vmem:[%s1153_s30 + $0x58] sm:$0xf] %vm767_vm2, %v955_v22  ;;  %v953_v32 = vpack.c.bf16 %v627_v23, %v627_v23  ;;  %v630_v33 = vmax.f32 %v598_v24, 0.0  ;;  %v596_v34 = vadd.f32 %v1138_v20, %v557_v25  ;;  %v562_v35 = vmul.f32 %v1010_v31, %v1133_v18  ;;  %v434_v36 = vpop.f32.mrf.mxu0 }
  0xe3   : > { %772 = vst.msk [vmem:[%s1153_s30 + $0x10] sm:$0xf] %vm767_vm2, %v937_v27  ;;  %v940_v37 = vpack.c.bf16 %v614_v28, %v614_v28  ;;  %v612_v38 = vmax.f32 %v580_v29, 0.0  ;;  %v585_v39 = vadd.f32 %v1138_v20, %v546_v30  ;;  %v544_v40 = vmul.f32 %v1133_v18, %v434_v36  ;;  %v498_v41 = vpop.f32.mrf.mxu1 }
  0xe4   : > { %788 = vst.msk [vmem:[%s1153_s30 + $0x50] sm:$0xf] %vm767_vm2, %v953_v32  ;;  %v956_v42 = vpack.c.bf16 %v630_v33, %v630_v33  ;;  %v628_v43 = vmax.f32 %v596_v34, 0.0  ;;  %v601_v44 = vadd.f32 %v1138_v20, %v562_v35  ;;  %v560_v45 = vmul.f32 %v1133_v18, %v498_v41  ;;  %v995_v46 = vpop.f32.mrf.mxu0 }
  0xe5   : > { %775 = vst.msk [vmem:[%s1153_s30 + $0x1c] sm:$0xf] %vm767_vm2, %v940_v37  ;;  %v938_v47 = vpack.c.bf16 %v612_v38, %v612_v38  ;;  %v617_v48 = vmax.f32 %v585_v39, 0.0  ;;  %v583_v49 = vadd.f32 %v1138_v20, %v544_v40  ;;  %v547_v50 = vmul.f32 %v995_v46, %v1133_v18  ;;  %v1011_v51 = vpop.f32.mrf.mxu1 }
  0xe6   : > { %791 = vst.msk [vmem:[%s1153_s30 + $0x5c] sm:$0xf] %vm767_vm2, %v956_v42  ;;  %v954_v52 = vpack.c.bf16 %v628_v43, %v628_v43  ;;  %v633_v53 = vmax.f32 %v601_v44, 0.0  ;;  %v599_v54 = vadd.f32 %v1138_v20, %v560_v45  ;;  %v563_v55 = vmul.f32 %v1011_v51, %v1133_v18  ;;  %v437_v56 = vpop.f32.mrf.mxu0 }
  0xe7   : > { %773 = vst.msk [vmem:[%s1153_s30 + $0x14] sm:$0xf] %vm767_vm2, %v938_v47  ;;  %v943_v57 = vpack.c.bf16 %v617_v48, %v617_v48  ;;  %v615_v58 = vmax.f32 %v583_v49, 0.0  ;;  %v586_v59 = vadd.f32 %v1138_v20, %v547_v50  ;;  %v545_v60 = vmul.f32 %v1133_v18, %v437_v56  ;;  %v501_v61 = vpop.f32.mrf.mxu1 }
  0xe8   : > { %789 = vst.msk [vmem:[%s1153_s30 + $0x54] sm:$0xf] %vm767_vm2, %v954_v52  ;;  %v959_v62 = vpack.c.bf16 %v633_v53, %v633_v53  ;;  %v631_v63 = vmax.f32 %v599_v54, 0.0  ;;  %v602_v0 = vadd.f32 %v1138_v20, %v563_v55  ;;  %v561_v1 = vmul.f32 %v1133_v18, %v501_v61  ;;  %v998_v2 = vpop.f32.mrf.mxu0 }
  0xe9   : > { %778 = vst.msk [vmem:[%s1153_s30 + $0x28] sm:$0xf] %vm767_vm2, %v943_v57  ;;  %v941_v3 = vpack.c.bf16 %v615_v58, %v615_v58  ;;  %v618_v4 = vmax.f32 %v586_v59, 0.0  ;;  %v584_v5 = vadd.f32 %v1138_v20, %v545_v60  ;;  %v550_v6 = vmul.f32 %v998_v2, %v1133_v18  ;;  %v1014_v7 = vpop.f32.mrf.mxu1 }
  0xea   : > { %794 = vst.msk [vmem:[%s1153_s30 + $0x68] sm:$0xf] %vm767_vm2, %v959_v62  ;;  %v957_v8 = vpack.c.bf16 %v631_v63, %v631_v63  ;;  %v634_v9 = vmax.f32 %v602_v0, 0.0  ;;  %v600_v10 = vadd.f32 %v1138_v20, %v561_v1  ;;  %v566_v11 = vmul.f32 %v1014_v7, %v1133_v18  ;;  %v450_v12 = vpop.f32.mrf.mxu0 }
  0xeb   : > { %776 = vst.msk [vmem:[%s1153_s30 + $0x20] sm:$0xf] %vm767_vm2, %v941_v3  ;;  %v944_v13 = vpack.c.bf16 %v618_v4, %v618_v4  ;;  %v616_v14 = vmax.f32 %v584_v5, 0.0  ;;  %v589_v15 = vadd.f32 %v1138_v20, %v550_v6  ;;  %v548_v16 = vmul.f32 %v1133_v18, %v450_v12  ;;  %v514_v17 = vpop.f32.mrf.mxu1 }
  0xec   : > { %792 = vst.msk [vmem:[%s1153_s30 + $0x60] sm:$0xf] %vm767_vm2, %v957_v8  ;;  %v960_v19 = vpack.c.bf16 %v634_v9, %v634_v9  ;;  %v632_v21 = vmax.f32 %v600_v10, 0.0  ;;  %v605_v22 = vadd.f32 %v1138_v20, %v566_v11  ;;  %v564_v23 = vmul.f32 %v1133_v18, %v514_v17  ;;  %v999_v24 = vpop.f32.mrf.mxu0 }
  0xed   : > { %779 = vst.msk [vmem:[%s1153_s30 + $0x2c] sm:$0xf] %vm767_vm2, %v944_v13  ;;  %v942_v25 = vpack.c.bf16 %v616_v14, %v616_v14  ;;  %v621_v26 = vmax.f32 %v589_v15, 0.0  ;;  %v587_v27 = vadd.f32 %v1138_v20, %v548_v16  ;;  %v551_v28 = vmul.f32 %v999_v24, %v1133_v18  ;;  %v1015_v29 = vpop.f32.mrf.mxu1 }
  0xee   : > { %795 = vst.msk [vmem:[%s1153_s30 + $0x6c] sm:$0xf] %vm767_vm2, %v960_v19  ;;  %v958_v30 = vpack.c.bf16 %v632_v21, %v632_v21  ;;  %v637_v31 = vmax.f32 %v605_v22, 0.0  ;;  %v603_v32 = vadd.f32 %v1138_v20, %v564_v23  ;;  %v567_v33 = vmul.f32 %v1015_v29, %v1133_v18  ;;  %v453_v34 = vpop.f32.mrf.mxu0 }
  0xef   : > { %777 = vst.msk [vmem:[%s1153_s30 + $0x24] sm:$0xf] %vm767_vm2, %v942_v25  ;;  %v947_v35 = vpack.c.bf16 %v621_v26, %v621_v26  ;;  %v619_v36 = vmax.f32 %v587_v27, 0.0  ;;  %v590_v37 = vadd.f32 %v1138_v20, %v551_v28  ;;  %v549_v38 = vmul.f32 %v1133_v18, %v453_v34  ;;  %v517_v39 = vpop.f32.mrf.mxu1 }
  0xf0   : > { %793 = vst.msk [vmem:[%s1153_s30 + $0x64] sm:$0xf] %vm767_vm2, %v958_v30  ;;  %v963_v40 = vpack.c.bf16 %v637_v31, %v637_v31  ;;  %v635_v41 = vmax.f32 %v603_v32, 0.0  ;;  %v606_v42 = vadd.f32 %v1138_v20, %v567_v33  ;;  %v565_v43 = vmul.f32 %v1133_v18, %v517_v39 }
  0xf1   : > { %782 = vst.msk [vmem:[%s1153_s30 + $0x38] sm:$0xf] %vm767_vm2, %v947_v35  ;;  %v945_v44 = vpack.c.bf16 %v619_v36, %v619_v36  ;;  %v622_v45 = vmax.f32 %v590_v37, 0.0  ;;  %v588_v46 = vadd.f32 %v1138_v20, %v549_v38 }
  0xf2   : > { %798 = vst.msk [vmem:[%s1153_s30 + $0x78] sm:$0xf] %vm767_vm2, %v963_v40  ;;  %v961_v47 = vpack.c.bf16 %v635_v41, %v635_v41  ;;  %v638_v48 = vmax.f32 %v606_v42, 0.0  ;;  %v604_v49 = vadd.f32 %v1138_v20, %v565_v43 }
  0xf3   : > { %780 = vst.msk [vmem:[%s1153_s30 + $0x30] sm:$0xf] %vm767_vm2, %v945_v44  ;;  %v948_v50 = vpack.c.bf16 %v622_v45, %v622_v45  ;;  %v620_v51 = vmax.f32 %v588_v46, 0.0 }
  0xf4   : > { %796 = vst.msk [vmem:[%s1153_s30 + $0x70] sm:$0xf] %vm767_vm2, %v961_v47  ;;  %v964_v18 = vpack.c.bf16 %v638_v48, %v638_v48  ;;  %v636_v52 = vmax.f32 %v604_v49, 0.0 }
  0xf5   : > { %783 = vst.msk [vmem:[%s1153_s30 + $0x3c] sm:$0xf] %vm767_vm2, %v948_v50  ;;  %v946_v53 = vpack.c.bf16 %v620_v51, %v620_v51 }
  0xf6   : > { %799 = vst.msk [vmem:[%s1153_s30 + $0x7c] sm:$0xf] %vm767_vm2, %v964_v18  ;;  %v962_v54 = vpack.c.bf16 %v636_v52, %v636_v52 }
  0xf7   : > { %781 = vst.msk [vmem:[%s1153_s30 + $0x34] sm:$0xf] %vm767_vm2, %v946_v53 }
  0xf8   : > { %797 = vst.msk [vmem:[%s1153_s30 + $0x74] sm:$0xf] %vm767_vm2, %v962_v54 }
  0xf9 PF: > { %s14_s15 = sadd.s32 1, %s1050_s15  }
  0xfa   : > { %p11_p4 = scmp.ge.s32.totalorder %s14_s15, 4  }
  0xfc   :  { %13 = sbr.rel (!%p11_p4) target bundleno = 1 (0x1), region = 66 }

// kernel: reverse.11
= control target key start
LH: loop header
LB: loop body
LE: loop exit
PB: predicated region body
PF: predicated region fallthrough
CT: control target
= control target key end

     0   :  { %v82_v8 = vld [vmem:[#allocation1 + $0x38] sm:$0xf]  ;;  %v92_v9 = vld [vmem:[#allocation1 + $0x30] sm:$0xf]  ;;  %v102_v10 = vld [vmem:[#allocation1 + $0x28] sm:$0xf]  ;;  %v159_v12 = vlaneseq  ;;  %s501_s0 = inlined_call_operand.vmem [shape: f32[2,4,8,3], index: 0, kind: input, shape index: {}]   ;;  %s502_s1 = inlined_call_operand.vmem [shape: f32[2,4,8,3], index: 1, kind: output, shape index: {}]  }
   0x1   :  { %v19_v0 = vld [vmem:[%s501_s0] sm:$0xf]  ;;  %v21_v1 = vld [vmem:[%s501_s0 + $0x4] sm:$0xf]  ;;  %v23_v2 = vld [vmem:[%s501_s0 + $0x8] sm:$0xf] }
   0x2   :  { %20 = vst [vmem:[#allocation1 + $0x4] sm:$0xf] %v19_v0  ;;  %22 = vst [vmem:[#allocation1 + $0xc] sm:$0xf] %v21_v1  ;;  %v25_v3 = vld [vmem:[%s501_s0 + $0xc] sm:$0xf] }
   0x3   :  { %24 = vst [vmem:[#allocation1 + $0x14] sm:$0xf] %v23_v2  ;;  %v27_v4 = vld [vmem:[%s501_s0 + $0x10] sm:$0xf]  ;;  %v29_v5 = vld [vmem:[%s501_s0 + $0x14] sm:$0xf] }
   0x4   :  { %26 = vst [vmem:[#allocation1 + $0x1c] sm:$0xf] %v25_v3  ;;  %28 = vst [vmem:[#allocation1 + $0x24] sm:$0xf] %v27_v4  ;;  %v31_v6 = vld [vmem:[%s501_s0 + $0x18] sm:$0xf] }
   0x5   :  { %30 = vst [vmem:[#allocation1 + $0x2c] sm:$0xf] %v29_v5  ;;  %v33_v7 = vld [vmem:[%s501_s0 + $0x1c] sm:$0xf]  ;;  %32 = vst [vmem:[#allocation1 + $0x34] sm:$0xf] %v31_v6 }
   0x6   :  { %34 = vst [vmem:[#allocation1 + $0x3c] sm:$0xf] %v33_v7  ;;  %84 = vst [vmem:[#allocation0 + $0x70] sm:$0xf] %v82_v8  ;;  %v112_v11 = vld [vmem:[#allocation1 + $0x20] sm:$0xf] }
   0x7   :  { %94 = vst [vmem:[#allocation0 + $0x60] sm:$0xf] %v92_v9  ;;  %104 = vst [vmem:[#allocation0 + $0x50] sm:$0xf] %v102_v10  ;;  %v122_v13 = vld [vmem:[#allocation1 + $0x18] sm:$0xf] }
   0x8   :  { %114 = vst [vmem:[#allocation0 + $0x40] sm:$0xf] %v112_v11  ;;  %v132_v14 = vld [vmem:[#allocation1 + $0x10] sm:$0xf]  ;;  %v142_v15 = vld [vmem:[#allocation1 + $0x8] sm:$0xf] }
   0x9   :  { %124 = vst [vmem:[#allocation0 + $0x30] sm:$0xf] %v122_v13  ;;  %134 = vst [vmem:[#allocation0 + $0x20] sm:$0xf] %v132_v14  ;;  %v149_v16 = vld [vmem:[#allocation1] sm:$0xf] }
   0xa   :  { %144 = vst [vmem:[#allocation0 + $0x10] sm:$0xf] %v142_v15  ;;  %150 = vst [vmem:[#allocation0] sm:$0xf] %v149_v16  ;;  %v470_v17 = vshrl.u32 %v159_v12, 7 }
   0xb   :  { %v127_v18 = vld [vmem:[#allocation1 + $0x14] sm:$0xf]  ;;  %v137_v19 = vld [vmem:[#allocation1 + $0xc] sm:$0xf]  ;;  %v146_v20 = vld [vmem:[#allocation1 + $0x4] sm:$0xf] }
   0xc   :  { %v97_v21 = vld [vmem:[#allocation1 + $0x2c] sm:$0xf]  ;;  %v107_v22 = vld [vmem:[#allocation1 + $0x24] sm:$0xf]  ;;  %v117_v23 = vld [vmem:[#allocation1 + $0x1c] sm:$0xf] }
   0xd   :  { %129 = vst [vmem:[#allocation0 + $0x28] sm:$0xf] %v127_v18  ;;  %139 = vst [vmem:[#allocation0 + $0x18] sm:$0xf] %v137_v19  ;;  %v77_v24 = vld [vmem:[#allocation1 + $0x3c] sm:$0xf] }
   0xe   :  { %148 = vst [vmem:[#allocation0 + $0x8] sm:$0xf] %v146_v20  ;;  %v87_v25 = vld [vmem:[#allocation1 + $0x34] sm:$0xf]  ;;  %99 = vst [vmem:[#allocation0 + $0x58] sm:$0xf] %v97_v21 }
   0xf   :  { %109 = vst [vmem:[#allocation0 + $0x48] sm:$0xf] %v107_v22  ;;  %119 = vst [vmem:[#allocation0 + $0x38] sm:$0xf] %v117_v23  ;;  %v250_v26 = vld [vmem:[#allocation0 + $0x77] ss:$-1 sm:$0xff] }
  0x10   :  { %79 = vst [vmem:[#allocation0 + $0x78] sm:$0xf] %v77_v24  ;;  %89 = vst [vmem:[#allocation0 + $0x68] sm:$0xf] %v87_v25  ;;  %v208_v27 = vld [vmem:[#allocation0 + $0x47] ss:$-1 sm:$0xff] }
  0x11   :  { %v222_v28 = vld [vmem:[#allocation0 + $0x57] ss:$-1 sm:$0xff]  ;;  %v236_v29 = vld [vmem:[#allocation0 + $0x67] ss:$-1 sm:$0xff]  ;;  %v209_v37 = vrot.slane %v208_v27, 5  ;;  %v251_v41 = vrot.slane %v250_v26, 5 }
  0x12   :  { %v166_v30 = vld [vmem:[#allocation0 + $0x17] ss:$-1 sm:$0xff]  ;;  %v180_v31 = vld [vmem:[#allocation0 + $0x27] ss:$-1 sm:$0xff]  ;;  %v223_v39 = vrot.slane %v222_v28, 5  ;;  %v237_v40 = vrot.slane %v236_v29, 5 }
  0x13   :  { %v194_v32 = vld [vmem:[#allocation0 + $0x37] ss:$-1 sm:$0xff]  ;;  %v152_v33 = vld [vmem:[#allocation0 + $0x7] ss:$-1 sm:$0xff]  ;;  %v167_v34 = vrot.slane %v166_v30, 5  ;;  %v181_v35 = vrot.slane %v180_v31, 5 }
  0x14   :  { %v195_v36 = vrot.slane %v194_v32, 5  ;;  %v153_v38 = vrot.slane %v152_v33, 5  ;;  %vm161_vm0 = vcmp.lt.s32.totalorder %v470_v17, 3  ;;  %210 = vst [vmem:[#allocation2 + $0x20] sm:$0xff] %v209_v37  ;;  %v171_v43 = vld [vmem:[#allocation0 + $0x1f] ss:$-1 sm:$0xff] }
  0x15   :  { %168 = vst [vmem:[#allocation2 + $0x8] sm:$0xff] %v167_v34  ;;  %182 = vst [vmem:[#allocation2 + $0x10] sm:$0xff] %v181_v35  ;;  %v157_v42 = vld [vmem:[#allocation0 + $0xf] ss:$-1 sm:$0xff]  ;;  %v172_v46 = vrot.slane %v171_v43, 5 }
  0x16   :  { %196 = vst [vmem:[#allocation2 + $0x18] sm:$0xff] %v195_v36  ;;  %154 = vst [vmem:[#allocation2] sm:$0xff] %v153_v38  ;;  %v185_v44 = vld [vmem:[#allocation0 + $0x2f] ss:$-1 sm:$0xff]  ;;  %v158_v45 = vrot.slane %v157_v42, 5 }
  0x17   :  { %224 = vst [vmem:[#allocation2 + $0x28] sm:$0xff] %v223_v39  ;;  %238 = vst [vmem:[#allocation2 + $0x30] sm:$0xff] %v237_v40  ;;  %v186_v47 = vrot.slane %v185_v44, 5  ;;  %v199_v48 = vld [vmem:[#allocation0 + $0x3f] ss:$-1 sm:$0xff] }
  0x18   :  { %252 = vst [vmem:[#allocation2 + $0x38] sm:$0xff] %v251_v41  ;;  %v200_v49 = vrot.slane %v199_v48, 5  ;;  %v213_v50 = vld [vmem:[#allocation0 + $0x4f] ss:$-1 sm:$0xff]  ;;  %v227_v51 = vld [vmem:[#allocation0 + $0x5f] ss:$-1 sm:$0xff] }
  0x19   :  { %162 = vst.msk [vmem:[#allocation2] sm:$0xff] %vm161_vm0, %v158_v45  ;;  %176 = vst.msk [vmem:[#allocation2 + $0x8] sm:$0xff] %vm161_vm0, %v172_v46  ;;  %v214_v52 = vrot.slane %v213_v50, 5  ;;  %v228_v53 = vrot.slane %v227_v51, 5  ;;  %v241_v54 = vld [vmem:[#allocation0 + $0x6f] ss:$-1 sm:$0xff] }
  0x1a   :  { %190 = vst.msk [vmem:[#allocation2 + $0x10] sm:$0xff] %vm161_vm0, %v186_v47  ;;  %v255_v55 = vld [vmem:[#allocation0 + $0x7f] ss:$-1 sm:$0xff]  ;;  %204 = vst.msk [vmem:[#allocation2 + $0x18] sm:$0xff] %vm161_vm0, %v200_v49  ;;  %v242_v56 = vrot.slane %v241_v54, 5 }
  0x1b   :  { %v256_v57 = vrot.slane %v255_v55, 5  ;;  %218 = vst.msk [vmem:[#allocation2 + $0x20] sm:$0xff] %vm161_vm0, %v214_v52  ;;  %232 = vst.msk [vmem:[#allocation2 + $0x28] sm:$0xff] %vm161_vm0, %v228_v53 }
  0x1c   :  { %246 = vst.msk [vmem:[#allocation2 + $0x30] sm:$0xff] %vm161_vm0, %v242_v56 }
  0x1d   :  { %260 = vst.msk [vmem:[#allocation2 + $0x38] sm:$0xff] %vm161_vm0, %v256_v57 }
  0x20   :  { %v265_v58 = vld [vmem:[#allocation2] sm:$0xf]  ;;  %v270_v59 = vld [vmem:[#allocation2 + $0x8] sm:$0xf] }
  0x21   :  { %v276_v60 = vld [vmem:[#allocation2 + $0x10] sm:$0xf]  ;;  %268 = vst [vmem:[#allocation3] sm:$0xf] %v265_v58  ;;  %274 = vst [vmem:[#allocation3 + $0x4] sm:$0xf] %v270_v59 }
  0x22   :  { %281 = vst [vmem:[#allocation3 + $0x8] sm:$0xf] %v276_v60  ;;  %v283_v61 = vld [vmem:[#allocation2 + $0x18] sm:$0xf]  ;;  %v290_v62 = vld [vmem:[#allocation2 + $0x20] sm:$0xf] }
  0x23   :  { %288 = vst [vmem:[#allocation3 + $0xc] sm:$0xf] %v283_v61  ;;  %v297_v63 = vld [vmem:[#allocation2 + $0x28] sm:$0xf]  ;;  %295 = vst [vmem:[#allocation3 + $0x10] sm:$0xf] %v290_v62 }
  0x24   :  { %302 = vst [vmem:[#allocation3 + $0x14] sm:$0xf] %v297_v63  ;;  %v304_v0 = vld [vmem:[#allocation2 + $0x30] sm:$0xf]  ;;  %v311_v1 = vld [vmem:[#allocation2 + $0x38] sm:$0xf] }
  0x25   :  { %309 = vst [vmem:[#allocation3 + $0x18] sm:$0xf] %v304_v0  ;;  %316 = vst [vmem:[#allocation3 + $0x1c] sm:$0xf] %v311_v1 }
  0x28   :  { %v333_v2 = vld [vmem:[#allocation3] sm:$0xff]  }
  0x29   :  { %334 = vst [vmem:[%s502_s1] sm:$0xff] %v333_v2  }
  0x2a   :  { %v337_v3 = vld [vmem:[#allocation3 + $0x8] sm:$0xff]  }
  0x2b   :  { %338 = vst [vmem:[%s502_s1 + $0x8] sm:$0xff] %v337_v3   ;;  %v341_v4 = vld [vmem:[#allocation3 + $0x10] sm:$0xff]  }
  0x2c   :  { %342 = vst [vmem:[%s502_s1 + $0x10] sm:$0xff] %v341_v4   ;;  %v345_v5 = vld [vmem:[#allocation3 + $0x18] sm:$0xff]  }
  0x2d   :  { %346 = vst [vmem:[%s502_s1 + $0x18] sm:$0xff] %v345_v5  }

// kernel: basic_block.15
= control target key start
LH: loop header
LB: loop body
LE: loop exit
PB: predicated region body
PF: predicated region fallthrough
CT: control target
= control target key end

     0   :  { %s498_s15 = smov 0   ;;  %s532_s0 = inlined_call_operand.vmem [shape: bf16[80,8], index: 0, kind: input, shape index: {}]   ;;  %s533_s1 = inlined_call_operand.vmem [shape: bf16[8,8], index: 1, kind: input, shape index: {}]   ;;  %s534_s2 = inlined_call_operand.vmem [shape: f32[1,8], index: 2, kind: input, shape index: {}]   ;;  %s535_s3 = inlined_call_operand.vmem [shape: f32[1,8], index: 3, kind: input, shape index: {}]   ;;  %s536_s4 = inlined_call_operand.vmem [shape: bf16[80,8], index: 4, kind: output, shape index: {}]  }
   0x1 LB: > { %s403_s16 = sadd.s32 4294967295, %s469_s15   ;;  %p407_p0 = scmp.ge.s32.totalorder %s469_s15, 1  ;;  %s469_s15 = sphi %s498_s15, %s14_s15  }
   0x2   : > { %p163_p1 = scmp.lt.s32.totalorder %s469_s15, 3 }
   0x4   : > { %p164_p2 = pnand %p407_p0, %p163_p1 }
   0x5   : > { %s189_s19 = smul.u32 (!%p164_p2), 5, %s403_s16 }
   0x6   : > { %167 = sbr.rel (%p164_p2) target bundleno = 226 (0xe2), region = 36 }
   0x7   : > { %p190_p3 = scmp.lt.s32.totalorder (!%p164_p2), %s189_s19, 9 }
   0xb   : > { %v207_v0 = vld [vmem:[%s533_s1] sm:$0xf]  ;;  %vm231_vm0 = vcmask 1043456   ;;  %v471_v1 = vmov 0.0   ;;  %vm472_vm1 = vmmov 0   ;;  %s538_s19 = smov (!%p190_p3, %s189_s19), 9 }
   0xc   : > { %434 = vmatprep.subr.bf16.mxu0 %v471_v1  ;;  %448 = vmatprep.subr.bf16.mxu1 %v471_v1  ;;  %v233_v2 = vsel %vm231_vm0, %v207_v0, 0  ;;  %s408_s20 = sshll.u32 %s538_s19, 2  ;;  %vm221_vm2 = vcmask 64512   ;;  %v416_v6 = vld [vmem:[%s534_s2] ss:$0 sm:$0xff]  ;;  %vm341_vm3 = vcmask 60416  }
   0xd   : > { %435 = vmatpush3.bf16.msra.mxu0 %v233_v2  ;;  %449 = vmatpush3.bf16.msra.mxu1 %v233_v2  ;;  %s193_s23 = scalar_lea.vmem %s532_s0, %s408_s20  ;;  %v417_v9 = vld [vmem:[%s535_s3] ss:$0 sm:$0xff]  ;;  %s199_s30 = scalar_lea.vmem %s536_s4, %s408_s20 }
   0xe   : > { %436 = vmatprep.mubr.msk.bf16.mxu0 %vm472_vm1, %v471_v1  ;;  %440 = vmatprep.mubr.msk.bf16.mxu1 %vm472_vm1, %v471_v1  ;;  %v460_v3 = vld [vmem:[%s193_s23] sm:$0xff]   ;;  %v461_v4 = vld [vmem:[%s193_s23 + $0x8] sm:$0xff]   ;;  %v462_v5 = vld [vmem:[%s193_s23 + $0x10] ss:$0 sps:$4 sm:$0xff]  }
  0x10   : > { %437 = vmatmul.mubr.msk.bf16.vlgmr.msra.gmra.mxu0 %vm221_vm2, %v460_v3  ;;  %441 = vmatmul.mubr.msk.bf16.vlgmr.msra.gmra.mxu1 %vm221_vm2, %v461_v4 }
  0x11   : > { %444 = vmatprep.mubr.msk.bf16.mxu1 %vm472_vm1, %v471_v1 }
  0x18   : > { %445 = vmatmul.mubr.msk.bf16.gmra.mxu1 %vm221_vm2, %v462_v5 }
  0xd0   : > { %v269_v7 = vpop.f32.mrf.mxu0  ;;  %v277_v10 = vpop.f32.mrf.mxu1 }
  0xd1   : > { %v298_v8 = vmul.f32 %v416_v6, %v269_v7  ;;  %v300_v11 = vmul.f32 %v416_v6, %v277_v10 }
  0xd2   : > { %v438_v12 = vpop.f32.mrf.mxu0  ;;  %v442_v14 = vpop.f32.mrf.mxu1 }
  0xd3   : > { %v310_v13 = vadd.f32 %v417_v9, %v298_v8  ;;  %v312_v15 = vadd.f32 %v417_v9, %v300_v11 }
  0xd4   : > { %v272_v16 = vpop.f32.mrf.mxu0  ;;  %v280_v19 = vpop.f32.mrf.mxu1 }
  0xd5   : > { %v315_v17 = vmax.f32 %v310_v13, 0.0  ;;  %v299_v18 = vmul.f32 %v416_v6, %v272_v16  ;;  %v317_v20 = vmax.f32 %v312_v15, 0.0  ;;  %v301_v21 = vmul.f32 %v416_v6, %v280_v19 }
  0xd6   : > { %v439_v22 = vpop.f32.mrf.mxu0  ;;  %v443_v25 = vpop.f32.mrf.mxu1 }
  0xd7   : > { %v425_v23 = vpack.c.bf16 %v315_v17, %v315_v17  ;;  %v311_v24 = vadd.f32 %v417_v9, %v299_v18  ;;  %v427_v26 = vpack.c.bf16 %v317_v20, %v317_v20  ;;  %v313_v27 = vadd.f32 %v417_v9, %v301_v21 }
  0xd8   : > { %v285_v29 = vpop.f32.mrf.mxu1 }
  0xd9   : > { %342 = vst.msk [vmem:[%s199_s30] sm:$0xf] %vm341_vm3, %v425_v23  ;;  %v316_v28 = vmax.f32 %v311_v24, 0.0  ;;  %344 = vst.msk [vmem:[%s199_s30 + $0x8] sm:$0xf] %vm341_vm3, %v427_v26  ;;  %v318_v30 = vmax.f32 %v313_v27, 0.0  ;;  %v302_v31 = vmul.f32 %v416_v6, %v285_v29 }
  0xda   : > { %v446_v33 = vpop.f32.mrf.mxu1 }
  0xdb   : > { %v426_v32 = vpack.c.bf16 %v316_v28, %v316_v28  ;;  %v428_v34 = vpack.c.bf16 %v318_v30, %v318_v30  ;;  %v314_v35 = vadd.f32 %v417_v9, %v302_v31 }
  0xdc   : > { %v288_v36 = vpop.f32.mrf.mxu1 }
  0xdd   : > { %343 = vst.msk [vmem:[%s199_s30 + $0x4] sm:$0xf] %vm341_vm3, %v426_v32  ;;  %345 = vst.msk [vmem:[%s199_s30 + $0xc] sm:$0xf] %vm341_vm3, %v428_v34  ;;  %v319_v37 = vmax.f32 %v314_v35, 0.0 }
  0xde   : > { %v447_v38 = vpop.f32.mrf.mxu1 }
  0xdf   : > { %v429_v39 = vpack.c.bf16 %v319_v37, %v319_v37 }
  0xe1   : > { %346 = vst.msk [vmem:[%s199_s30 + $0x10] sm:$0xf] %vm341_vm3, %v429_v39 }
  0xe2 PF: > { %s14_s15 = sadd.s32 1, %s469_s15  }
  0xe3   : > { %p11_p4 = scmp.ge.s32.totalorder %s14_s15, 4  }
  0xe5   :  { %13 = sbr.rel (!%p11_p4) target bundleno = 1 (0x1), region = 66 }

// kernel: reverse.9
= control target key start
LH: loop header
LB: loop body
LE: loop exit
PB: predicated region body
PF: predicated region fallthrough
CT: control target
= control target key end

     0   :  { %v72_v3 = vlaneseq  ;;  %v65_v9 = vld [vmem:[#allocation0 + $0x7] ss:$-1 sm:$0xff]  ;;  %v79_v12 = vld [vmem:[#allocation0 + $0x17] ss:$-1 sm:$0xff]  ;;  %s331_s0 = inlined_call_operand.vmem [shape: f32[2,4,16,7], index: 0, kind: input, shape index: {}]   ;;  %s332_s1 = inlined_call_operand.vmem [shape: f32[2,4,16,7], index: 1, kind: output, shape index: {}]  }
   0x1   :  { %v45_v0 = vld [vmem:[%s331_s0] sm:$0xff]  ;;  %v47_v1 = vld [vmem:[%s331_s0 + $0x8] sm:$0xff]  ;;  %v49_v2 = vld [vmem:[%s331_s0 + $0x10] sm:$0xff]  ;;  %v66_v10 = vrot.slane %v65_v9, 1  ;;  %v80_v14 = vrot.slane %v79_v12, 1 }
   0x2   :  { %46 = vst [vmem:[#allocation0 + $0x8] sm:$0xff] %v45_v0  ;;  %48 = vst [vmem:[#allocation0 + $0x18] sm:$0xff] %v47_v1  ;;  %v51_v4 = vld [vmem:[%s331_s0 + $0x18] sm:$0xff]  ;;  %v53_v5 = vld [vmem:[%s331_s0 + $0x20] sm:$0xff]  ;;  %v73_v11 = vshrl.u32 %v72_v3, 7 }
   0x3   :  { %50 = vst [vmem:[#allocation0 + $0x28] sm:$0xff] %v49_v2  ;;  %v55_v6 = vld [vmem:[%s331_s0 + $0x28] sm:$0xff]  ;;  %52 = vst [vmem:[#allocation0 + $0x38] sm:$0xff] %v51_v4  ;;  %v57_v7 = vld [vmem:[%s331_s0 + $0x30] sm:$0xff] }
   0x4   :  { %54 = vst [vmem:[#allocation0 + $0x48] sm:$0xff] %v53_v5  ;;  %56 = vst [vmem:[#allocation0 + $0x58] sm:$0xff] %v55_v6  ;;  %v59_v8 = vld [vmem:[%s331_s0 + $0x38] sm:$0xff]  ;;  %v93_v13 = vld [vmem:[#allocation0 + $0x27] ss:$-1 sm:$0xff]  ;;  %vm74_vm0 = vcmp.lt.s32.totalorder %v73_v11, 7 }
   0x5   :  { %58 = vst [vmem:[#allocation0 + $0x68] sm:$0xff] %v57_v7  ;;  %60 = vst [vmem:[#allocation0 + $0x78] sm:$0xff] %v59_v8  ;;  %v94_v15 = vrot.slane %v93_v13, 1  ;;  %v107_v16 = vld [vmem:[#allocation0 + $0x37] ss:$-1 sm:$0xff] }
   0x6   :  { %67 = vst [vmem:[#allocation1] sm:$0xff] %v66_v10  ;;  %v108_v17 = vrot.slane %v107_v16, 1  ;;  %v121_v18 = vld [vmem:[#allocation0 + $0x47] ss:$-1 sm:$0xff]  ;;  %v135_v19 = vld [vmem:[#allocation0 + $0x57] ss:$-1 sm:$0xff] }
   0x7   :  { %81 = vst [vmem:[#allocation1 + $0x8] sm:$0xff] %v80_v14  ;;  %95 = vst [vmem:[#allocation1 + $0x10] sm:$0xff] %v94_v15  ;;  %v122_v20 = vrot.slane %v121_v18, 1  ;;  %v136_v21 = vrot.slane %v135_v19, 1  ;;  %v149_v22 = vld [vmem:[#allocation0 + $0x67] ss:$-1 sm:$0xff] }
   0x8   :  { %v163_v23 = vld [vmem:[#allocation0 + $0x77] ss:$-1 sm:$0xff]  ;;  %109 = vst [vmem:[#allocation1 + $0x18] sm:$0xff] %v108_v17  ;;  %v150_v24 = vrot.slane %v149_v22, 1 }
   0x9   :  { %v164_v25 = vrot.slane %v163_v23, 1  ;;  %v70_v26 = vld [vmem:[#allocation0 + $0xf] ss:$-1 sm:$0xff]  ;;  %v84_v27 = vld [vmem:[#allocation0 + $0x1f] ss:$-1 sm:$0xff]  ;;  %123 = vst [vmem:[#allocation1 + $0x20] sm:$0xff] %v122_v20 }
   0xa   :  { %v98_v28 = vld [vmem:[#allocation0 + $0x2f] ss:$-1 sm:$0xff]  ;;  %137 = vst [vmem:[#allocation1 + $0x28] sm:$0xff] %v136_v21  ;;  %v71_v29 = vrot.slane %v70_v26, 1  ;;  %v85_v30 = vrot.slane %v84_v27, 1  ;;  %151 = vst [vmem:[#allocation1 + $0x30] sm:$0xff] %v150_v24 }
   0xb   :  { %v99_v31 = vrot.slane %v98_v28, 1  ;;  %v112_v32 = vld [vmem:[#allocation0 + $0x3f] ss:$-1 sm:$0xff]  ;;  %165 = vst [vmem:[#allocation1 + $0x38] sm:$0xff] %v164_v25  ;;  %v126_v34 = vld [vmem:[#allocation0 + $0x4f] ss:$-1 sm:$0xff] }
   0xc   :  { %v113_v33 = vrot.slane %v112_v32, 1  ;;  %v140_v35 = vld [vmem:[#allocation0 + $0x5f] ss:$-1 sm:$0xff]  ;;  %75 = vst.msk [vmem:[#allocation1] sm:$0xff] %vm74_vm0, %v71_v29  ;;  %89 = vst.msk [vmem:[#allocation1 + $0x8] sm:$0xff] %vm74_vm0, %v85_v30  ;;  %v127_v36 = vrot.slane %v126_v34, 1 }
   0xd   :  { %103 = vst.msk [vmem:[#allocation1 + $0x10] sm:$0xff] %vm74_vm0, %v99_v31  ;;  %v141_v37 = vrot.slane %v140_v35, 1  ;;  %v154_v38 = vld [vmem:[#allocation0 + $0x6f] ss:$-1 sm:$0xff]  ;;  %v168_v39 = vld [vmem:[#allocation0 + $0x7f] ss:$-1 sm:$0xff] }
   0xe   :  { %117 = vst.msk [vmem:[#allocation1 + $0x18] sm:$0xff] %vm74_vm0, %v113_v33  ;;  %v155_v40 = vrot.slane %v154_v38, 1  ;;  %v169_v41 = vrot.slane %v168_v39, 1  ;;  %131 = vst.msk [vmem:[#allocation1 + $0x20] sm:$0xff] %vm74_vm0, %v127_v36 }
   0xf   :  { %145 = vst.msk [vmem:[#allocation1 + $0x28] sm:$0xff] %vm74_vm0, %v141_v37 }
  0x10   :  { %159 = vst.msk [vmem:[#allocation1 + $0x30] sm:$0xff] %vm74_vm0, %v155_v40  ;;  %173 = vst.msk [vmem:[#allocation1 + $0x38] sm:$0xff] %vm74_vm0, %v169_v41 }
  0x13   :  { %v216_v42 = vld [vmem:[#allocation1] sm:$0xff]  ;;  %v218_v43 = vld [vmem:[#allocation1 + $0x8] sm:$0xff] }
  0x14   :  { %v220_v44 = vld [vmem:[#allocation1 + $0x10] sm:$0xff]  ;;  %217 = vst [vmem:[%s332_s1] sm:$0xff] %v216_v42  ;;  %219 = vst [vmem:[%s332_s1 + $0x8] sm:$0xff] %v218_v43 }
  0x15   :  { %221 = vst [vmem:[%s332_s1 + $0x10] sm:$0xff] %v220_v44  ;;  %v222_v45 = vld [vmem:[#allocation1 + $0x18] sm:$0xff]  ;;  %v224_v46 = vld [vmem:[#allocation1 + $0x20] sm:$0xff] }
  0x16   :  { %223 = vst [vmem:[%s332_s1 + $0x18] sm:$0xff] %v222_v45  ;;  %v226_v47 = vld [vmem:[#allocation1 + $0x28] sm:$0xff]  ;;  %225 = vst [vmem:[%s332_s1 + $0x20] sm:$0xff] %v224_v46 }
  0x17   :  { %227 = vst [vmem:[%s332_s1 + $0x28] sm:$0xff] %v226_v47  ;;  %v228_v48 = vld [vmem:[#allocation1 + $0x30] sm:$0xff]  ;;  %v230_v49 = vld [vmem:[#allocation1 + $0x38] sm:$0xff] }
  0x18   :  { %229 = vst [vmem:[%s332_s1 + $0x30] sm:$0xff] %v228_v48  ;;  %231 = vst [vmem:[%s332_s1 + $0x38] sm:$0xff] %v230_v49 }

// kernel: basic_block.14
= control target key start
LH: loop header
LB: loop body
LE: loop exit
PB: predicated region body
PF: predicated region fallthrough
CT: control target
= control target key end

     0   :  { %s787_s15 = smov 0   ;;  %s916_s0 = inlined_call_operand.vmem [shape: bf16[288,8], index: 0, kind: input, shape index: {}]   ;;  %s917_s1 = inlined_call_operand.vmem [shape: bf16[8,8], index: 1, kind: input, shape index: {}]   ;;  %s918_s2 = inlined_call_operand.vmem [shape: f32[1,8], index: 2, kind: input, shape index: {}]   ;;  %s919_s3 = inlined_call_operand.vmem [shape: f32[1,8], index: 3, kind: input, shape index: {}]   ;;  %s920_s4 = inlined_call_operand.vmem [shape: bf16[288,8], index: 4, kind: output, shape index: {}]  }
   0x1 LB: > { %s618_s16 = sadd.s32 4294967295, %s758_s15   ;;  %p622_p0 = scmp.ge.s32.totalorder %s758_s15, 1  ;;  %s758_s15 = sphi %s787_s15, %s14_s15  }
   0x2   : > { %p163_p1 = scmp.lt.s32.totalorder %s758_s15, 3 }
   0x4   : > { %p164_p2 = pnand %p622_p0, %p163_p1 }
   0x5   : > { %s189_s19 = smul.u32 (!%p164_p2), 18, %s618_s16 }
   0x6   : > { %167 = sbr.rel (%p164_p2) target bundleno = 254 (0xfe), region = 36 }
   0x7   : > { %p190_p3 = scmp.lt.s32.totalorder (!%p164_p2), %s189_s19, 35 }
   0xb   : > { %v220_v0 = vld [vmem:[%s917_s1] sm:$0xf]  ;;  %vm294_vm0 = vcmask 1043456   ;;  %v760_v1 = vmov 0.0   ;;  %vm761_vm1 = vmmov 0   ;;  %s922_s19 = smov (!%p190_p3, %s189_s19), 35 }
   0xc   : > { %693 = vmatprep.subr.bf16.mxu0 %v760_v1  ;;  %v296_v2 = vsel %vm294_vm0, %v220_v0, 0  ;;  %731 = vmatprep.subr.bf16.mxu1 %v760_v1  ;;  %s623_s20 = sshll.u32 %s922_s19, 2  ;;  %vm266_vm2 = vcmask 64512   ;;  %v827_v12 = vld [vmem:[%s918_s2] ss:$0 sm:$0xff]  ;;  %vm543_vm3 = vcmask 60416  }
   0xd   : > { %694 = vmatpush3.bf16.msra.mxu0 %v296_v2  ;;  %732 = vmatpush3.bf16.msra.mxu1 %v296_v2  ;;  %s193_s23 = scalar_lea.vmem %s916_s0, %s623_s20  ;;  %v832_v14 = vld [vmem:[%s919_s3] ss:$0 sm:$0xff]  ;;  %s844_s30 = scalar_lea.vmem %s920_s4, %s623_s20 }
   0xe   : > { %695 = vmatprep.mubr.msk.bf16.mxu0 %vm761_vm1, %v760_v1  ;;  %715 = vmatprep.mubr.msk.bf16.mxu1 %vm761_vm1, %v760_v1  ;;  %v743_v3 = vld [vmem:[%s193_s23] sm:$0xff]   ;;  %v744_v4 = vld [vmem:[%s193_s23 + $0x28] sm:$0xff]   ;;  %v746_v6 = vld [vmem:[%s193_s23 + $0x30] sm:$0xff]  }
   0xf   : > { %v745_v5 = vld [vmem:[%s193_s23 + $0x8] sm:$0xff]   ;;  %v747_v7 = vld [vmem:[%s193_s23 + $0x10] sm:$0xff]   ;;  %v748_v8 = vld [vmem:[%s193_s23 + $0x38] sm:$0xff]  }
  0x10   : > { %696 = vmatmul.mubr.msk.bf16.vlgmr.msra.gmra.mxu0 %vm266_vm2, %v743_v3  ;;  %716 = vmatmul.mubr.msk.bf16.vlgmr.msra.gmra.mxu1 %vm266_vm2, %v744_v4  ;;  %v749_v9 = vld [vmem:[%s193_s23 + $0x18] sm:$0xff]   ;;  %v750_v10 = vld [vmem:[%s193_s23 + $0x40] sm:$0xff]  }
  0x11   : > { %699 = vmatprep.mubr.msk.bf16.mxu0 %vm761_vm1, %v760_v1  ;;  %719 = vmatprep.mubr.msk.bf16.mxu1 %vm761_vm1, %v760_v1  ;;  %v751_v11 = vld [vmem:[%s193_s23 + $0x20] sm:$0xff]  }
  0x18   : > { %700 = vmatmul.mubr.msk.bf16.gmra.mxu0 %vm266_vm2, %v745_v5  ;;  %720 = vmatmul.mubr.msk.bf16.gmra.mxu1 %vm266_vm2, %v746_v6 }
  0x19   : > { %703 = vmatprep.mubr.msk.bf16.mxu0 %vm761_vm1, %v760_v1  ;;  %723 = vmatprep.mubr.msk.bf16.mxu1 %vm761_vm1, %v760_v1 }
  0x20   : > { %704 = vmatmul.mubr.msk.bf16.gmra.mxu0 %vm266_vm2, %v747_v7  ;;  %724 = vmatmul.mubr.msk.bf16.gmra.mxu1 %vm266_vm2, %v748_v8 }
  0x21   : > { %707 = vmatprep.mubr.msk.bf16.mxu0 %vm761_vm1, %v760_v1  ;;  %727 = vmatprep.mubr.msk.bf16.mxu1 %vm761_vm1, %v760_v1 }
  0x28   : > { %708 = vmatmul.mubr.msk.bf16.gmra.mxu0 %vm266_vm2, %v749_v9  ;;  %728 = vmatmul.mubr.msk.bf16.gmra.mxu1 %vm266_vm2, %v750_v10 }
  0x29   : > { %711 = vmatprep.mubr.msk.bf16.mxu0 %vm761_vm1, %v760_v1 }
  0x30   : > { %712 = vmatmul.mubr.msk.bf16.gmra.mxu0 %vm266_vm2, %v751_v11 }
  0xd0   : > { %v332_v13 = vpop.f32.mrf.mxu0  ;;  %v372_v16 = vpop.f32.mrf.mxu1 }
  0xd1   : > { %v410_v15 = vmul.f32 %v827_v12, %v332_v13  ;;  %v420_v18 = vmul.f32 %v827_v12, %v372_v16 }
  0xd2   : > { %v697_v17 = vpop.f32.mrf.mxu0  ;;  %v717_v20 = vpop.f32.mrf.mxu1 }
  0xd3   : > { %v435_v19 = vadd.f32 %v832_v14, %v410_v15  ;;  %v445_v21 = vadd.f32 %v832_v14, %v420_v18 }
  0xd4   : > { %v335_v22 = vpop.f32.mrf.mxu0  ;;  %v375_v25 = vpop.f32.mrf.mxu1 }
  0xd5   : > { %v453_v23 = vmax.f32 %v435_v19, 0.0  ;;  %v411_v24 = vmul.f32 %v827_v12, %v335_v22  ;;  %v463_v26 = vmax.f32 %v445_v21, 0.0  ;;  %v421_v28 = vmul.f32 %v827_v12, %v375_v25 }
  0xd6   : > { %v698_v27 = vpop.f32.mrf.mxu0  ;;  %v718_v31 = vpop.f32.mrf.mxu1 }
  0xd7   : > { %v665_v29 = vpack.c.bf16 %v453_v23, %v453_v23  ;;  %v436_v30 = vadd.f32 %v832_v14, %v411_v24  ;;  %v675_v32 = vpack.c.bf16 %v463_v26, %v463_v26  ;;  %v446_v33 = vadd.f32 %v832_v14, %v421_v28 }
  0xd8   : > { %v340_v34 = vpop.f32.mrf.mxu0  ;;  %v380_v37 = vpop.f32.mrf.mxu1 }
  0xd9   : > { %544 = vst.msk [vmem:[%s844_s30] sm:$0xf] %vm543_vm3, %v665_v29  ;;  %v454_v35 = vmax.f32 %v436_v30, 0.0  ;;  %v412_v36 = vmul.f32 %v827_v12, %v340_v34  ;;  %554 = vst.msk [vmem:[%s844_s30 + $0x28] sm:$0xf] %vm543_vm3, %v675_v32  ;;  %v464_v38 = vmax.f32 %v446_v33, 0.0  ;;  %v422_v40 = vmul.f32 %v827_v12, %v380_v37 }
  0xda   : > { %v701_v39 = vpop.f32.mrf.mxu0  ;;  %v721_v43 = vpop.f32.mrf.mxu1 }
  0xdb   : > { %v666_v41 = vpack.c.bf16 %v454_v35, %v454_v35  ;;  %v437_v42 = vadd.f32 %v832_v14, %v412_v36  ;;  %v676_v44 = vpack.c.bf16 %v464_v38, %v464_v38  ;;  %v447_v45 = vadd.f32 %v832_v14, %v422_v40 }
  0xdc   : > { %v343_v46 = vpop.f32.mrf.mxu0  ;;  %v383_v49 = vpop.f32.mrf.mxu1 }
  0xdd   : > { %545 = vst.msk [vmem:[%s844_s30 + $0x4] sm:$0xf] %vm543_vm3, %v666_v41  ;;  %v455_v47 = vmax.f32 %v437_v42, 0.0  ;;  %v413_v48 = vmul.f32 %v827_v12, %v343_v46  ;;  %555 = vst.msk [vmem:[%s844_s30 + $0x2c] sm:$0xf] %vm543_vm3, %v676_v44  ;;  %v465_v50 = vmax.f32 %v447_v45, 0.0  ;;  %v423_v52 = vmul.f32 %v827_v12, %v383_v49 }
  0xde   : > { %v702_v51 = vpop.f32.mrf.mxu0  ;;  %v722_v55 = vpop.f32.mrf.mxu1 }
  0xdf   : > { %v667_v53 = vpack.c.bf16 %v455_v47, %v455_v47  ;;  %v438_v54 = vadd.f32 %v832_v14, %v413_v48  ;;  %v677_v56 = vpack.c.bf16 %v465_v50, %v465_v50  ;;  %v448_v57 = vadd.f32 %v832_v14, %v423_v52 }
  0xe0   : > { %v348_v58 = vpop.f32.mrf.mxu0  ;;  %v388_v61 = vpop.f32.mrf.mxu1 }
  0xe1   : > { %546 = vst.msk [vmem:[%s844_s30 + $0x8] sm:$0xf] %vm543_vm3, %v667_v53  ;;  %v456_v59 = vmax.f32 %v438_v54, 0.0  ;;  %v414_v60 = vmul.f32 %v827_v12, %v348_v58  ;;  %556 = vst.msk [vmem:[%s844_s30 + $0x30] sm:$0xf] %vm543_vm3, %v677_v56  ;;  %v466_v62 = vmax.f32 %v448_v57, 0.0  ;;  %v424_v0 = vmul.f32 %v827_v12, %v388_v61 }
  0xe2   : > { %v705_v63 = vpop.f32.mrf.mxu0  ;;  %v725_v3 = vpop.f32.mrf.mxu1 }
  0xe3   : > { %v668_v1 = vpack.c.bf16 %v456_v59, %v456_v59  ;;  %v439_v2 = vadd.f32 %v832_v14, %v414_v60  ;;  %v678_v4 = vpack.c.bf16 %v466_v62, %v466_v62  ;;  %v449_v5 = vadd.f32 %v832_v14, %v424_v0 }
  0xe4   : > { %v351_v6 = vpop.f32.mrf.mxu0  ;;  %v391_v9 = vpop.f32.mrf.mxu1 }
  0xe5   : > { %547 = vst.msk [vmem:[%s844_s30 + $0xc] sm:$0xf] %vm543_vm3, %v668_v1  ;;  %v457_v7 = vmax.f32 %v439_v2, 0.0  ;;  %v415_v8 = vmul.f32 %v827_v12, %v351_v6  ;;  %557 = vst.msk [vmem:[%s844_s30 + $0x34] sm:$0xf] %vm543_vm3, %v678_v4  ;;  %v467_v10 = vmax.f32 %v449_v5, 0.0  ;;  %v425_v13 = vmul.f32 %v827_v12, %v391_v9 }
  0xe6   : > { %v706_v11 = vpop.f32.mrf.mxu0  ;;  %v726_v17 = vpop.f32.mrf.mxu1 }
  0xe7   : > { %v669_v15 = vpack.c.bf16 %v457_v7, %v457_v7  ;;  %v440_v16 = vadd.f32 %v832_v14, %v415_v8  ;;  %v679_v18 = vpack.c.bf16 %v467_v10, %v467_v10  ;;  %v450_v19 = vadd.f32 %v832_v14, %v425_v13 }
  0xe8   : > { %v356_v20 = vpop.f32.mrf.mxu0  ;;  %v396_v23 = vpop.f32.mrf.mxu1 }
  0xe9   : > { %548 = vst.msk [vmem:[%s844_s30 + $0x10] sm:$0xf] %vm543_vm3, %v669_v15  ;;  %v458_v21 = vmax.f32 %v440_v16, 0.0  ;;  %v416_v22 = vmul.f32 %v827_v12, %v356_v20  ;;  %558 = vst.msk [vmem:[%s844_s30 + $0x38] sm:$0xf] %vm543_vm3, %v679_v18  ;;  %v468_v24 = vmax.f32 %v450_v19, 0.0  ;;  %v426_v26 = vmul.f32 %v827_v12, %v396_v23 }
  0xea   : > { %v709_v25 = vpop.f32.mrf.mxu0  ;;  %v729_v29 = vpop.f32.mrf.mxu1 }
  0xeb   : > { %v670_v27 = vpack.c.bf16 %v458_v21, %v458_v21  ;;  %v441_v28 = vadd.f32 %v832_v14, %v416_v22  ;;  %v680_v30 = vpack.c.bf16 %v468_v24, %v468_v24  ;;  %v451_v31 = vadd.f32 %v832_v14, %v426_v26 }
  0xec   : > { %v359_v32 = vpop.f32.mrf.mxu0  ;;  %v399_v35 = vpop.f32.mrf.mxu1 }
  0xed   : > { %549 = vst.msk [vmem:[%s844_s30 + $0x14] sm:$0xf] %vm543_vm3, %v670_v27  ;;  %v459_v33 = vmax.f32 %v441_v28, 0.0  ;;  %v417_v34 = vmul.f32 %v827_v12, %v359_v32  ;;  %559 = vst.msk [vmem:[%s844_s30 + $0x3c] sm:$0xf] %vm543_vm3, %v680_v30  ;;  %v469_v36 = vmax.f32 %v451_v31, 0.0  ;;  %v427_v38 = vmul.f32 %v827_v12, %v399_v35 }
  0xee   : > { %v710_v37 = vpop.f32.mrf.mxu0  ;;  %v730_v41 = vpop.f32.mrf.mxu1 }
  0xef   : > { %v671_v39 = vpack.c.bf16 %v459_v33, %v459_v33  ;;  %v442_v40 = vadd.f32 %v832_v14, %v417_v34  ;;  %v681_v42 = vpack.c.bf16 %v469_v36, %v469_v36  ;;  %v452_v43 = vadd.f32 %v832_v14, %v427_v38 }
  0xf0   : > { %v364_v44 = vpop.f32.mrf.mxu0 }
  0xf1   : > { %550 = vst.msk [vmem:[%s844_s30 + $0x18] sm:$0xf] %vm543_vm3, %v671_v39  ;;  %v460_v45 = vmax.f32 %v442_v40, 0.0  ;;  %v418_v46 = vmul.f32 %v827_v12, %v364_v44  ;;  %560 = vst.msk [vmem:[%s844_s30 + $0x40] sm:$0xf] %vm543_vm3, %v681_v42  ;;  %v470_v47 = vmax.f32 %v452_v43, 0.0 }
  0xf2   : > { %v713_v48 = vpop.f32.mrf.mxu0 }
  0xf3   : > { %v672_v49 = vpack.c.bf16 %v460_v45, %v460_v45  ;;  %v443_v50 = vadd.f32 %v832_v14, %v418_v46  ;;  %v682_v51 = vpack.c.bf16 %v470_v47, %v470_v47 }
  0xf4   : > { %v367_v52 = vpop.f32.mrf.mxu0 }
  0xf5   : > { %551 = vst.msk [vmem:[%s844_s30 + $0x1c] sm:$0xf] %vm543_vm3, %v672_v49  ;;  %v461_v53 = vmax.f32 %v443_v50, 0.0  ;;  %v419_v54 = vmul.f32 %v827_v12, %v367_v52  ;;  %561 = vst.msk [vmem:[%s844_s30 + $0x44] sm:$0xf] %vm543_vm3, %v682_v51 }
  0xf6   : > { %v714_v55 = vpop.f32.mrf.mxu0 }
  0xf7   : > { %v673_v56 = vpack.c.bf16 %v461_v53, %v461_v53  ;;  %v444_v57 = vadd.f32 %v832_v14, %v419_v54 }
  0xf9   : > { %552 = vst.msk [vmem:[%s844_s30 + $0x20] sm:$0xf] %vm543_vm3, %v673_v56  ;;  %v462_v58 = vmax.f32 %v444_v57, 0.0 }
  0xfb   : > { %v674_v59 = vpack.c.bf16 %v462_v58, %v462_v58 }
  0xfd   : > { %553 = vst.msk [vmem:[%s844_s30 + $0x24] sm:$0xf] %vm543_vm3, %v674_v59 }
  0xfe PF: > { %s14_s15 = sadd.s32 1, %s758_s15  }
  0xff   : > { %p11_p4 = scmp.ge.s32.totalorder %s14_s15, 4  }
 0x101   :  { %13 = sbr.rel (!%p11_p4) target bundleno = 1 (0x1), region = 66 }

// kernel: tile.33
= control target key start
LH: loop header
LB: loop body
LE: loop exit
PB: predicated region body
PF: predicated region fallthrough
CT: control target
= control target key end

     0   :  { %s22_s0 = inlined_call_operand.vmem [shape: f32[16], index: 0, kind: input, shape index: {}]   ;;  %s23_s1 = inlined_call_operand.vmem [shape: f32[8,16], index: 1, kind: output, shape index: {}]  }
   0x1   :  { %v4_v0 = vld [vmem:[%s22_s0] ss:$0 sm:$0xff] }
   0x2   :  { %5 = vst [vmem:[%s23_s1] sm:$0xff] %v4_v0 }

// kernel: tile.34
= control target key start
LH: loop header
LB: loop body
LE: loop exit
PB: predicated region body
PF: predicated region fallthrough
CT: control target
= control target key end

     0   :  { %s69_s10 = smov 112   ;;  %s70_s11 = smov 80   ;;  %vm3_vm0 = vcmask 130048   ;;  %vm9_vm1 = vcmask 1048448   ;;  %vm15_vm2 = vcmask 917248   ;;  %vm21_vm3 = vcmask 786048   ;;  %s113_s0 = inlined_call_operand.vmem [shape: f32[8,16], index: 0, kind: input, shape index: {}]   ;;  %s114_s1 = inlined_call_operand.vmem [shape: f32[1,128], index: 1, kind: output, shape index: {}]  }
   0x1   :  { %v55_v0 = vld [vmem:[%s113_s0 + $0x7] sm:$0x1]   ;;  %v57_v1 = vld [vmem:[%s113_s0 + $0x5] sm:$0x1]   ;;  %v56_v2 = vld [vmem:[%s113_s0 + $0x6] sm:$0x1]  }
   0x2   :  { %7 = vrot.lane.b32.xlu0 %v55_v0, %s69_s10  ;;  %19 = vrot.lane.b32.xlu1 %v57_v1, %s70_s11  ;;  %v58_v3 = vld [vmem:[%s113_s0 + $0x4] sm:$0x1]   ;;  %v2_v4 = vld [vmem:[%s113_s0] sm:$0x1]   ;;  %s71_s18 = smov 96   ;;  %s72_s19 = smov 64  }
   0x3   :  { %4 = vst.msk [vmem:[#allocation0] sm:$0x1] %vm3_vm0, %v2_v4   ;;  %v59_v5 = vld [vmem:[%s113_s0 + $0x3] sm:$0x1]   ;;  %v60_v6 = vld [vmem:[%s113_s0 + $0x2] sm:$0x1]  }
   0x4   :  { %s73_s24 = smov 48   ;;  %s74_s25 = smov 32   ;;  %v61_v7 = vld [vmem:[%s113_s0 + $0x1] sm:$0x1]   ;;  %vm27_vm4 = vcmask 654848   ;;  %vm33_vm5 = vcmask 523648  }
   0x5   :  { %s75_s0 = smov 16   ;;  %vm39_vm6 = vcmask 392448   ;;  %vm45_vm7 = vcmask 261248  }
   0x6   :  { %13 = vrot.lane.b32.xlu0 %v56_v2, %s71_s18  ;;  %25 = vrot.lane.b32.xlu1 %v58_v3, %s72_s19 }
   0xa   :  { %31 = vrot.lane.b32.xlu0 %v59_v5, %s73_s24  ;;  %37 = vrot.lane.b32.xlu1 %v60_v6, %s74_s25 }
   0xe   :  { %43 = vrot.lane.b32.xlu0 %v61_v7, %s75_s0 }
  0x74   :  { %v8_v8 = vpop.permute.xlu0 %7   ;;  %v20_v9 = vpop.permute.xlu1 %19  }
  0x75   :  { %10 = vst.msk [vmem:[#allocation0] sm:$0x1] %vm9_vm1, %v8_v8  }
  0x78   :  { %v14_v10 = vpop.permute.xlu0 %13   ;;  %v26_v11 = vpop.permute.xlu1 %25  }
  0x79   :  { %16 = vst.msk [vmem:[#allocation0] sm:$0x1] %vm15_vm2, %v14_v10  }
  0x7a   :  { %22 = vst.msk [vmem:[#allocation0] sm:$0x1] %vm21_vm3, %v20_v9  }
  0x7b   :  { %28 = vst.msk [vmem:[#allocation0] sm:$0x1] %vm27_vm4, %v26_v11  }
  0x7c   :  { %v32_v12 = vpop.permute.xlu0 %31   ;;  %v38_v13 = vpop.permute.xlu1 %37  }
  0x7d   :  { %34 = vst.msk [vmem:[#allocation0] sm:$0x1] %vm33_vm5, %v32_v12  }
  0x7e   :  { %40 = vst.msk [vmem:[#allocation0] sm:$0x1] %vm39_vm6, %v38_v13  }
  0x80   :  { %v44_v14 = vpop.permute.xlu0 %43  }
  0x81   :  { %46 = vst.msk [vmem:[#allocation0] sm:$0x1] %vm45_vm7, %v44_v14  }
  0x88   :  { %v51_v15 = vld [vmem:[#allocation0] sm:$0x1] }
  0x89   :  { %54 = vst [vmem:[%s114_s1] sm:$0x1] %v51_v15 }

// kernel: basic_block.16
= control target key start
LH: loop header
LB: loop body
LE: loop exit
PB: predicated region body
PF: predicated region fallthrough
CT: control target
= control target key end

     0   :  { %s1402_s15 = smov 0   ;;  %s1570_s0 = inlined_call_operand.vmem [shape: bf16[512,4], index: 0, kind: input, shape index: {}]   ;;  %s1571_s1 = inlined_call_operand.vmem [shape: bf16[512,4], index: 1, kind: input, shape index: {}]   ;;  %s1572_s2 = inlined_call_operand.vmem [shape: bf16[512,4], index: 2, kind: input, shape index: {}]   ;;  %s1573_s3 = inlined_call_operand.vmem [shape: bf16[4,8], index: 3, kind: input, shape index: {}]   ;;  %s1574_s4 = inlined_call_operand.vmem [shape: bf16[512,8], index: 4, kind: output, shape index: {}]  }
   0x1 LB: > { %s974_s16 = sadd.s32 4294967295, %s1375_s15   ;;  %p978_p0 = scmp.ge.s32.totalorder %s1375_s15, 1  ;;  %s1375_s15 = sphi %s1402_s15, %s14_s15  }
   0x2   : > { %p185_p1 = scmp.lt.s32.totalorder %s1375_s15, 3 }
   0x4   : > { %p186_p2 = pnand %p978_p0, %p185_p1 }
   0x5   : > { %s979_s19 = sshll.u32 (!%p186_p2), %s974_s16, 5 }
   0x6   : > { %189 = sbr.rel (%p186_p2) target bundleno = 266 (0x10a), region = 36  ;;  %p222_p3 = scmp.lt.s32.totalorder (!%p186_p2), %s979_s19, 63 }
   0xb   : > { %v518_v0 = vld [vmem:[%s1573_s3] sm:$0x3]  ;;  %vm568_vm0 = vcmask 1041408   ;;  %s1576_s19 = smov (!%p222_p3, %s979_s19), 63  ;;  %vm519_vm1 = vcmask 31744   ;;  %vm861_vm2 = vcmask 60416  }
   0xc   : > { %1359 = vmatprep.subr.msk.bf16.mxu0 %vm568_vm0, %v518_v0  ;;  %1360 = vmatprep.subr.msk.bf16.mxu1 %vm568_vm0, %v518_v0  ;;  %v570_v1 = vsel %vm568_vm0, %v518_v0, 0  ;;  %s1413_s20 = sshll.u32 %s1576_s19, 2 }
   0xd   : > { %1324 = vmatpush3.bf16.msra.mxu0 %v570_v1  ;;  %1358 = vmatpush3.bf16.msra.mxu1 %v570_v1  ;;  %s1419_s23 = scalar_lea.vmem %s1570_s0, %s1413_s20  ;;  %s1425_s26 = scalar_lea.vmem %s1571_s1, %s1413_s20 }
   0xe   : > { %s1431_s29 = scalar_lea.vmem %s1572_s2, %s1413_s20  ;;  %v1070_v2 = vld [vmem:[%s1419_s23] sm:$0xff]   ;;  %v1261_v16 = vld [vmem:[%s1419_s23 + $0x8] sm:$0xff]   ;;  %v1262_v42 = vld [vmem:[%s1419_s23 + $0x10] sm:$0xff]   ;;  %s1501_s6 = scalar_lea.vmem %s1574_s4, %s1413_s20 }
   0xf   : > { %v1134_v3 = vld [vmem:[%s1425_s26] sm:$0xff]   ;;  %v1071_v5 = vunpack.c.l.bf16 %v1070_v2  ;;  %v1072_v6 = vunpack.c.h.bf16 %v1070_v2  ;;  %v1276_v21 = vld [vmem:[%s1425_s26 + $0x8] sm:$0xff]   ;;  %v1075_v25 = vunpack.c.l.bf16 %v1261_v16  ;;  %v1076_v26 = vunpack.c.h.bf16 %v1261_v16  ;;  %v1277_v47 = vld [vmem:[%s1425_s26 + $0x10] sm:$0xff]  }
  0x10   : > { %v1268_v4 = vld [vmem:[%s1419_s23 + $0x40] sm:$0xff]   ;;  %v1135_v7 = vunpack.c.l.bf16 %v1134_v3  ;;  %v1136_v8 = vunpack.c.h.bf16 %v1134_v3  ;;  %v1291_v22 = vld [vmem:[%s1431_s29 + $0x8] sm:$0xff]   ;;  %v1139_v33 = vunpack.c.l.bf16 %v1276_v21  ;;  %v1140_v34 = vunpack.c.h.bf16 %v1276_v21  ;;  %v1292_v52 = vld [vmem:[%s1431_s29 + $0x10] sm:$0xff]  }
  0x11   : > { %v1198_v9 = vld [vmem:[%s1431_s29] sm:$0xff]   ;;  %v1103_v14 = vunpack.c.l.bf16 %v1268_v4  ;;  %v1104_v15 = vunpack.c.h.bf16 %v1268_v4  ;;  %v1269_v27 = vld [vmem:[%s1419_s23 + $0x48] sm:$0xff]   ;;  %v1203_v35 = vunpack.c.l.bf16 %v1291_v22  ;;  %v1204_v36 = vunpack.c.h.bf16 %v1291_v22  ;;  %v1270_v57 = vld [vmem:[%s1419_s23 + $0x50] sm:$0xff]  }
  0x12   : > { %v1283_v10 = vld [vmem:[%s1425_s26 + $0x40] sm:$0xff]   ;;  %v1199_v12 = vunpack.c.l.bf16 %v1198_v9  ;;  %v1200_v13 = vunpack.c.h.bf16 %v1198_v9  ;;  %v374_v17 = vadd.f32 %v1135_v7, %v1071_v5  ;;  %v375_v18 = vadd.f32 %v1136_v8, %v1072_v6  ;;  %v1284_v32 = vld [vmem:[%s1425_s26 + $0x48] sm:$0xff]   ;;  %v1285_v62 = vld [vmem:[%s1425_s26 + $0x50] sm:$0xff]  }
  0x13   : > { %v1298_v11 = vld [vmem:[%s1431_s29 + $0x40] sm:$0xff]   ;;  %v1167_v19 = vunpack.c.l.bf16 %v1283_v10  ;;  %v1168_v20 = vunpack.c.h.bf16 %v1283_v10  ;;  %v1299_v37 = vld [vmem:[%s1431_s29 + $0x48] sm:$0xff]   ;;  %v1107_v41 = vunpack.c.l.bf16 %v1269_v27  ;;  %v376_v43 = vadd.f32 %v1139_v33, %v1075_v25  ;;  %v1300_v63 = vld [vmem:[%s1431_s29 + $0x50] sm:$0xff]  }
  0x14   : > { %v1231_v23 = vunpack.c.l.bf16 %v1298_v11  ;;  %v1232_v24 = vunpack.c.h.bf16 %v1298_v11  ;;  %v470_v28 = vadd.f32 %v1199_v12, %v374_v17  ;;  %v471_v29 = vadd.f32 %v1200_v13, %v375_v18  ;;  %v1263_v8 = vld [vmem:[%s1419_s23 + $0x18] sm:$0xff]  }
  0x15   : > { %v390_v30 = vadd.f32 %v1167_v19, %v1103_v14  ;;  %v391_v31 = vadd.f32 %v1168_v20, %v1104_v15  ;;  %v377_v44 = vadd.f32 %v1140_v34, %v1076_v26  ;;  %v1108_v45 = vunpack.c.h.bf16 %v1269_v27  ;;  %v1278_v13 = vld [vmem:[%s1425_s26 + $0x18] sm:$0xff]   ;;  %v1264_v34 = vld [vmem:[%s1419_s23 + $0x20] sm:$0xff]  }
  0x16   : > { %v502_v38 = vpack.c.bf16 %v471_v29, %v470_v28  ;;  %v1171_v46 = vunpack.c.l.bf16 %v1284_v32  ;;  %v1172_v49 = vunpack.c.h.bf16 %v1284_v32  ;;  %v1235_v50 = vunpack.c.l.bf16 %v1299_v37  ;;  %v1293_v14 = vld [vmem:[%s1431_s29 + $0x18] sm:$0xff]  }
  0x17   : > { %v486_v39 = vadd.f32 %v1231_v23, %v390_v30  ;;  %v487_v40 = vadd.f32 %v1232_v24, %v391_v31  ;;  %v1236_v51 = vunpack.c.h.bf16 %v1299_v37  ;;  %v472_v53 = vadd.f32 %v1203_v35, %v376_v43  ;;  %v1271_v19 = vld [vmem:[%s1419_s23 + $0x58] sm:$0xff]  }
  0x18   : > { %1325 = vmatprep.mubr.msk.bf16.mxu0 %vm519_vm1, %v502_v38  ;;  %v473_v54 = vadd.f32 %v1204_v36, %v377_v44  ;;  %v392_v55 = vadd.f32 %v1171_v46, %v1107_v41  ;;  %v1079_v56 = vunpack.c.l.bf16 %v1262_v42  ;;  %v393_v58 = vadd.f32 %v1172_v49, %v1108_v45  ;;  %v1286_v24 = vld [vmem:[%s1425_s26 + $0x58] sm:$0xff]   ;;  %v1294_v44 = vld [vmem:[%s1431_s29 + $0x20] sm:$0xff]  }
  0x19   : > { %v510_v48 = vpack.c.bf16 %v487_v40, %v486_v39  ;;  %v1080_v59 = vunpack.c.h.bf16 %v1262_v42  ;;  %v1143_v60 = vunpack.c.l.bf16 %v1277_v47  ;;  %v1144_v61 = vunpack.c.h.bf16 %v1277_v47  ;;  %v1301_v29 = vld [vmem:[%s1431_s29 + $0x58] sm:$0xff]   ;;  %v1279_v39 = vld [vmem:[%s1425_s26 + $0x20] sm:$0xff]  }
  0x1a   : > { %v503_v0 = vpack.c.bf16 %v473_v54, %v472_v53  ;;  %v488_v1 = vadd.f32 %v1235_v50, %v392_v55  ;;  %v1207_v2 = vunpack.c.l.bf16 %v1292_v52  ;;  %v1208_v3 = vunpack.c.h.bf16 %v1292_v52  ;;  %v1272_v49 = vld [vmem:[%s1419_s23 + $0x60] sm:$0xff]  }
  0x1b   : > { %1341 = vmatprep.mubr.msk.bf16.mxu1 %vm519_vm1, %v510_v48  ;;  %v489_v4 = vadd.f32 %v1236_v51, %v393_v58  ;;  %v378_v5 = vadd.f32 %v1143_v60, %v1079_v56  ;;  %v379_v6 = vadd.f32 %v1144_v61, %v1080_v59  ;;  %v1111_v7 = vunpack.c.l.bf16 %v1270_v57  ;;  %v1287_v54 = vld [vmem:[%s1425_s26 + $0x60] sm:$0xff]  }
  0x1c   : > { %1326 = vmatmul.mubr.msk.bf16.vlgmr.msra.gmra.mxu0 %vm519_vm1, %v503_v0  ;;  %v1112_v9 = vunpack.c.h.bf16 %v1270_v57  ;;  %v1175_v10 = vunpack.c.l.bf16 %v1285_v62  ;;  %v1176_v11 = vunpack.c.h.bf16 %v1285_v62  ;;  %v1239_v12 = vunpack.c.l.bf16 %v1300_v63  ;;  %v1302_v55 = vld [vmem:[%s1431_s29 + $0x60] sm:$0xff]   ;;  %v1265_v0 = vld [vmem:[%s1419_s23 + $0x28] sm:$0xff]  }
  0x1d   : > { %v511_v15 = vpack.c.bf16 %v489_v4, %v488_v1  ;;  %v474_v16 = vadd.f32 %v1207_v2, %v378_v5  ;;  %v475_v17 = vadd.f32 %v1208_v3, %v379_v6  ;;  %v1240_v18 = vunpack.c.h.bf16 %v1300_v63  ;;  %v1280_v5 = vld [vmem:[%s1425_s26 + $0x28] sm:$0xff]  }
  0x1e   : > { %v394_v20 = vadd.f32 %v1175_v10, %v1111_v7  ;;  %v395_v21 = vadd.f32 %v1176_v11, %v1112_v9  ;;  %v1083_v22 = vunpack.c.l.bf16 %v1263_v8  ;;  %v1084_v23 = vunpack.c.h.bf16 %v1263_v8  ;;  %v1295_v6 = vld [vmem:[%s1431_s29 + $0x28] sm:$0xff]  }
  0x1f   : > { %1342 = vmatmul.mubr.msk.bf16.vlgmr.msra.gmra.mxu1 %vm519_vm1, %v511_v15  ;;  %v504_v25 = vpack.c.bf16 %v475_v17, %v474_v16  ;;  %v1147_v26 = vunpack.c.l.bf16 %v1278_v13  ;;  %v1148_v27 = vunpack.c.h.bf16 %v1278_v13  ;;  %v1211_v28 = vunpack.c.l.bf16 %v1293_v14  ;;  %v1273_v11 = vld [vmem:[%s1419_s23 + $0x68] sm:$0xff]  }
  0x20   : > { %v490_v30 = vadd.f32 %v1239_v12, %v394_v20  ;;  %v491_v31 = vadd.f32 %v1240_v18, %v395_v21  ;;  %v1212_v32 = vunpack.c.h.bf16 %v1293_v14  ;;  %v1115_v33 = vunpack.c.l.bf16 %v1271_v19  ;;  %v1288_v16 = vld [vmem:[%s1425_s26 + $0x68] sm:$0xff]  }
  0x21   : > { %1329 = vmatprep.mubr.msk.bf16.mxu0 %vm519_vm1, %v504_v25  ;;  %v380_v35 = vadd.f32 %v1147_v26, %v1083_v22  ;;  %v381_v36 = vadd.f32 %v1148_v27, %v1084_v23  ;;  %v1116_v37 = vunpack.c.h.bf16 %v1271_v19  ;;  %v1179_v38 = vunpack.c.l.bf16 %v1286_v24  ;;  %v1303_v21 = vld [vmem:[%s1431_s29 + $0x68] sm:$0xff]   ;;  %v1266_v26 = vld [vmem:[%s1419_s23 + $0x30] sm:$0xff]  }
  0x22   : > { %v512_v40 = vpack.c.bf16 %v491_v31, %v490_v30  ;;  %v1180_v41 = vunpack.c.h.bf16 %v1286_v24  ;;  %v1243_v42 = vunpack.c.l.bf16 %v1301_v29  ;;  %v1244_v43 = vunpack.c.h.bf16 %v1301_v29  ;;  %v1281_v31 = vld [vmem:[%s1425_s26 + $0x30] sm:$0xff]  }
  0x23   : > { %v476_v45 = vadd.f32 %v1211_v28, %v380_v35  ;;  %v477_v46 = vadd.f32 %v1212_v32, %v381_v36  ;;  %v396_v47 = vadd.f32 %v1179_v38, %v1115_v33  ;;  %v1087_v48 = vunpack.c.l.bf16 %v1264_v34  ;;  %v1296_v36 = vld [vmem:[%s1431_s29 + $0x30] sm:$0xff]  }
  0x24   : > { %1345 = vmatprep.mubr.msk.bf16.mxu1 %vm519_vm1, %v512_v40  ;;  %v397_v50 = vadd.f32 %v1180_v41, %v1116_v37  ;;  %v1088_v51 = vunpack.c.h.bf16 %v1264_v34  ;;  %v1151_v52 = vunpack.c.l.bf16 %v1279_v39  ;;  %v1152_v53 = vunpack.c.h.bf16 %v1279_v39  ;;  %v1274_v41 = vld [vmem:[%s1419_s23 + $0x70] sm:$0xff]  }
  0x25   : > { %v505_v56 = vpack.c.bf16 %v477_v46, %v476_v45  ;;  %v492_v57 = vadd.f32 %v1243_v42, %v396_v47  ;;  %v1215_v58 = vunpack.c.l.bf16 %v1294_v44  ;;  %v1216_v59 = vunpack.c.h.bf16 %v1294_v44  ;;  %v1289_v46 = vld [vmem:[%s1425_s26 + $0x70] sm:$0xff]  }
  0x26   : > { %v493_v60 = vadd.f32 %v1244_v43, %v397_v50  ;;  %v382_v61 = vadd.f32 %v1151_v52, %v1087_v48  ;;  %v383_v62 = vadd.f32 %v1152_v53, %v1088_v51  ;;  %v1119_v63 = vunpack.c.l.bf16 %v1272_v49  ;;  %v1304_v47 = vld [vmem:[%s1431_s29 + $0x70] sm:$0xff]  }
  0x27   : > { %1330 = vmatmul.mubr.msk.bf16.gmra.mxu0 %vm519_vm1, %v505_v56  ;;  %v1120_v1 = vunpack.c.h.bf16 %v1272_v49  ;;  %v1183_v2 = vunpack.c.l.bf16 %v1287_v54  ;;  %v1184_v3 = vunpack.c.h.bf16 %v1287_v54  ;;  %v1247_v4 = vunpack.c.l.bf16 %v1302_v55  ;;  %v1267_v56 = vld [vmem:[%s1419_s23 + $0x38] sm:$0xff]  }
  0x28   : > { %v513_v7 = vpack.c.bf16 %v493_v60, %v492_v57  ;;  %v478_v8 = vadd.f32 %v1215_v58, %v382_v61  ;;  %v479_v9 = vadd.f32 %v1216_v59, %v383_v62  ;;  %v1248_v10 = vunpack.c.h.bf16 %v1302_v55  ;;  %v1282_v61 = vld [vmem:[%s1425_s26 + $0x38] sm:$0xff]  }
  0x29   : > { %v398_v12 = vadd.f32 %v1183_v2, %v1119_v63  ;;  %v399_v13 = vadd.f32 %v1184_v3, %v1120_v1  ;;  %v1091_v14 = vunpack.c.l.bf16 %v1265_v0  ;;  %v1092_v15 = vunpack.c.h.bf16 %v1265_v0  ;;  %v1297_v62 = vld [vmem:[%s1431_s29 + $0x38] sm:$0xff]  }
  0x2a   : > { %1346 = vmatmul.mubr.msk.bf16.gmra.mxu1 %vm519_vm1, %v513_v7  ;;  %v506_v17 = vpack.c.bf16 %v479_v9, %v478_v8  ;;  %v1155_v18 = vunpack.c.l.bf16 %v1280_v5  ;;  %v1156_v19 = vunpack.c.h.bf16 %v1280_v5  ;;  %v1219_v20 = vunpack.c.l.bf16 %v1295_v6  ;;  %v1275_v3 = vld [vmem:[%s1419_s23 + $0x78] sm:$0xff]  }
  0x2b   : > { %v494_v22 = vadd.f32 %v1247_v4, %v398_v12  ;;  %v495_v23 = vadd.f32 %v1248_v10, %v399_v13  ;;  %v1220_v24 = vunpack.c.h.bf16 %v1295_v6  ;;  %v1123_v25 = vunpack.c.l.bf16 %v1273_v11  ;;  %v1290_v8 = vld [vmem:[%s1425_s26 + $0x78] sm:$0xff]  }
  0x2c   : > { %1333 = vmatprep.mubr.msk.bf16.mxu0 %vm519_vm1, %v506_v17  ;;  %v384_v27 = vadd.f32 %v1155_v18, %v1091_v14  ;;  %v385_v28 = vadd.f32 %v1156_v19, %v1092_v15  ;;  %v1124_v29 = vunpack.c.h.bf16 %v1273_v11  ;;  %v1187_v30 = vunpack.c.l.bf16 %v1288_v16  ;;  %v1305_v13 = vld [vmem:[%s1431_s29 + $0x78] sm:$0xff]  }
  0x2d   : > { %v514_v32 = vpack.c.bf16 %v495_v23, %v494_v22  ;;  %v1188_v33 = vunpack.c.h.bf16 %v1288_v16  ;;  %v1251_v34 = vunpack.c.l.bf16 %v1303_v21  ;;  %v1252_v35 = vunpack.c.h.bf16 %v1303_v21 }
  0x2e   : > { %v480_v37 = vadd.f32 %v1219_v20, %v384_v27  ;;  %v481_v38 = vadd.f32 %v1220_v24, %v385_v28  ;;  %v400_v39 = vadd.f32 %v1187_v30, %v1123_v25  ;;  %v1095_v40 = vunpack.c.l.bf16 %v1266_v26 }
  0x2f   : > { %1349 = vmatprep.mubr.msk.bf16.mxu1 %vm519_vm1, %v514_v32  ;;  %v401_v42 = vadd.f32 %v1188_v33, %v1124_v29  ;;  %v1096_v43 = vunpack.c.h.bf16 %v1266_v26  ;;  %v1159_v44 = vunpack.c.l.bf16 %v1281_v31  ;;  %v1160_v45 = vunpack.c.h.bf16 %v1281_v31 }
  0x30   : > { %v507_v48 = vpack.c.bf16 %v481_v38, %v480_v37  ;;  %v496_v49 = vadd.f32 %v1251_v34, %v400_v39  ;;  %v1223_v50 = vunpack.c.l.bf16 %v1296_v36  ;;  %v1224_v51 = vunpack.c.h.bf16 %v1296_v36 }
  0x31   : > { %v497_v52 = vadd.f32 %v1252_v35, %v401_v42  ;;  %v386_v53 = vadd.f32 %v1159_v44, %v1095_v40  ;;  %v387_v54 = vadd.f32 %v1160_v45, %v1096_v43  ;;  %v1127_v55 = vunpack.c.l.bf16 %v1274_v41 }
  0x32   : > { %1334 = vmatmul.mubr.msk.bf16.gmra.mxu0 %vm519_vm1, %v507_v48  ;;  %v1128_v57 = vunpack.c.h.bf16 %v1274_v41  ;;  %v1191_v58 = vunpack.c.l.bf16 %v1289_v46  ;;  %v1192_v59 = vunpack.c.h.bf16 %v1289_v46  ;;  %v1255_v60 = vunpack.c.l.bf16 %v1304_v47 }
  0x33   : > { %v515_v63 = vpack.c.bf16 %v497_v52, %v496_v49  ;;  %v482_v0 = vadd.f32 %v1223_v50, %v386_v53  ;;  %v483_v1 = vadd.f32 %v1224_v51, %v387_v54  ;;  %v1256_v2 = vunpack.c.h.bf16 %v1304_v47 }
  0x34   : > { %v402_v4 = vadd.f32 %v1191_v58, %v1127_v55  ;;  %v403_v5 = vadd.f32 %v1192_v59, %v1128_v57  ;;  %v1099_v6 = vunpack.c.l.bf16 %v1267_v56  ;;  %v1100_v7 = vunpack.c.h.bf16 %v1267_v56 }
  0x35   : > { %1350 = vmatmul.mubr.msk.bf16.gmra.mxu1 %vm519_vm1, %v515_v63  ;;  %v508_v9 = vpack.c.bf16 %v483_v1, %v482_v0  ;;  %v1163_v10 = vunpack.c.l.bf16 %v1282_v61  ;;  %v1164_v11 = vunpack.c.h.bf16 %v1282_v61  ;;  %v1227_v12 = vunpack.c.l.bf16 %v1297_v62 }
  0x36   : > { %v498_v14 = vadd.f32 %v1255_v60, %v402_v4  ;;  %v499_v15 = vadd.f32 %v1256_v2, %v403_v5  ;;  %v1228_v16 = vunpack.c.h.bf16 %v1297_v62  ;;  %v1131_v17 = vunpack.c.l.bf16 %v1275_v3 }
  0x37   : > { %1337 = vmatprep.mubr.msk.bf16.mxu0 %vm519_vm1, %v508_v9  ;;  %v388_v18 = vadd.f32 %v1163_v10, %v1099_v6  ;;  %v389_v19 = vadd.f32 %v1164_v11, %v1100_v7  ;;  %v1132_v20 = vunpack.c.h.bf16 %v1275_v3  ;;  %v1195_v21 = vunpack.c.l.bf16 %v1290_v8 }
  0x38   : > { %v516_v22 = vpack.c.bf16 %v499_v15, %v498_v14  ;;  %v1196_v23 = vunpack.c.h.bf16 %v1290_v8  ;;  %v1259_v24 = vunpack.c.l.bf16 %v1305_v13  ;;  %v1260_v25 = vunpack.c.h.bf16 %v1305_v13 }
  0x39   : > { %v484_v26 = vadd.f32 %v1227_v12, %v388_v18  ;;  %v485_v27 = vadd.f32 %v1228_v16, %v389_v19  ;;  %v404_v28 = vadd.f32 %v1195_v21, %v1131_v17 }
  0x3a   : > { %1353 = vmatprep.mubr.msk.bf16.mxu1 %vm519_vm1, %v516_v22  ;;  %v405_v29 = vadd.f32 %v1196_v23, %v1132_v20 }
  0x3b   : > { %v509_v30 = vpack.c.bf16 %v485_v27, %v484_v26  ;;  %v500_v31 = vadd.f32 %v1259_v24, %v404_v28 }
  0x3c   : > { %v501_v32 = vadd.f32 %v1260_v25, %v405_v29 }
  0x3d   : > { %1338 = vmatmul.mubr.msk.bf16.gmra.mxu0 %vm519_vm1, %v509_v30 }
  0x3e   : > { %v517_v33 = vpack.c.bf16 %v501_v32, %v500_v31 }
  0x40   : > { %1354 = vmatmul.mubr.msk.bf16.gmra.mxu1 %vm519_vm1, %v517_v33 }
  0xdc   : > { %v1327_v34 = vpop.f32.mrf.mxu0 }
  0xdd   : > { %v1039_v35 = vpack.c.bf16 %v1327_v34, %v1327_v34 }
  0xde   : > { %v606_v36 = vpop.f32.mrf.mxu0 }
  0xdf   : > { %864 = vst.msk [vmem:[%s1501_s6 + $0x8] sm:$0xf] %vm861_vm2, %v1039_v35  ;;  %v1343_v37 = vpop.f32.mrf.mxu1  ;;  %v1037_v38 = vpack.c.bf16 %v606_v36, %v606_v36 }
  0xe0   : > { %v1055_v39 = vpack.c.bf16 %v1343_v37, %v1343_v37  ;;  %v1328_v40 = vpop.f32.mrf.mxu0 }
  0xe1   : > { %862 = vst.msk [vmem:[%s1501_s6] sm:$0xf] %vm861_vm2, %v1037_v38  ;;  %v670_v41 = vpop.f32.mrf.mxu1  ;;  %v1040_v42 = vpack.c.bf16 %v1328_v40, %v1328_v40 }
  0xe2   : > { %880 = vst.msk [vmem:[%s1501_s6 + $0x48] sm:$0xf] %vm861_vm2, %v1055_v39  ;;  %v1053_v43 = vpack.c.bf16 %v670_v41, %v670_v41  ;;  %v609_v44 = vpop.f32.mrf.mxu0 }
  0xe3   : > { %865 = vst.msk [vmem:[%s1501_s6 + $0xc] sm:$0xf] %vm861_vm2, %v1040_v42  ;;  %v1344_v45 = vpop.f32.mrf.mxu1  ;;  %v1038_v46 = vpack.c.bf16 %v609_v44, %v609_v44 }
  0xe4   : > { %878 = vst.msk [vmem:[%s1501_s6 + $0x40] sm:$0xf] %vm861_vm2, %v1053_v43  ;;  %v1056_v47 = vpack.c.bf16 %v1344_v45, %v1344_v45 }
  0xe5   : > { %863 = vst.msk [vmem:[%s1501_s6 + $0x4] sm:$0xf] %vm861_vm2, %v1038_v46  ;;  %v673_v48 = vpop.f32.mrf.mxu1 }
  0xe6   : > { %881 = vst.msk [vmem:[%s1501_s6 + $0x4c] sm:$0xf] %vm861_vm2, %v1056_v47  ;;  %v1054_v49 = vpack.c.bf16 %v673_v48, %v673_v48 }
  0xe7   : > { %v1331_v50 = vpop.f32.mrf.mxu0 }
  0xe8   : > { %879 = vst.msk [vmem:[%s1501_s6 + $0x44] sm:$0xf] %vm861_vm2, %v1054_v49  ;;  %v1043_v51 = vpack.c.bf16 %v1331_v50, %v1331_v50 }
  0xe9   : > { %v622_v52 = vpop.f32.mrf.mxu0 }
  0xea   : > { %868 = vst.msk [vmem:[%s1501_s6 + $0x18] sm:$0xf] %vm861_vm2, %v1043_v51  ;;  %v1347_v53 = vpop.f32.mrf.mxu1  ;;  %v1041_v54 = vpack.c.bf16 %v622_v52, %v622_v52 }
  0xeb   : > { %v1059_v55 = vpack.c.bf16 %v1347_v53, %v1347_v53  ;;  %v1332_v56 = vpop.f32.mrf.mxu0 }
  0xec   : > { %866 = vst.msk [vmem:[%s1501_s6 + $0x10] sm:$0xf] %vm861_vm2, %v1041_v54  ;;  %v686_v57 = vpop.f32.mrf.mxu1  ;;  %v1044_v58 = vpack.c.bf16 %v1332_v56, %v1332_v56 }
  0xed   : > { %884 = vst.msk [vmem:[%s1501_s6 + $0x58] sm:$0xf] %vm861_vm2, %v1059_v55  ;;  %v1057_v59 = vpack.c.bf16 %v686_v57, %v686_v57  ;;  %v625_v60 = vpop.f32.mrf.mxu0 }
  0xee   : > { %869 = vst.msk [vmem:[%s1501_s6 + $0x1c] sm:$0xf] %vm861_vm2, %v1044_v58  ;;  %v1348_v61 = vpop.f32.mrf.mxu1  ;;  %v1042_v62 = vpack.c.bf16 %v625_v60, %v625_v60 }
  0xef   : > { %882 = vst.msk [vmem:[%s1501_s6 + $0x50] sm:$0xf] %vm861_vm2, %v1057_v59  ;;  %v1060_v63 = vpack.c.bf16 %v1348_v61, %v1348_v61 }
  0xf0   : > { %867 = vst.msk [vmem:[%s1501_s6 + $0x14] sm:$0xf] %vm861_vm2, %v1042_v62  ;;  %v689_v0 = vpop.f32.mrf.mxu1 }
  0xf1   : > { %885 = vst.msk [vmem:[%s1501_s6 + $0x5c] sm:$0xf] %vm861_vm2, %v1060_v63  ;;  %v1058_v1 = vpack.c.bf16 %v689_v0, %v689_v0 }
  0xf2   : > { %v1335_v2 = vpop.f32.mrf.mxu0 }
  0xf3   : > { %883 = vst.msk [vmem:[%s1501_s6 + $0x54] sm:$0xf] %vm861_vm2, %v1058_v1  ;;  %v1047_v3 = vpack.c.bf16 %v1335_v2, %v1335_v2 }
  0xf4   : > { %v638_v4 = vpop.f32.mrf.mxu0 }
  0xf5   : > { %872 = vst.msk [vmem:[%s1501_s6 + $0x28] sm:$0xf] %vm861_vm2, %v1047_v3  ;;  %v1351_v5 = vpop.f32.mrf.mxu1  ;;  %v1045_v6 = vpack.c.bf16 %v638_v4, %v638_v4 }
  0xf6   : > { %v1063_v7 = vpack.c.bf16 %v1351_v5, %v1351_v5  ;;  %v1336_v8 = vpop.f32.mrf.mxu0 }
  0xf7   : > { %870 = vst.msk [vmem:[%s1501_s6 + $0x20] sm:$0xf] %vm861_vm2, %v1045_v6  ;;  %v702_v9 = vpop.f32.mrf.mxu1  ;;  %v1048_v10 = vpack.c.bf16 %v1336_v8, %v1336_v8 }
  0xf8   : > { %888 = vst.msk [vmem:[%s1501_s6 + $0x68] sm:$0xf] %vm861_vm2, %v1063_v7  ;;  %v1061_v11 = vpack.c.bf16 %v702_v9, %v702_v9  ;;  %v641_v12 = vpop.f32.mrf.mxu0 }
  0xf9   : > { %873 = vst.msk [vmem:[%s1501_s6 + $0x2c] sm:$0xf] %vm861_vm2, %v1048_v10  ;;  %v1352_v13 = vpop.f32.mrf.mxu1  ;;  %v1046_v14 = vpack.c.bf16 %v641_v12, %v641_v12 }
  0xfa   : > { %886 = vst.msk [vmem:[%s1501_s6 + $0x60] sm:$0xf] %vm861_vm2, %v1061_v11  ;;  %v1064_v15 = vpack.c.bf16 %v1352_v13, %v1352_v13 }
  0xfb   : > { %871 = vst.msk [vmem:[%s1501_s6 + $0x24] sm:$0xf] %vm861_vm2, %v1046_v14  ;;  %v705_v16 = vpop.f32.mrf.mxu1 }
  0xfc   : > { %889 = vst.msk [vmem:[%s1501_s6 + $0x6c] sm:$0xf] %vm861_vm2, %v1064_v15  ;;  %v1062_v17 = vpack.c.bf16 %v705_v16, %v705_v16 }
  0xfd   : > { %v1339_v18 = vpop.f32.mrf.mxu0 }
  0xfe   : > { %887 = vst.msk [vmem:[%s1501_s6 + $0x64] sm:$0xf] %vm861_vm2, %v1062_v17  ;;  %v1051_v19 = vpack.c.bf16 %v1339_v18, %v1339_v18 }
  0xff   : > { %v654_v20 = vpop.f32.mrf.mxu0 }
 0x100   : > { %876 = vst.msk [vmem:[%s1501_s6 + $0x38] sm:$0xf] %vm861_vm2, %v1051_v19  ;;  %v1355_v21 = vpop.f32.mrf.mxu1  ;;  %v1049_v22 = vpack.c.bf16 %v654_v20, %v654_v20 }
 0x101   : > { %v1067_v23 = vpack.c.bf16 %v1355_v21, %v1355_v21  ;;  %v1340_v24 = vpop.f32.mrf.mxu0 }
 0x102   : > { %874 = vst.msk [vmem:[%s1501_s6 + $0x30] sm:$0xf] %vm861_vm2, %v1049_v22  ;;  %v718_v25 = vpop.f32.mrf.mxu1  ;;  %v1052_v26 = vpack.c.bf16 %v1340_v24, %v1340_v24 }
 0x103   : > { %892 = vst.msk [vmem:[%s1501_s6 + $0x78] sm:$0xf] %vm861_vm2, %v1067_v23  ;;  %v1065_v27 = vpack.c.bf16 %v718_v25, %v718_v25  ;;  %v657_v28 = vpop.f32.mrf.mxu0 }
 0x104   : > { %877 = vst.msk [vmem:[%s1501_s6 + $0x3c] sm:$0xf] %vm861_vm2, %v1052_v26  ;;  %v1356_v29 = vpop.f32.mrf.mxu1  ;;  %v1050_v30 = vpack.c.bf16 %v657_v28, %v657_v28 }
 0x105   : > { %890 = vst.msk [vmem:[%s1501_s6 + $0x70] sm:$0xf] %vm861_vm2, %v1065_v27  ;;  %v1068_v31 = vpack.c.bf16 %v1356_v29, %v1356_v29 }
 0x106   : > { %875 = vst.msk [vmem:[%s1501_s6 + $0x34] sm:$0xf] %vm861_vm2, %v1050_v30  ;;  %v721_v32 = vpop.f32.mrf.mxu1 }
 0x107   : > { %893 = vst.msk [vmem:[%s1501_s6 + $0x7c] sm:$0xf] %vm861_vm2, %v1068_v31  ;;  %v1066_v33 = vpack.c.bf16 %v721_v32, %v721_v32 }
 0x109   : > { %891 = vst.msk [vmem:[%s1501_s6 + $0x74] sm:$0xf] %vm861_vm2, %v1066_v33 }
 0x10a PF: > { %s14_s15 = sadd.s32 1, %s1375_s15  }
 0x10b   : > { %p11_p4 = scmp.ge.s32.totalorder %s14_s15, 4  }
 0x10d   :  { %13 = sbr.rel (!%p11_p4) target bundleno = 1 (0x1), region = 72 }

// kernel: basic_block.17
= control target key start
LH: loop header
LB: loop body
LE: loop exit
PB: predicated region body
PF: predicated region fallthrough
CT: control target
= control target key end

     0   :  { %s450_s15 = smov 0   ;;  %s481_s0 = inlined_call_operand.vmem [shape: bf16[64,128], index: 0, kind: input, shape index: {}]   ;;  %s482_s1 = inlined_call_operand.vmem [shape: bf16[64,128], index: 1, kind: input, shape index: {}]   ;;  %s483_s2 = inlined_call_operand.vmem [shape: f32[1,128], index: 2, kind: input, shape index: {}]   ;;  %s484_s3 = inlined_call_operand.vmem [shape: f32[1,128], index: 3, kind: input, shape index: {}]   ;;  %s485_s4 = inlined_call_operand.vmem [shape: bf16[64,128], index: 4, kind: output, shape index: {}]  }
   0x1 LB: > { %s357_s16 = sadd.s32 4294967295, %s423_s15   ;;  %p361_p0 = scmp.ge.s32.totalorder %s423_s15, 1  ;;  %s423_s15 = sphi %s450_s15, %s14_s15  }
   0x2   : > { %p174_p1 = scmp.lt.s32.totalorder %s423_s15, 3 }
   0x4   : > { %p175_p2 = pnand %p361_p0, %p174_p1 }
   0x5   : > { %s362_s17 = sshll.u32 (!%p175_p2), %s357_s16, 2 }
   0x6   : > { %178 = sbr.rel (%p175_p2) target bundleno = 29 (0x1d), region = 36  ;;  %p206_p3 = scmp.lt.s32.totalorder (!%p175_p2), %s362_s17, 7 }
   0xb   : > { %s487_s17 = smov (!%p206_p3, %s362_s17), 7  ;;  %v368_v12 = vld [vmem:[%s483_s2] ss:$0 sm:$0xff] }
   0xc   : > { %s458_s18 = sshll.u32 %s487_s17, 2  ;;  %v369_v17 = vld [vmem:[%s484_s3] ss:$0 sm:$0xff] }
   0xd   : > { %s209_s21 = scalar_lea.vmem %s481_s0, %s458_s18  ;;  %s215_s24 = scalar_lea.vmem %s482_s1, %s458_s18 }
   0xe   : > { %v381_v0 = vld [vmem:[%s209_s21] sm:$0xff]   ;;  %v406_v1 = vld [vmem:[%s209_s21 + $0x8] sm:$0xff]   ;;  %s221_s5 = scalar_lea.vmem %s485_s4, %s458_s18 }
   0xf   : > { %v389_v2 = vld [vmem:[%s215_s24] sm:$0xff]   ;;  %v382_v3 = vunpack.c.l.bf16 %v381_v0  ;;  %v383_v4 = vunpack.c.h.bf16 %v381_v0  ;;  %v386_v5 = vunpack.c.l.bf16 %v406_v1  ;;  %v387_v6 = vunpack.c.h.bf16 %v406_v1  ;;  %v407_v7 = vld [vmem:[%s215_s24 + $0x8] sm:$0xff]  }
  0x10   : > { %v390_v8 = vunpack.c.l.bf16 %v389_v2  ;;  %v391_v9 = vunpack.c.h.bf16 %v389_v2  ;;  %v394_v10 = vunpack.c.l.bf16 %v407_v7  ;;  %v395_v11 = vunpack.c.h.bf16 %v407_v7 }
  0x12   : > { %v239_v13 = vadd.f32 %v390_v8, %v382_v3  ;;  %v240_v14 = vadd.f32 %v391_v9, %v383_v4  ;;  %v241_v15 = vadd.f32 %v394_v10, %v386_v5  ;;  %v242_v16 = vadd.f32 %v395_v11, %v387_v6 }
  0x14   : > { %v250_v18 = vmul.f32 %v368_v12, %v239_v13  ;;  %v251_v19 = vmul.f32 %v368_v12, %v240_v14  ;;  %v252_v20 = vmul.f32 %v368_v12, %v241_v15  ;;  %v253_v21 = vmul.f32 %v368_v12, %v242_v16 }
  0x16   : > { %v261_v22 = vadd.f32 %v369_v17, %v250_v18  ;;  %v262_v23 = vadd.f32 %v369_v17, %v251_v19  ;;  %v263_v24 = vadd.f32 %v369_v17, %v252_v20  ;;  %v264_v25 = vadd.f32 %v369_v17, %v253_v21 }
  0x18   : > { %v265_v26 = vmax.f32 %v261_v22, 0.0  ;;  %v266_v27 = vmax.f32 %v262_v23, 0.0  ;;  %v267_v28 = vmax.f32 %v263_v24, 0.0  ;;  %v268_v29 = vmax.f32 %v264_v25, 0.0 }
  0x1a   : > { %v399_v30 = vpack.c.bf16 %v266_v27, %v265_v26  ;;  %v404_v31 = vpack.c.bf16 %v268_v29, %v267_v28 }
  0x1c   : > { %400 = vst [vmem:[%s221_s5] sm:$0xff] %v399_v30   ;;  %408 = vst [vmem:[%s221_s5 + $0x8] sm:$0xff] %v404_v31  }
  0x1d PF: > { %s14_s15 = sadd.s32 1, %s423_s15  }
  0x1e   : > { %p11_p4 = scmp.ge.s32.totalorder %s14_s15, 4  }
  0x20   :  { %13 = sbr.rel (!%p11_p4) target bundleno = 1 (0x1), region = 69 }

// kernel: basic_block.12
= control target key start
LH: loop header
LB: loop body
LE: loop exit
PB: predicated region body
PF: predicated region fallthrough
CT: control target
= control target key end

     0   :  { %s2488_s9 = smov 0   ;;  %s4099_s0 = inlined_call_operand.vmem [shape: bf16[2,440,16], index: 0, kind: input, shape index: {}]   ;;  %s4100_s1 = inlined_call_operand.vmem [shape: bf16[144,24], index: 1, kind: input, shape index: {}]   ;;  %s4101_s2 = inlined_call_operand.vmem [shape: bf16[2,256,24], index: 2, kind: output, shape index: {}]  }
   0x1 LB: > { %s2197_s10 = sadd.s32 4294967295, %s2463_s9   ;;  %p2201_p0 = scmp.ge.s32.totalorder %s2463_s9, 1  ;;  %s2463_s9 = sphi %s2488_s9, %s12_s9  }
   0x2   : > { %p112_p1 = scmp.lt.s32.totalorder %s2463_s9, 3 }
   0x4   : > { %p113_p2 = pnand %p2201_p0, %p112_p1 }
   0x6   : > { %116 = sbr.rel (%p113_p2) target bundleno = 670 (0x29e), region = 28 }
   0xb   : > { %p134_p3 = scmp.lt.s32.totalorder %s2197_s10, 1  ;;  %v2465_v0 = vmov 0   ;;  %v2421_v1 = vld [vmem:[%s4100_s1 + $0x38] sm:$0xff]   ;;  %v2424_v2 = vld [vmem:[%s4100_s1 + $0x30] sm:$0xff]   ;;  %vm568_vm0 = vcmask 1046528   ;;  %v2425_v8 = vld [vmem:[%s4100_s1 + $0x28] sm:$0xff]  }
   0xc   : > { %1740 = vmatprep.subr.bf16.mxu0 %v2465_v0  ;;  %2359 = vmatprep.subr.bf16.mxu1 %v2465_v0  ;;  %s2466_s21 = smov 48   ;;  %v2426_v27 = vld [vmem:[%s4100_s1 + $0x20] sm:$0xff]   ;;  %vm323_vm1 = vsmask.f32 7424  ;;  %v2427_v44 = vld [vmem:[%s4100_s1 + $0x18] sm:$0xff]   ;;  %s2467_s26 = smov 80  }
   0xd   : > { %s4176_s10 = smov (!%p134_p3, %s2197_s10), 1  ;;  %1741 = vmatpush1.bf16.msra.mxu0 %v2421_v1  ;;  %2368 = vmatpush1.bf16.msra.mxu1 %v2421_v1  ;;  %s2468_s27 = smov 32   ;;  %vm1229_vm2 = vcmask 130048   ;;  %vm1278_vm3 = vcmask 261120   ;;  %vm1327_vm4 = vcmask 392192   ;;  %vm1376_vm5 = vcmask 523264  }
   0xe   : > { %s2377_s13 = smul.u32 220, %s4176_s10  ;;  %1742 = vmatprep.subr.bf16.mxu0 %v2465_v0  ;;  %2360 = vmatprep.subr.bf16.mxu1 %v2465_v0  ;;  %s2469_s30 = smov 16   ;;  %vm1425_vm6 = vcmask 654336   ;;  %vm1474_vm7 = vcmask 785408   ;;  %vm1523_vm8 = vcmask 916480   ;;  %vm1996_vm9 = vcmask 191488  }
   0xf   : > { %s2470_s7 = smov 64   ;;  %s2471_s12 = smov 96  }
  0x10   : > { %s2512_s18 = scalar_lea.vmem %s4099_s0, %s2377_s13  ;;  %s2472_s13 = smov 112  }
  0x11   : > { %v172_v3 = vld [vmem:[%s2512_s18 + $0x6c] sm:$0xf]  ;;  %v2516_v4 = vld [vmem:[%s2512_s18 + $0x70] sm:$0xf]  ;;  %v2519_v5 = vld [vmem:[%s2512_s18 + $0x74] sm:$0xf]  ;;  %1743 = vmatpush1.bf16.msra.mxu0 %v2424_v2  ;;  %2369 = vmatpush1.bf16.msra.mxu1 %v2424_v2 }
  0x12   : > { %v2522_v6 = vld [vmem:[%s2512_s18 + $0x78] sm:$0xf]  ;;  %v2525_v7 = vcombine.low %v172_v3, %v2516_v4  ;;  %v2531_v9 = vld [vmem:[%s2512_s18 + $0x60] sm:$0xf]  ;;  %v170_v10 = vld [vmem:[%s2512_s18 + $0x64] sm:$0xf]  ;;  %1744 = vmatprep.subr.bf16.mxu0 %v2465_v0  ;;  %2361 = vmatprep.subr.bf16.mxu1 %v2465_v0 }
  0x13   : > { %v171_v11 = vld [vmem:[%s2512_s18 + $0x68] sm:$0xf]  ;;  %v2539_v12 = vcombine.low %v2519_v5, %v2522_v6  ;;  %v2544_v13 = vcombine.low %v2531_v9, %v170_v10  ;;  %v148_v16 = vld [vmem:[%s2512_s18 + $0xc] sm:$0xf]  ;;  %v2552_v17 = vld [vmem:[%s2512_s18 + $0x10] sm:$0xf] }
  0x14   : > { %4133 = vst [vmem:[#allocation2_spill] sm:$0xff] %v2525_v7  ;;  %718 = vrot.lane.b32.xlu1 %v2525_v7, %s2466_s21  ;;  %v2546_v14 = vcombine.low %v171_v11, %v172_v3  ;;  %v2548_v15 = vcombine.low %v170_v10, %v171_v11  ;;  %v2555_v18 = vld [vmem:[%s2512_s18 + $0x14] sm:$0xf]  ;;  %v2558_v19 = vld [vmem:[%s2512_s18 + $0x18] sm:$0xf]  ;;  %v2561_v20 = vcombine.low %v148_v16, %v2552_v17  ;;  %v2571_v24 = vld [vmem:[%s2512_s18] sm:$0xff]  }
  0x15   : > { %v147_v21 = vld [vmem:[%s2512_s18 + $0x8] sm:$0xf]  ;;  %v2566_v22 = vcombine.low %v2555_v18, %v2558_v19  ;;  %v4103_v25 = vrot.slane %v2544_v13, 1  ;;  %1745 = vmatpush1.bf16.msra.mxu0 %v2425_v8  ;;  %2370 = vmatpush1.bf16.msra.mxu1 %v2425_v8  ;;  %v4102_v29 = vrot.slane %v2525_v7, 1  ;;  %v420_v30 = vshll.u32 %v2544_v13, 16  ;;  %v2430_v2 = vld [vmem:[%s4100_s1 + $0x10] sm:$0xff]  }
  0x16   : > { %4134 = vst [vmem:[#allocation3_spill] sm:$0xff] %v2546_v14  ;;  %4135 = vst [vmem:[#allocation4_spill] sm:$0xff] %v2548_v15  ;;  %v2568_v23 = vcombine.low %v147_v21, %v148_v16  ;;  %v594_v26 = vrot.slane %v2546_v14, 1  ;;  %694 = vrot.lane.b32.xlu0 %v2561_v20, %s2466_s21  ;;  %v989_v28 = vrot.slane %v2561_v20, 1  ;;  %1746 = vmatprep.subr.bf16.mxu0 %v2465_v0  ;;  %v569_v32 = vrot.slane %v2571_v24, 1  ;;  %s2326_s14 = sshll.u32 %s4176_s10, 7 }
  0x17   : > { %v990_v31 = vrot.slane %v2566_v22, 1  ;;  %v1014_v34 = vrot.slane %v2539_v12, 1  ;;  %2362 = vmatprep.subr.bf16.mxu1 %v2465_v0  ;;  %v325_v36 = vshrl.u32 %v2571_v24, 16  ;;  %v327_v37 = vshll.u32 %v2571_v24, 16  ;;  %v2609_v43 = vld [vmem:[%s2512_s18 + $0x7c] sm:$0xf]  ;;  %s3925_s16 = scalar_lea.vmem %s4101_s2, %s2326_s14 }
  0x18   : > { %v570_v33 = vrot.slane %v2568_v23, 1  ;;  %v2594_v35 = vsel %vm568_vm0, %v4103_v25, %v594_v26  ;;  %v332_v38 = vshll.u32 %v2568_v23, 16  ;;  %v2605_v41 = vrot.slane %v420_v30, 1  ;;  %v2621_v49 = vld [vmem:[%s2512_s18 + $0x80] sm:$0xf] }
  0x19   : > { %4136 = vst [vmem:[#allocation5_spill] sm:$0xff] %v2594_v35  ;;  %v991_v39 = vsel %vm568_vm0, %v989_v28, %v990_v31  ;;  %v424_v42 = vshrl.u32 %v2544_v13, 16  ;;  %1747 = vmatpush1.bf16.msra.mxu0 %v2426_v27  ;;  %2371 = vmatpush1.bf16.msra.mxu1 %v2426_v27  ;;  %v329_v45 = vrot.slane %v327_v37, 1  ;;  %v428_v47 = vshll.u32 %v2546_v14, 16  ;;  %v2628_v54 = vld [vmem:[%s2512_s18 + $0x84] sm:$0xf] }
  0x1a   : > { %v571_v40 = vsel %vm568_vm0, %v569_v32, %v570_v33  ;;  %1038 = vrot.lane.b32.xlu0 %v991_v39, %s2467_s26  ;;  %v2616_v46 = vrot.slane %v332_v38, 1  ;;  %v841_v48 = vshll.u32 %v2525_v7, 16  ;;  %v845_v51 = vshrl.u32 %v2525_v7, 16  ;;  %1748 = vmatprep.subr.bf16.mxu0 %v2465_v0  ;;  %v2638_v59 = vld [vmem:[%s2512_s18 + $0x1c] sm:$0xf] }
  0x1b   : > { %618 = vrot.lane.b32.xlu1 %v571_v40, %s2468_s27  ;;  %v426_v50 = vor.u32 %v424_v42, %v2605_v41  ;;  %v849_v52 = vshll.u32 %v2539_v12, 16  ;;  %v746_v53 = vshrl.u32 %v2561_v20, 16  ;;  %2363 = vmatprep.subr.bf16.mxu1 %v2465_v0  ;;  %v330_v55 = vor.u32 %v329_v45, %v325_v36  ;;  %v2651_v63 = vld [vmem:[%s2512_s18 + $0x20] sm:$0xf]  ;;  %v2654_v1 = vld [vmem:[%s2512_s18 + $0x24] sm:$0xf] }
  0x1c   : > { %v2632_v56 = vrot.slane %v428_v47, 1  ;;  %v2634_v57 = vrot.slane %v841_v48, 1  ;;  %v748_v58 = vshll.u32 %v2561_v20, 16  ;;  %v1015_v60 = vsel %vm568_vm0, %v4102_v29, %v1014_v34  ;;  %v2432_v47 = vld [vmem:[%s4100_s1] sm:$0xff]  }
  0x1d   : > { %v753_v61 = vshll.u32 %v2566_v22, 16  ;;  %v2648_v62 = vcombine.low %v2522_v6, %v2609_v43  ;;  %1749 = vmatpush1.bf16.msra.mxu0 %v2427_v44  ;;  %2372 = vmatpush1.bf16.msra.mxu1 %v2427_v44  ;;  %v335_v3 = vsel %vm323_vm1, %v330_v55, %v2616_v46  ;;  %v2664_v6 = vrot.slane %v849_v52, 1  ;;  %v3076_v29 = vld [vmem:[%s2512_s18 + $0x44] sm:$0xf] }
  0x1e   : > { %4137 = vst [vmem:[#allocation6_spill] sm:$0xff] %v2634_v57  ;;  %v847_v8 = vor.u32 %v845_v51, %v2634_v57  ;;  %v750_v10 = vrot.slane %v748_v58, 1  ;;  %1750 = vmatprep.subr.bf16.mxu0 %v2465_v0  ;;  %520 = vrot.lane.b32.xlu0 %v335_v3, %s2469_s30  ;;  %v2670_v11 = vsel %vm323_vm1, %v426_v50, %v2632_v56  ;;  %v432_v48 = vshrl.u32 %v2546_v14, 16  ;;  %v2435_v58 = vld [vmem:[%s4100_s1 + $0x40] sm:$0xff]  }
  0x1f   : > { %642 = vrot.lane.b32.xlu1 %v2594_v35, %s2468_s27  ;;  %4138 = vst [vmem:[#allocation7_spill] sm:$0xff] %v2670_v11  ;;  %v2674_v16 = vcombine.low %v2621_v49, %v2628_v54  ;;  %v2678_v20 = vcombine.low %v2558_v19, %v2638_v59  ;;  %2364 = vmatprep.subr.bf16.mxu1 %v2465_v0  ;;  %v2681_v27 = vrot.slane %v753_v61, 1  ;;  %v444_v30 = vshll.u32 %v2648_v62, 16  ;;  %v2431_v19 = vld [vmem:[%s4100_s1 + $0x8] sm:$0xff]  }
  0x20   : > { %v751_v21 = vor.u32 %v750_v10, %v746_v53  ;;  %v2685_v28 = vcombine.low %v2651_v63, %v2654_v1  ;;  %v2694_v36 = vcombine.low %v2516_v4, %v2519_v5  ;;  %v852_v37 = vsel %vm323_vm1, %v847_v8, %v2664_v6 }
  0x21   : > { %v348_v32 = vshll.u32 %v2678_v20, 16  ;;  %1751 = vmatpush1.bf16.msra.mxu0 %v2430_v2  ;;  %2373 = vmatpush1.bf16.msra.mxu1 %v2430_v2  ;;  %v2702_v38 = vrot.slane %v444_v30, 1  ;;  %v448_v39 = vshrl.u32 %v2648_v62, 16  ;;  %v452_v40 = vshll.u32 %v2674_v16, 16 }
  0x22   : > { %1752 = vmatprep.subr.bf16.mxu0 %v2465_v0  ;;  %544 = vrot.lane.b32.xlu0 %v2670_v11, %s2469_s30  ;;  %v352_v42 = vshrl.u32 %v2678_v20, 16  ;;  %v2710_v4 = vcombine.low %v2552_v17, %v2555_v18  ;;  %v756_v5 = vsel %vm323_vm1, %v751_v21, %v2681_v27  ;;  %v356_v45 = vshll.u32 %v2685_v28, 16 }
  0x23   : > { %1062 = vrot.lane.b32.xlu1 %v1015_v60, %s2467_s26  ;;  %2365 = vmatprep.subr.bf16.mxu1 %v2465_v0  ;;  %v2714_v44 = vrot.slane %v348_v32, 1  ;;  %v450_v17 = vor.u32 %v448_v39, %v2702_v38  ;;  %v2724_v18 = vrot.slane %v452_v40, 1  ;;  %v436_v50 = vshll.u32 %v2694_v36, 16 }
  0x24   : > { %v2730_v52 = vrot.slane %v356_v45, 1  ;;  %v336_v53 = vshrl.u32 %v2568_v23, 16  ;;  %v340_v55 = vshll.u32 %v2710_v4, 16  ;;  %v434_v61 = vor.u32 %v432_v48, %v2632_v56  ;;  %v2803_v45 = vld [vmem:[%s2512_s18 + $0x8c] sm:$0xf] }
  0x25   : > { %1753 = vmatpush1.bf16.msra.mxu0 %v2431_v19  ;;  %2374 = vmatpush1.bf16.msra.mxu1 %v2431_v19  ;;  %v354_v51 = vor.u32 %v352_v42, %v2714_v44  ;;  %v2744_v60 = vsel %vm323_vm1, %v450_v17, %v2724_v18  ;;  %v2747_v2 = vrot.slane %v436_v50, 1  ;;  %v2761_v56 = vcombine.low %v2609_v43, %v2621_v49 }
  0x26   : > { %1754 = vmatprep.subr.bf16.mxu0 %v2465_v0  ;;  %941 = vrot.lane.b32.xlu0 %v756_v5, %s2470_s7  ;;  %v338_v8 = vor.u32 %v336_v53, %v2616_v46  ;;  %v2755_v10 = vrot.slane %v340_v55, 1  ;;  %v596_v46 = vrot.slane %v2694_v36, 1  ;;  %v2772_v21 = vcombine.low %v2638_v59, %v2651_v63  ;;  %v179_v5 = vld [vmem:[%s2512_s18 + $0x88] sm:$0xf] }
  0x27   : > { %965 = vrot.lane.b32.xlu1 %v852_v37, %s2470_s7  ;;  %2366 = vmatprep.subr.bf16.mxu1 %v2465_v0  ;;  %v2752_v3 = vsel %vm323_vm1, %v354_v51, %v2730_v52  ;;  %v572_v43 = vrot.slane %v2710_v4, 1  ;;  %v853_v59 = vshrl.u32 %v2539_v12, 16  ;;  %v857_v63 = vshll.u32 %v2761_v56, 16 }
  0x28   : > { %v343_v30 = vsel %vm323_vm1, %v338_v8, %v2755_v10  ;;  %v2785_v49 = vsel %vm568_vm0, %v594_v26, %v596_v46  ;;  %v757_v19 = vshrl.u32 %v2566_v22, 16  ;;  %v761_v37 = vshll.u32 %v2772_v21, 16 }
  0x29   : > { %1755 = vmatpush1.bf16.msra.mxu0 %v2432_v47  ;;  %2375 = vmatpush1.bf16.msra.mxu1 %v2432_v47  ;;  %4140 = vst [vmem:[#allocation9_spill] sm:$0xff] %v2785_v49  ;;  %v573_v32 = vsel %vm568_vm0, %v570_v33, %v572_v43  ;;  %v855_v26 = vor.u32 %v853_v59, %v2664_v6  ;;  %v859_v39 = vrot.slane %v857_v63, 1  ;;  %v155_v47 = vld [vmem:[%s2512_s18 + $0x28] sm:$0xf]  ;;  %v2807_v33 = vld [vmem:[%s2512_s18 + $0x2c] sm:$0xf] }
  0x2a   : > { %1770 = vmatprep.subr.bf16.mxu0 %v2465_v0  ;;  %1093 = vrot.lane.b32.xlu0 %v2678_v20, %s2471_s12  ;;  %v759_v40 = vor.u32 %v757_v19, %v2681_v27  ;;  %v763_v42 = vrot.slane %v761_v37, 1  ;;  %v1016_v17 = vrot.slane %v2761_v56, 1  ;;  %v2816_v48 = vcombine.low %v179_v5, %v2803_v45 }
  0x2b   : > { %1117 = vrot.lane.b32.xlu1 %v2648_v62, %s2471_s12  ;;  %2367 = vmatprep.subr.bf16.mxu1 %v2465_v0  ;;  %v2767_v0 = vsel %vm323_vm1, %v434_v61, %v2747_v2  ;;  %v860_v6 = vsel %vm323_vm1, %v855_v26, %v859_v39  ;;  %v600_v27 = vrot.slane %v2674_v16, 1  ;;  %v576_v50 = vrot.slane %v2685_v28, 1 }
  0x2c   : > { %4139 = vst [vmem:[#allocation8_spill] sm:$0xff] %v2767_v0  ;;  %v764_v51 = vsel %vm323_vm1, %v759_v40, %v763_v42  ;;  %v992_v53 = vrot.slane %v2772_v21, 1  ;;  %v2823_v55 = vcombine.low %v155_v47, %v2807_v33  ;;  %v574_v61 = vrot.slane %v2678_v20, 1 }
  0x2d   : > { %1771 = vmatpush2.bf16.msra.mxu0 %v2435_v58  ;;  %2376 = vmatpush2.bf16.msra.mxu1 %v2435_v58  ;;  %v598_v58 = vrot.slane %v2648_v62, 1  ;;  %v1017_v8 = vsel %vm568_vm0, %v1014_v34, %v1016_v17  ;;  %v460_v59 = vshll.u32 %v2816_v48, 16  ;;  %v360_v34 = vshrl.u32 %v2685_v28, 16 }
  0x2e   : > { %1173 = vrot.lane.b32.xlu0 %v2752_v3, %s2472_s13  ;;  %4141 = vst [vmem:[#allocation10_spill] sm:$0xff] %v2823_v55  ;;  %v364_v19 = vshll.u32 %v2823_v55, 16 }
  0x2f   : > { %1197 = vrot.lane.b32.xlu1 %v2744_v60, %s2472_s13  ;;  %v2839_v63 = vsel %vm568_vm0, %v598_v58, %v600_v27  ;;  %v462_v26 = vrot.slane %v460_v59, 1  ;;  %v2884_v59 = vcombine.low %v2628_v54, %v179_v5  ;;  %v2897_v54 = vsel %vm568_vm0, %v596_v46, %v598_v58 }
  0x30   : > { %2280 = vmatprep.mubr.msk.bf16.mxu1 %vm1229_vm2, %v2839_v63  ;;  %v366_v40 = vrot.slane %v364_v19, 1  ;;  %4143 = vst [vmem:[#allocation12_spill] sm:$0xff] %v2897_v54  ;;  %v181_v19 = vld [vmem:[%s2512_s18 + $0x90] sm:$0xf] }
  0x32   : > { %522 = vrot.lane.b32.xlu0 %v343_v30, %s2469_s30  ;;  %v456_v30 = vshrl.u32 %v2674_v16, 16 }
  0x33   : > { %546 = vrot.lane.b32.xlu1 %v2767_v0, %s2469_s30 }
  0x34   : > { %v458_v37 = vor.u32 %v456_v30, %v2724_v18 }
  0x36   : > { %620 = vrot.lane.b32.xlu0 %v573_v32, %s2468_s27  ;;  %v2844_v32 = vsel %vm568_vm0, %v574_v61, %v576_v50 }
  0x37   : > { %644 = vrot.lane.b32.xlu1 %v2785_v49, %s2468_s27  ;;  %2268 = vmatprep.mubr.msk.bf16.mxu0 %vm1229_vm2, %v2844_v32 }
  0x3a   : > { %696 = vrot.lane.b32.xlu0 %v2566_v22, %s2466_s21  ;;  %v440_v22 = vshrl.u32 %v2694_v36, 16 }
  0x3b   : > { %720 = vrot.lane.b32.xlu1 %v2539_v12, %s2466_s21  ;;  %v993_v12 = vsel %vm568_vm0, %v990_v31, %v992_v53  ;;  %v362_v31 = vor.u32 %v360_v34, %v2730_v52 }
  0x3d   : > { %v2872_v18 = vsel %vm323_vm1, %v362_v31, %v366_v40  ;;  %v2915_v31 = vld [vmem:[%s2512_s18 + $0x34] sm:$0xf] }
  0x3e   : > { %943 = vrot.lane.b32.xlu0 %v764_v51, %s2470_s7  ;;  %v2868_v51 = vsel %vm323_vm1, %v458_v37, %v462_v26  ;;  %v2911_v37 = vld [vmem:[%s2512_s18 + $0x94] sm:$0xf] }
  0x3f   : > { %967 = vrot.lane.b32.xlu1 %v860_v6, %s2470_s7  ;;  %v344_v6 = vshrl.u32 %v2710_v4, 16 }
  0x41   : > { %v346_v30 = vor.u32 %v344_v6, %v2755_v10  ;;  %v765_v10 = vshrl.u32 %v2772_v21, 16 }
  0x42   : > { %1040 = vrot.lane.b32.xlu0 %v993_v12, %s2467_s26  ;;  %v2889_v12 = vcombine.low %v2654_v1, %v155_v47  ;;  %v575_v1 = vsel %vm568_vm0, %v572_v43, %v574_v61  ;;  %v1018_v61 = vrot.slane %v2884_v59, 1 }
  0x43   : > { %1064 = vrot.lane.b32.xlu1 %v1017_v8, %s2467_s26  ;;  %v442_v8 = vor.u32 %v440_v22, %v2747_v2  ;;  %v351_v2 = vsel %vm323_vm1, %v346_v30, %v2714_v44  ;;  %v865_v44 = vshll.u32 %v2884_v59, 16  ;;  %v767_v58 = vor.u32 %v765_v10, %v763_v42  ;;  %v157_v22 = vld [vmem:[%s2512_s18 + $0x30] sm:$0xf] }
  0x44   : > { %v769_v5 = vshll.u32 %v2889_v12, 16  ;;  %v994_v6 = vrot.slane %v2889_v12, 1  ;;  %v1019_v30 = vsel %vm568_vm0, %v1016_v17, %v1018_v61 }
  0x45   : > { %v2881_v52 = vsel %vm323_vm1, %v442_v8, %v2702_v38  ;;  %v861_v38 = vshrl.u32 %v2761_v56, 16  ;;  %v867_v46 = vrot.slane %v865_v44, 1  ;;  %v2929_v8 = vcombine.low %v157_v22, %v2915_v31 }
  0x46   : > { %1095 = vrot.lane.b32.xlu0 %v2685_v28, %s2471_s12  ;;  %4142 = vst [vmem:[#allocation11_spill] sm:$0xff] %v2881_v52  ;;  %v771_v34 = vrot.slane %v769_v5, 1  ;;  %v995_v44 = vsel %vm568_vm0, %v992_v53, %v994_v6 }
  0x47   : > { %1119 = vrot.lane.b32.xlu1 %v2674_v16, %s2471_s12  ;;  %v863_v47 = vor.u32 %v861_v38, %v859_v39  ;;  %v2924_v39 = vcombine.low %v181_v19, %v2911_v37  ;;  %v372_v10 = vshll.u32 %v2929_v8, 16 }
  0x48   : > { %v772_v42 = vsel %vm323_vm1, %v767_v58, %v771_v34  ;;  %v869_v58 = vshrl.u32 %v2884_v59, 16 }
  0x49   : > { %v868_v43 = vsel %vm323_vm1, %v863_v47, %v867_v46  ;;  %v468_v38 = vshll.u32 %v2924_v39, 16  ;;  %v374_v17 = vrot.slane %v372_v10, 1 }
  0x4a   : > { %1175 = vrot.lane.b32.xlu0 %v2872_v18, %s2472_s13 }
  0x4b   : > { %1199 = vrot.lane.b32.xlu1 %v2868_v51, %s2472_s13 }
  0x4e   : > { %524 = vrot.lane.b32.xlu0 %v351_v2, %s2469_s30  ;;  %v464_v2 = vshrl.u32 %v2816_v48, 16 }
  0x4f   : > { %548 = vrot.lane.b32.xlu1 %v2881_v52, %s2469_s30 }
  0x50   : > { %v466_v5 = vor.u32 %v464_v2, %v462_v26  ;;  %v2960_v26 = vcombine.low %v2803_v45, %v181_v19  ;;  %v159_v2 = vld [vmem:[%s2512_s18 + $0x38] sm:$0xf] }
  0x52   : > { %622 = vrot.lane.b32.xlu0 %v575_v1, %s2468_s27  ;;  %v368_v1 = vshrl.u32 %v2823_v55, 16 }
  0x53   : > { %646 = vrot.lane.b32.xlu1 %v2897_v54, %s2468_s27 }
  0x54   : > { %v370_v47 = vor.u32 %v368_v1, %v366_v40  ;;  %v2963_v40 = vcombine.low %v2807_v33, %v157_v22  ;;  %v871_v33 = vor.u32 %v869_v58, %v867_v46 }
  0x56   : > { %698 = vrot.lane.b32.xlu0 %v2772_v21, %s2466_s21  ;;  %v2953_v53 = vsel %vm323_vm1, %v370_v47, %v374_v17  ;;  %v777_v45 = vshll.u32 %v2963_v40, 16  ;;  %v376_v47 = vshrl.u32 %v2929_v8, 16  ;;  %v4144_v54 = vrot.slane %v2963_v40, 1 }
  0x57   : > { %722 = vrot.lane.b32.xlu1 %v2761_v56, %s2466_s21  ;;  %v470_v56 = vrot.slane %v468_v38, 1  ;;  %v2983_v38 = vld [vmem:[%s2512_s18 + $0x3c] sm:$0xf] }
  0x58   : > { %v779_v22 = vrot.slane %v777_v45, 1  ;;  %v2997_v1 = vcombine.low %v159_v2, %v2983_v38  ;;  %v378_v45 = vor.u32 %v376_v47, %v374_v17 }
  0x59   : > { %v2950_v21 = vsel %vm323_vm1, %v466_v5, %v470_v56 }
  0x5a   : > { %945 = vrot.lane.b32.xlu0 %v772_v42, %s2470_s7  ;;  %v773_v42 = vshrl.u32 %v2889_v12, 16  ;;  %v380_v58 = vshll.u32 %v2997_v1, 16 }
  0x5b   : > { %969 = vrot.lane.b32.xlu1 %v868_v43, %s2470_s7  ;;  %v873_v43 = vshll.u32 %v2960_v26, 16 }
  0x5d   : > { %v875_v19 = vrot.slane %v873_v43, 1 }
  0x5e   : > { %1042 = vrot.lane.b32.xlu0 %v995_v44, %s2467_s26  ;;  %v4106_v44 = vrot.slane %v2963_v40, 1 }
  0x5f   : > { %1066 = vrot.lane.b32.xlu1 %v1019_v30, %s2467_s26  ;;  %v183_v30 = vld [vmem:[%s2512_s18 + $0x98] sm:$0xf] }
  0x60   : > { %v997_v5 = vsel %vm568_vm0, %v994_v6, %v4106_v44  ;;  %v3032_v17 = vcombine.low %v2911_v37, %v183_v30 }
  0x62   : > { %1097 = vrot.lane.b32.xlu0 %v2823_v55, %s2471_s12 }
  0x63   : > { %1121 = vrot.lane.b32.xlu1 %v2816_v48, %s2471_s12 }
  0x66   : > { %1177 = vrot.lane.b32.xlu0 %v2953_v53, %s2472_s13 }
  0x67   : > { %1201 = vrot.lane.b32.xlu1 %v2950_v21, %s2472_s13 }
  0x6a   : > { %526 = vrot.lane.b32.xlu0 %v2752_v3, %s2469_s30  ;;  %v2979_v3 = vld [vmem:[%s2512_s18 + $0x9c] sm:$0xf] }
  0x6b   : > { %550 = vrot.lane.b32.xlu1 %v2744_v60, %s2469_s30  ;;  %v775_v60 = vor.u32 %v773_v42, %v771_v34  ;;  %v2992_v46 = vcombine.low %v183_v30, %v2979_v3  ;;  %v877_v30 = vshrl.u32 %v2960_v26, 16 }
  0x6d   : > { %v780_v34 = vsel %vm323_vm1, %v775_v60, %v779_v22  ;;  %v476_v10 = vshll.u32 %v2992_v46, 16  ;;  %v4104_v60 = vrot.slane %v2823_v55, 1  ;;  %v4126_v11 = vrot.slane %v2992_v46, 1 }
  0x6e   : > { %624 = vrot.lane.b32.xlu0 %v2844_v32, %s2468_s27  ;;  %v1020_v32 = vrot.slane %v2960_v26, 1 }
  0x6f   : > { %648 = vrot.lane.b32.xlu1 %v2839_v63, %s2468_s27  ;;  %v876_v63 = vsel %vm323_vm1, %v871_v33, %v875_v19  ;;  %v478_v42 = vrot.slane %v476_v10, 1 }
  0x72   : > { %700 = vrot.lane.b32.xlu0 %v2889_v12, %s2466_s21  ;;  %v472_v12 = vshrl.u32 %v2924_v39, 16 }
  0x73   : > { %724 = vrot.lane.b32.xlu1 %v2884_v59, %s2466_s21  ;;  %v1021_v59 = vsel %vm568_vm0, %v1018_v61, %v1020_v32  ;;  %v3013_v61 = vrot.slane %v380_v58, 1 }
  0x74   : > { %v474_v43 = vor.u32 %v472_v12, %v470_v56  ;;  %v4105_v56 = vrot.slane %v2816_v48, 1 }
  0x75   : > { %v3024_v33 = vsel %vm323_vm1, %v378_v45, %v3013_v61  ;;  %v161_v45 = vld [vmem:[%s2512_s18 + $0x40] sm:$0xf] }
  0x76   : > { %947 = vrot.lane.b32.xlu0 %v780_v34, %s2470_s7  ;;  %v3020_v6 = vsel %vm323_vm1, %v474_v43, %v478_v42  ;;  %v3047_v37 = vsel %vm568_vm0, %v600_v27, %v4105_v56  ;;  %v3072_v43 = vld [vmem:[%s2512_s18 + $0xa4] sm:$0xf]  ;;  %v3092_v25 = vcombine.low %v161_v45, %v3076_v29  ;;  %v480_v56 = vshrl.u32 %v2992_v46, 16 }
  0x77   : > { %971 = vrot.lane.b32.xlu1 %v876_v63, %s2470_s7  ;;  %v3036_v63 = vcombine.low %v2915_v31, %v159_v2  ;;  %v881_v31 = vshll.u32 %v3032_v17, 16  ;;  %v781_v2 = vshrl.u32 %v2963_v40, 16 }
  0x79   : > { %v785_v27 = vshll.u32 %v3036_v63, 16  ;;  %v3064_v12 = vrot.slane %v881_v31, 1  ;;  %v783_v47 = vor.u32 %v781_v2, %v779_v22 }
  0x7a   : > { %1044 = vrot.lane.b32.xlu0 %v997_v5, %s2467_s26 }
  0x7b   : > { %1068 = vrot.lane.b32.xlu1 %v1021_v59, %s2467_s26  ;;  %v879_v59 = vor.u32 %v877_v30, %v875_v19  ;;  %v3068_v58 = vrot.slane %v785_v27, 1  ;;  %v4110_v30 = vrot.slane %v3032_v17, 1  ;;  %v4111_v27 = vrot.slane %v3036_v63, 1 }
  0x7d   : > { %v884_v19 = vsel %vm323_vm1, %v879_v59, %v3064_v12  ;;  %v788_v2 = vsel %vm323_vm1, %v783_v47, %v3068_v58  ;;  %v1023_v59 = vsel %vm568_vm0, %v1020_v32, %v4110_v30  ;;  %v999_v49 = vsel %vm568_vm0, %v4144_v54, %v4111_v27 }
  0x7e   : > { %1099 = vrot.lane.b32.xlu0 %v2929_v8, %s2471_s12 }
  0x7f   : > { %1123 = vrot.lane.b32.xlu1 %v2924_v39, %s2471_s12 }
  0x82   : > { %1179 = vrot.lane.b32.xlu0 %v3024_v33, %s2472_s13 }
  0x83   : > { %1203 = vrot.lane.b32.xlu1 %v3020_v6, %s2472_s13 }
  0x86   : > { %v719_v34 = vpop.permute.xlu1 %718  ;;  %528 = vrot.lane.b32.xlu0 %v2872_v18, %s2469_s30  ;;  %v3056_v18 = vsel %vm568_vm0, %v576_v50, %v4104_v60  ;;  %v185_v50 = vld [vmem:[%s2512_s18 + $0xa0] sm:$0xf] }
  0x87   : > { %552 = vrot.lane.b32.xlu1 %v2868_v51, %s2469_s30  ;;  %v3086_v22 = vcombine.low %v185_v50, %v3072_v43 }
  0x88   : > { %v695_v51 = vpop.permute.xlu0 %694 }
  0x89   : > { %v484_v47 = vshll.u32 %v3086_v22, 16 }
  0x8a   : > { %626 = vrot.lane.b32.xlu0 %v3056_v18, %s2468_s27 }
  0x8b   : > { %650 = vrot.lane.b32.xlu1 %v3047_v37, %s2468_s27  ;;  %v3117_v54 = vrot.slane %v484_v47, 1 }
  0x8c   : > { %v3066_v10 = vpop.permute.xlu0 %1038 }
  0x8d   : > { %v619_v5 = vpop.permute.xlu1 %618 }
  0x8e   : > { %702 = vrot.lane.b32.xlu0 %v2963_v40, %s2466_s21  ;;  %v482_v40 = vor.u32 %v480_v56, %v478_v42 }
  0x8f   : > { %726 = vrot.lane.b32.xlu1 %v2960_v26, %s2466_s21 }
  0x90   : > { %v521_v60 = vpop.permute.xlu0 %520 }
  0x91   : > { %v643_v31 = vpop.permute.xlu1 %642  ;;  %v1231_v26 = vsel %vm1229_vm2, %v2571_v24, %v521_v60 }
  0x92   : > { %949 = vrot.lane.b32.xlu0 %v788_v2, %s2470_s7  ;;  %v388_v2 = vshll.u32 %v3092_v25, 16  ;;  %v1280_v24 = vsel %vm1278_vm3, %v1231_v26, %v619_v5 }
  0x93   : > { %973 = vrot.lane.b32.xlu1 %v884_v19, %s2470_s7  ;;  %v384_v19 = vshrl.u32 %v2997_v1, 16 }
  0x94   : > { %v545_v35 = vpop.permute.xlu0 %544  ;;  %v3120_v7 = vrot.slane %v388_v2, 1  ;;  %v3153_v2 = vcombine.low %v2983_v38, %v161_v45  ;;  %v4145_v38 = vrot.slane %v2816_v48, 1 }
  0x95   : > { %v1063_v44 = vpop.permute.xlu1 %1062  ;;  %v1255_v32 = vsel %vm1229_vm2, %v2544_v13, %v545_v35  ;;  %v386_v52 = vor.u32 %v384_v19, %v3013_v61  ;;  %v1329_v61 = vsel %vm1327_vm4, %v1280_v24, %v695_v51  ;;  %v4115_v51 = vrot.slane %v2924_v39, 1 }
  0x96   : > { %v1304_v30 = vsel %vm1278_vm3, %v1255_v32, %v643_v31  ;;  %1046 = vrot.lane.b32.xlu0 %v999_v49, %s2467_s26  ;;  %v3130_v49 = vsel %vm323_vm1, %v482_v40, %v3117_v54  ;;  %v4114_v19 = vrot.slane %v2929_v8, 1  ;;  %v4146_v40 = vrot.slane %v2823_v55, 1 }
  0x97   : > { %1070 = vrot.lane.b32.xlu1 %v1023_v59, %s2467_s26  ;;  %v1353_v35 = vsel %vm1327_vm4, %v1304_v30, %v719_v34  ;;  %v3136_v34 = vsel %vm323_vm1, %v386_v52, %v3120_v7  ;;  %v789_v24 = vshrl.u32 %v3036_v63, 16 }
  0x98   : > { %v942_v60 = vpop.permute.xlu0 %941 }
  0x99   : > { %v966_v27 = vpop.permute.xlu1 %965  ;;  %v1378_v5 = vsel %vm1376_vm5, %v1329_v61, %v942_v60 }
  0x9a   : > { %1101 = vrot.lane.b32.xlu0 %v2997_v1, %s2471_s12  ;;  %v1402_v42 = vsel %vm1376_vm5, %v1353_v35, %v966_v27  ;;  %v3146_v27 = vcombine.low %v2979_v3, %v185_v50  ;;  %v1427_v59 = vsel %vm1425_vm6, %v1378_v5, %v3066_v10  ;;  %v3167_v10 = vsel %vm568_vm0, %v4145_v38, %v4115_v51  ;;  %v3219_v38 = vld [vmem:[%s2512_s18 + $0x5c] sm:$0xf] }
  0x9b   : > { %1125 = vrot.lane.b32.xlu1 %v2992_v46, %s2471_s12  ;;  %v1451_v31 = vsel %vm1425_vm6, %v1402_v42, %v1063_v44  ;;  %v885_v50 = vshrl.u32 %v3032_v17, 16  ;;  %v793_v35 = vshll.u32 %v3153_v2, 16  ;;  %v791_v5 = vor.u32 %v789_v24, %v3068_v58 }
  0x9c   : > { %v1094_v30 = vpop.permute.xlu0 %1093  ;;  %v889_v45 = vshll.u32 %v3146_v27, 16  ;;  %v4116_v58 = vrot.slane %v3146_v27, 1 }
  0x9d   : > { %v1118_v56 = vpop.permute.xlu1 %1117  ;;  %v1476_v44 = vsel %vm1474_vm7, %v1427_v59, %v1094_v30  ;;  %v887_v42 = vor.u32 %v885_v50, %v3064_v12  ;;  %v3192_v30 = vrot.slane %v793_v35, 1  ;;  %v3200_v59 = vld [vmem:[%s2512_s18 + $0x4c] sm:$0xf]  ;;  %v488_v35 = vshrl.u32 %v3086_v22, 16 }
  0x9e   : > { %1181 = vrot.lane.b32.xlu0 %v3136_v34, %s2472_s13  ;;  %v1500_v52 = vsel %vm1474_vm7, %v1451_v31, %v1118_v56  ;;  %v3189_v61 = vrot.slane %v889_v45, 1  ;;  %v3196_v31 = vld [vmem:[%s2512_s18 + $0xac] sm:$0xf]  ;;  %v3223_v45 = vcombine.low %v3219_v38, %v2531_v9  ;;  %v4148_v9 = vrot.slane %v3036_v63, 1 }
  0x9f   : > { %1205 = vrot.lane.b32.xlu1 %v3130_v49, %s2472_s13 }
  0xa0   : > { %v1174_v26 = vpop.permute.xlu0 %1173  ;;  %v892_v12 = vsel %vm323_vm1, %v887_v42, %v3189_v61 }
  0xa1   : > { %v1198_v47 = vpop.permute.xlu1 %1197  ;;  %v1525_v3 = vsel %vm1523_vm8, %v1476_v44, %v1174_v26  ;;  %v796_v26 = vsel %vm323_vm1, %v791_v5, %v3192_v30 }
  0xa2   : > { %v1561_v32 = vsel %vm1523_vm8, %v1500_v52, %v1198_v47  ;;  %530 = vrot.lane.b32.xlu0 %v2953_v53, %s2469_s30  ;;  %1773 = vmatmul.mubr.bf16.vlgmr.msra.gmra.mxu0 %v1525_v3  ;;  %v3176_v53 = vsel %vm568_vm0, %v4146_v40, %v4114_v19  ;;  %v163_v52 = vld [vmem:[%s2512_s18 + $0x48] sm:$0xf]  ;;  %v4147_v40 = vrot.slane %v3032_v17, 1 }
  0xa3   : > { %554 = vrot.lane.b32.xlu1 %v2950_v21, %s2469_s30  ;;  %1869 = vmatmul.mubr.bf16.vlgmr.msra.gmra.mxu1 %v1561_v32  ;;  %v4119_v32 = vrot.slane %v3153_v2, 1  ;;  %v3216_v3 = vcombine.low %v163_v52, %v3200_v59 }
  0xa4   : > { %2269 = vmatprep.mubr.msk.bf16.mxu0 %vm1229_vm2, %v3056_v18  ;;  %2281 = vmatprep.mubr.msk.bf16.mxu1 %vm1229_vm2, %v3047_v37  ;;  %v523_v60 = vpop.permute.xlu0 %522  ;;  %v187_v18 = vld [vmem:[%s2512_s18 + $0xa8] sm:$0xf]  ;;  %v1025_v24 = vsel %vm568_vm0, %v4147_v40, %v4116_v58  ;;  %v490_v40 = vor.u32 %v488_v35, %v3117_v54 }
  0xa5   : > { %v547_v21 = vpop.permute.xlu1 %546  ;;  %v3210_v47 = vcombine.low %v187_v18, %v3196_v31  ;;  %v1001_v19 = vsel %vm568_vm0, %v4148_v9, %v4119_v32  ;;  %v1233_v35 = vsel %vm1229_vm2, %v2568_v23, %v523_v60 }
  0xa6   : > { %628 = vrot.lane.b32.xlu0 %v3176_v53, %s2468_s27 }
  0xa7   : > { %652 = vrot.lane.b32.xlu1 %v3167_v10, %s2468_s27  ;;  %v492_v42 = vshll.u32 %v3210_v47, 16 }
  0xa8   : > { %v621_v37 = vpop.permute.xlu0 %620 }
  0xa9   : > { %v645_v56 = vpop.permute.xlu1 %644  ;;  %v3245_v58 = vrot.slane %v492_v42, 1 }
  0xaa   : > { %704 = vrot.lane.b32.xlu0 %v3036_v63, %s2466_s21 }
  0xab   : > { %728 = vrot.lane.b32.xlu1 %v3032_v17, %s2466_s21  ;;  %v825_v17 = vshll.u32 %v3223_v45, 16  ;;  %v3261_v54 = vsel %vm323_vm1, %v490_v40, %v3245_v58 }
  0xac   : > { %v697_v50 = vpop.permute.xlu0 %696 }
  0xad   : > { %v721_v44 = vpop.permute.xlu1 %720  ;;  %v3252_v32 = vrot.slane %v825_v17, 1  ;;  %v1282_v17 = vsel %vm1278_vm3, %v1233_v35, %v621_v37  ;;  %v893_v35 = vshrl.u32 %v3146_v27, 16 }
  0xae   : > { %951 = vrot.lane.b32.xlu0 %v796_v26, %s2470_s7  ;;  %v396_v26 = vshll.u32 %v3216_v3, 16  ;;  %v1331_v23 = vsel %vm1327_vm4, %v1282_v17, %v697_v50  ;;  %v797_v17 = vshrl.u32 %v3153_v2, 16 }
  0xaf   : > { %975 = vrot.lane.b32.xlu1 %v892_v12, %s2470_s7  ;;  %v392_v12 = vshrl.u32 %v3092_v25, 16 }
  0xb0   : > { %v944_v51 = vpop.permute.xlu0 %943  ;;  %v3248_v0 = vrot.slane %v396_v26, 1 }
  0xb1   : > { %v968_v5 = vpop.permute.xlu1 %967  ;;  %v394_v63 = vor.u32 %v392_v12, %v3120_v7  ;;  %v833_v7 = vshll.u32 %v2548_v15, 16  ;;  %v1380_v37 = vsel %vm1376_vm5, %v1331_v23, %v944_v51  ;;  %v4123_v51 = vrot.slane %v2548_v15, 1 }
  0xb2   : > { %1048 = vrot.lane.b32.xlu0 %v1001_v19, %s2467_s26  ;;  %v1257_v19 = vsel %vm1229_vm2, %v2546_v14, %v547_v21 }
  0xb3   : > { %1072 = vrot.lane.b32.xlu1 %v1025_v24, %s2467_s26  ;;  %v829_v24 = vshrl.u32 %v3223_v45, 16  ;;  %v1306_v42 = vsel %vm1278_vm3, %v1257_v19, %v645_v56  ;;  %v3269_v26 = vsel %vm323_vm1, %v394_v63, %v3248_v0  ;;  %v3275_v55 = vrot.slane %v833_v7, 1 }
  0xb4   : > { %v1041_v9 = vpop.permute.xlu0 %1040  ;;  %v1355_v14 = vsel %vm1327_vm4, %v1306_v42, %v721_v44  ;;  %v4125_v56 = vrot.slane %v2997_v1, 1  ;;  %v3283_v63 = vcombine.low %v3072_v43, %v187_v18  ;;  %v4124_v18 = vrot.slane %v3223_v45, 1 }
  0xb5   : > { %v1065_v57 = vpop.permute.xlu1 %1064  ;;  %v831_v21 = vor.u32 %v829_v24, %v3252_v32  ;;  %4149 = vst [vmem:[#allocation13_spill] sm:$0xff] %v3275_v55  ;;  %v1404_v60 = vsel %vm1376_vm5, %v1355_v14, %v968_v5  ;;  %v3290_v24 = vcombine.low %v3076_v29, %v163_v52  ;;  %v1429_v50 = vsel %vm1425_vm6, %v1380_v37, %v1041_v9 }
  0xb6   : > { %1103 = vrot.lane.b32.xlu0 %v3092_v25, %s2471_s12  ;;  %v1453_v44 = vsel %vm1425_vm6, %v1404_v60, %v1065_v57  ;;  %v3310_v52 = vsel %vm568_vm0, %v4124_v18, %v4123_v51  ;;  %v4150_v9 = vrot.slane %v2924_v39, 1  ;;  %v897_v42 = vshll.u32 %v3283_v63, 16 }
  0xb7   : > { %1127 = vrot.lane.b32.xlu1 %v3086_v22, %s2471_s12  ;;  %v3294_v14 = vsel %vm323_vm1, %v831_v21, %v3275_v55  ;;  %v4151_v21 = vrot.slane %v2929_v8, 1  ;;  %v895_v60 = vor.u32 %v893_v35, %v3189_v61  ;;  %v1002_v35 = vrot.slane %v3290_v24, 1 }
  0xb8   : > { %v1096_v40 = vpop.permute.xlu0 %1095  ;;  %v3341_v37 = vrot.slane %v897_v42, 1  ;;  %v4153_v18 = vrot.slane %v3153_v2, 1 }
  0xb9   : > { %v1120_v12 = vpop.permute.xlu1 %1119  ;;  %v1478_v57 = vsel %vm1474_vm7, %v1429_v50, %v1096_v40  ;;  %v801_v40 = vshll.u32 %v3290_v24, 16  ;;  %v799_v50 = vor.u32 %v797_v17, %v3192_v30  ;;  %v4127_v30 = vrot.slane %v3283_v63, 1 }
  0xba   : > { %1183 = vrot.lane.b32.xlu0 %v3269_v26, %s2472_s13  ;;  %v1502_v5 = vsel %vm1474_vm7, %v1453_v44, %v1120_v12  ;;  %v900_v61 = vsel %vm323_vm1, %v895_v60, %v3341_v37  ;;  %v4152_v17 = vrot.slane %v3146_v27, 1  ;;  %v496_v60 = vshrl.u32 %v3210_v47, 16 }
  0xbb   : > { %1207 = vrot.lane.b32.xlu1 %v3261_v54, %s2472_s13 }
  0xbc   : > { %v1176_v19 = vpop.permute.xlu0 %1175 }
  0xbd   : > { %v1200_v43 = vpop.permute.xlu1 %1199  ;;  %v1528_v29 = vsel %vm1523_vm8, %v1478_v57, %v1176_v19  ;;  %v165_v57 = vld [vmem:[%s2512_s18 + $0x50] sm:$0xf]  ;;  %v3352_v19 = vld [vmem:[%s2512_s18 + $0x54] sm:$0xf] }
  0xbe   : > { %v1564_v7 = vsel %vm1523_vm8, %v1502_v5, %v1200_v43  ;;  %532 = vrot.lane.b32.xlu0 %v3024_v33, %s2469_s30  ;;  %1781 = vmatmul.mubr.bf16.gmra.mxu0 %v1528_v29  ;;  %v3328_v33 = vsel %vm568_vm0, %v4151_v21, %v4125_v56  ;;  %v3344_v5 = vrot.slane %v801_v40, 1  ;;  %v3348_v43 = vld [vmem:[%s2512_s18 + $0xb4] sm:$0xf]  ;;  %v3368_v42 = vcombine.low %v165_v57, %v3352_v19 }
  0xbf   : > { %556 = vrot.lane.b32.xlu1 %v3020_v6, %s2469_s30  ;;  %1877 = vmatmul.mubr.bf16.gmra.mxu1 %v1564_v7  ;;  %v3319_v6 = vsel %vm568_vm0, %v4150_v9, %v4126_v11  ;;  %v1027_v40 = vsel %vm568_vm0, %v4152_v17, %v4127_v30  ;;  %v1003_v56 = vsel %vm568_vm0, %v4153_v18, %v1002_v35 }
  0xc0   : > { %2270 = vmatprep.mubr.msk.bf16.mxu0 %vm1229_vm2, %v3176_v53  ;;  %2282 = vmatprep.mubr.msk.bf16.mxu1 %vm1229_vm2, %v3167_v10  ;;  %v525_v23 = vpop.permute.xlu0 %524  ;;  %v189_v53 = vld [vmem:[%s2512_s18 + $0xb0] sm:$0xf]  ;;  %v804_v9 = vsel %vm323_vm1, %v799_v50, %v3344_v5 }
  0xc1   : > { %v549_v12 = vpop.permute.xlu1 %548  ;;  %v3362_v7 = vcombine.low %v189_v53, %v3348_v43 }
  0xc2   : > { %630 = vrot.lane.b32.xlu0 %v3328_v33, %s2468_s27  ;;  %v1259_v18 = vsel %vm1229_vm2, %v2694_v36, %v549_v12 }
  0xc3   : > { %654 = vrot.lane.b32.xlu1 %v3319_v6, %s2468_s27  ;;  %v500_v50 = vshll.u32 %v3362_v7, 16 }
  0xc4   : > { %v623_v10 = vpop.permute.xlu0 %622 }
  0xc5   : > { %v647_v44 = vpop.permute.xlu1 %646  ;;  %v3389_v17 = vrot.slane %v500_v50, 1 }
  0xc6   : > { %706 = vrot.lane.b32.xlu0 %v3153_v2, %s2466_s21 }
  0xc7   : > { %730 = vrot.lane.b32.xlu1 %v3146_v27, %s2466_s21  ;;  %v498_v27 = vor.u32 %v496_v60, %v3245_v58 }
  0xc8   : > { %v699_v21 = vpop.permute.xlu0 %698 }
  0xc9   : > { %v723_v29 = vpop.permute.xlu1 %722  ;;  %v3402_v58 = vsel %vm323_vm1, %v498_v27, %v3389_v17 }
  0xca   : > { %953 = vrot.lane.b32.xlu0 %v804_v9, %s2470_s7  ;;  %v404_v9 = vshll.u32 %v3368_v42, 16 }
  0xcb   : > { %977 = vrot.lane.b32.xlu1 %v900_v61, %s2470_s7  ;;  %v400_v61 = vshrl.u32 %v3216_v3, 16 }
  0xcc   : > { %v946_v11 = vpop.permute.xlu0 %945  ;;  %v3392_v15 = vrot.slane %v404_v9, 1 }
  0xcd   : > { %v970_v51 = vpop.permute.xlu1 %969  ;;  %v402_v55 = vor.u32 %v400_v61, %v3248_v0  ;;  %v1308_v0 = vsel %vm1278_vm3, %v1259_v18, %v647_v44  ;;  %v3423_v44 = vcombine.low %v3196_v31, %v189_v53  ;;  %v3429_v18 = vcombine.low %v3200_v59, %v165_v57 }
  0xce   : > { %1050 = vrot.lane.b32.xlu0 %v1003_v56, %s2467_s26  ;;  %v1235_v56 = vsel %vm1229_vm2, %v2710_v4, %v525_v23  ;;  %v1357_v12 = vsel %vm1327_vm4, %v1308_v0, %v723_v29  ;;  %v4154_v59 = vrot.slane %v2992_v46, 1  ;;  %v901_v57 = vshrl.u32 %v3283_v63, 16 }
  0xcf   : > { %1074 = vrot.lane.b32.xlu1 %v1027_v40, %s2467_s26  ;;  %v3409_v60 = vsel %vm323_vm1, %v402_v55, %v3392_v15  ;;  %v1284_v50 = vsel %vm1278_vm3, %v1235_v56, %v623_v10  ;;  %v1406_v27 = vsel %vm1376_vm5, %v1357_v12, %v970_v51  ;;  %v608_v55 = vrot.slane %v3086_v22, 1 }
  0xd0   : > { %v1043_v2 = vpop.permute.xlu0 %1042  ;;  %v1333_v9 = vsel %vm1327_vm4, %v1284_v50, %v699_v21  ;;  %v4132_v21 = vrot.slane %v3092_v25, 1  ;;  %v4155_v0 = vrot.slane %v2997_v1, 1  ;;  %v809_v50 = vshll.u32 %v3429_v18, 16 }
  0xd1   : > { %v1067_v30 = vpop.permute.xlu1 %1066  ;;  %v1382_v4 = vsel %vm1376_vm5, %v1333_v9, %v946_v11  ;;  %v3443_v53 = vsel %vm568_vm0, %v4154_v59, %v608_v55 }
  0xd2   : > { %1105 = vrot.lane.b32.xlu0 %v3216_v3, %s2471_s12  ;;  %v1455_v23 = vsel %vm1425_vm6, %v1406_v27, %v1067_v30  ;;  %v1431_v10 = vsel %vm1425_vm6, %v1382_v4, %v1043_v2  ;;  %v905_v2 = vshll.u32 %v3423_v44, 16 }
  0xd3   : > { %1129 = vrot.lane.b32.xlu1 %v3210_v47, %s2471_s12 }
  0xd4   : > { %v1098_v61 = vpop.permute.xlu0 %1097  ;;  %v3465_v9 = vrot.slane %v905_v2, 1 }
  0xd5   : > { %v1122_v40 = vpop.permute.xlu1 %1121  ;;  %v1480_v11 = vsel %vm1474_vm7, %v1431_v10, %v1098_v61  ;;  %v903_v61 = vor.u32 %v901_v57, %v3341_v37  ;;  %v3472_v10 = vld [vmem:[%s2512_s18 + $0xbc] sm:$0xf]  ;;  %v4156_v57 = vrot.slane %v3283_v63, 1 }
  0xd6   : > { %1185 = vrot.lane.b32.xlu0 %v3409_v60, %s2472_s13  ;;  %v1504_v29 = vsel %vm1474_vm7, %v1455_v23, %v1122_v40  ;;  %v805_v40 = vshrl.u32 %v3290_v24, 16  ;;  %v3468_v23 = vrot.slane %v809_v50, 1 }
  0xd7   : > { %1209 = vrot.lane.b32.xlu1 %v3402_v58, %s2472_s13  ;;  %v908_v37 = vsel %vm323_vm1, %v903_v61, %v3465_v9  ;;  %v408_v61 = vshrl.u32 %v3368_v42, 16 }
  0xd8   : > { %v1178_v30 = vpop.permute.xlu0 %1177  ;;  %v807_v4 = vor.u32 %v805_v40, %v3344_v5 }
  0xd9   : > { %v1202_v51 = vpop.permute.xlu1 %1201  ;;  %v1531_v31 = vsel %vm1523_vm8, %v1480_v11, %v1178_v30 }
  0xda   : > { %v1567_v56 = vsel %vm1523_vm8, %v1504_v29, %v1202_v51  ;;  %534 = vrot.lane.b32.xlu0 %v3136_v34, %s2469_s30  ;;  %1789 = vmatmul.mubr.bf16.gmra.mxu0 %v1531_v31  ;;  %v3452_v34 = vsel %vm568_vm0, %v4155_v0, %v4132_v21  ;;  %v4131_v51 = vrot.slane %v3423_v44, 1  ;;  %v1004_v31 = vrot.slane %v3429_v18, 1 }
  0xdb   : > { %558 = vrot.lane.b32.xlu1 %v3130_v49, %s2469_s30  ;;  %1885 = vmatmul.mubr.bf16.gmra.mxu1 %v1567_v56  ;;  %v812_v56 = vsel %vm323_vm1, %v807_v4, %v3468_v23 }
  0xdc   : > { %2271 = vmatprep.mubr.msk.bf16.mxu0 %vm1229_vm2, %v3328_v33  ;;  %2283 = vmatprep.mubr.msk.bf16.mxu1 %vm1229_vm2, %v3319_v6  ;;  %v527_v12 = vpop.permute.xlu0 %526  ;;  %v191_v33 = vld [vmem:[%s2512_s18 + $0xb8] sm:$0xf]  ;;  %v1029_v2 = vsel %vm568_vm0, %v4156_v57, %v4131_v51  ;;  %v1005_v50 = vsel %vm568_vm0, %v1002_v35, %v1004_v31  ;;  %v410_v51 = vor.u32 %v408_v61, %v3392_v15 }
  0xdd   : > { %v551_v49 = vpop.permute.xlu1 %550  ;;  %v167_v6 = vld [vmem:[%s2512_s18 + $0x58] sm:$0xf]  ;;  %v3483_v5 = vcombine.low %v191_v33, %v3472_v10 }
  0xde   : > { %632 = vrot.lane.b32.xlu0 %v3452_v34, %s2468_s27  ;;  %v3486_v11 = vcombine.low %v167_v6, %v3219_v38  ;;  %v504_v38 = vshrl.u32 %v3362_v7, 16  ;;  %v1261_v35 = vsel %vm1229_vm2, %v2648_v62, %v551_v49 }
  0xdf   : > { %656 = vrot.lane.b32.xlu1 %v3443_v53, %s2468_s27  ;;  %v508_v0 = vshll.u32 %v3483_v5, 16 }
  0xe0   : > { %v625_v29 = vpop.permute.xlu0 %624  ;;  %v412_v4 = vshll.u32 %v3486_v11, 16 }
  0xe1   : > { %v649_v27 = vpop.permute.xlu1 %648 }
  0xe2   : > { %708 = vrot.lane.b32.xlu0 %v3290_v24, %s2466_s21  ;;  %v3513_v21 = vrot.slane %v412_v4, 1  ;;  %v1310_v15 = vsel %vm1278_vm3, %v1261_v35, %v649_v27  ;;  %v610_v27 = vrot.slane %v3210_v47, 1 }
  0xe3   : > { %732 = vrot.lane.b32.xlu1 %v3283_v63, %s2466_s21  ;;  %v506_v63 = vor.u32 %v504_v38, %v3389_v17 }
  0xe4   : > { %v701_v59 = vpop.permute.xlu0 %700 }
  0xe5   : > { %v725_v30 = vpop.permute.xlu1 %724 }
  0xe6   : > { %955 = vrot.lane.b32.xlu0 %v812_v56, %s2470_s7  ;;  %v3510_v56 = vrot.slane %v508_v0, 1  ;;  %v3530_v0 = vsel %vm323_vm1, %v410_v51, %v3513_v21  ;;  %v1359_v62 = vsel %vm1327_vm4, %v1310_v15, %v725_v30 }
  0xe7   : > { %979 = vrot.lane.b32.xlu1 %v908_v37, %s2470_s7 }
  0xe8   : > { %v948_v37 = vpop.permute.xlu0 %947  ;;  %v3523_v17 = vsel %vm323_vm1, %v506_v63, %v3510_v56  ;;  %v3550_v63 = vcombine.low %v3352_v19, %v167_v6  ;;  %v3564_v19 = vsel %vm568_vm0, %v608_v55, %v610_v27 }
  0xe9   : > { %v972_v40 = vpop.permute.xlu1 %971 }
  0xea   : > { %1052 = vrot.lane.b32.xlu0 %v1005_v50, %s2467_s26  ;;  %v1408_v4 = vsel %vm1376_vm5, %v1359_v62, %v972_v40  ;;  %v586_v40 = vrot.slane %v3216_v3, 1  ;;  %v817_v15 = vshll.u32 %v3550_v63, 16 }
  0xeb   : > { %1076 = vrot.lane.b32.xlu1 %v1029_v2, %s2467_s26  ;;  %v1237_v2 = vsel %vm1229_vm2, %v2678_v20, %v527_v12 }
  0xec   : > { %v1045_v24 = vpop.permute.xlu0 %1044  ;;  %v1286_v50 = vsel %vm1278_vm3, %v1237_v2, %v625_v29  ;;  %v3544_v29 = vcombine.low %v3348_v43, %v191_v33  ;;  %v909_v33 = vshrl.u32 %v3423_v44, 16  ;;  %v813_v2 = vshrl.u32 %v3429_v18, 16 }
  0xed   : > { %v1069_v57 = vpop.permute.xlu1 %1068  ;;  %v1335_v61 = vsel %vm1327_vm4, %v1286_v50, %v701_v59 }
  0xee   : > { %1107 = vrot.lane.b32.xlu0 %v3368_v42, %s2471_s12  ;;  %v1384_v20 = vsel %vm1376_vm5, %v1335_v61, %v948_v37  ;;  %v1457_v12 = vsel %vm1425_vm6, %v1408_v4, %v1069_v57  ;;  %v913_v6 = vshll.u32 %v3544_v29, 16  ;;  %v3589_v61 = vrot.slane %v817_v15, 1  ;;  %v3595_v4 = vld [vmem:[%s2512_s18 + $0xc4] sm:$0xf] }
  0xef   : > { %1131 = vrot.lane.b32.xlu1 %v3362_v7, %s2471_s12  ;;  %v1433_v51 = vsel %vm1425_vm6, %v1384_v20, %v1045_v24  ;;  %v4157_v24 = vrot.slane %v3092_v25, 1  ;;  %v1030_v20 = vrot.slane %v3544_v29, 1 }
  0xf0   : > { %v1100_v49 = vpop.permute.xlu0 %1099  ;;  %v3586_v50 = vrot.slane %v913_v6, 1 }
  0xf1   : > { %v1124_v38 = vpop.permute.xlu1 %1123  ;;  %v1482_v37 = vsel %vm1474_vm7, %v1433_v51, %v1100_v49  ;;  %v815_v49 = vor.u32 %v813_v2, %v3468_v23 }
  0xf2   : > { %1187 = vrot.lane.b32.xlu0 %v3530_v0, %s2472_s13  ;;  %v1506_v30 = vsel %vm1474_vm7, %v1457_v12, %v1124_v38  ;;  %v911_v38 = vor.u32 %v909_v33, %v3465_v9 }
  0xf3   : > { %1211 = vrot.lane.b32.xlu1 %v3523_v17, %s2472_s13  ;;  %v820_v51 = vsel %vm323_vm1, %v815_v49, %v3589_v61 }
  0xf4   : > { %v1180_v57 = vpop.permute.xlu0 %1179  ;;  %v916_v9 = vsel %vm323_vm1, %v911_v38, %v3586_v50 }
  0xf5   : > { %v1204_v59 = vpop.permute.xlu1 %1203  ;;  %v1534_v43 = vsel %vm1523_vm8, %v1482_v37, %v1180_v57  ;;  %v4158_v37 = vrot.slane %v3423_v44, 1 }
  0xf6   : > { %v1570_v35 = vsel %vm1523_vm8, %v1506_v30, %v1204_v59  ;;  %536 = vrot.lane.b32.xlu0 %v3269_v26, %s2469_s30  ;;  %1797 = vmatmul.mubr.bf16.gmra.mxu0 %v1534_v43  ;;  %v3573_v26 = vsel %vm568_vm0, %v4157_v24, %v586_v40  ;;  %v1006_v30 = vrot.slane %v3550_v63, 1  ;;  %v416_v24 = vshrl.u32 %v3486_v11, 16 }
  0xf7   : > { %560 = vrot.lane.b32.xlu1 %v3261_v54, %s2469_s30  ;;  %1893 = vmatmul.mubr.bf16.gmra.mxu1 %v1570_v35  ;;  %v1031_v57 = vsel %vm568_vm0, %v4158_v37, %v1030_v20  ;;  %v512_v35 = vshrl.u32 %v3483_v5, 16 }
  0xf8   : > { %2272 = vmatprep.mubr.msk.bf16.mxu0 %vm1229_vm2, %v3452_v34  ;;  %2284 = vmatprep.mubr.msk.bf16.mxu1 %vm1229_vm2, %v3443_v53  ;;  %v529_v55 = vpop.permute.xlu0 %528  ;;  %v3592_v34 = vld [vmem:[%s2512_s18 + $0xc0] sm:$0xf]  ;;  %v1007_v6 = vsel %vm568_vm0, %v1004_v31, %v1006_v30  ;;  %v418_v49 = vor.u32 %v416_v24, %v3513_v21 }
  0xf9   : > { %v553_v54 = vpop.permute.xlu1 %552  ;;  %v3606_v23 = vcombine.low %v3592_v34, %v3595_v4 }
  0xfa   : > { %634 = vrot.lane.b32.xlu0 %v3573_v26, %s2468_s27  ;;  %v3648_v37 = vsel %vm323_vm1, %v418_v49, %v2605_v41  ;;  %v612_v41 = vrot.slane %v3362_v7, 1  ;;  %v917_v49 = vshrl.u32 %v3544_v29, 16 }
  0xfb   : > { %658 = vrot.lane.b32.xlu1 %v3564_v19, %s2468_s27  ;;  %v1145_v43 = vshll.u32 %v3606_v23, 16 }
  0xfc   : > { %v627_v53 = vpop.permute.xlu0 %626 }
  0xfd   : > { %v651_v62 = vpop.permute.xlu1 %650  ;;  %v3631_v15 = vrot.slane %v1145_v43, 1 }
  0xfe   : > { %710 = vrot.lane.b32.xlu0 %v3429_v18, %s2466_s21  ;;  %v1263_v18 = vsel %vm1229_vm2, %v2674_v16, %v553_v54 }
  0xff   : > { %734 = vrot.lane.b32.xlu1 %v3423_v44, %s2466_s21  ;;  %v3629_v44 = vor.u32 %v512_v35, %v3510_v56  ;;  %v1239_v56 = vsel %vm1229_vm2, %v2685_v28, %v529_v55 }
 0x100   : > { %v703_v59 = vpop.permute.xlu0 %702 }
 0x101   : > { %v727_v12 = vpop.permute.xlu1 %726  ;;  %v1148_v31 = vsel %vm323_vm1, %v3629_v44, %v3631_v15 }
 0x102   : > { %957 = vrot.lane.b32.xlu0 %v820_v51, %s2470_s7  ;;  %v1312_v51 = vsel %vm1278_vm3, %v1263_v18, %v651_v62  ;;  %v3662_v62 = vcombine.low %v3472_v10, %v3592_v34  ;;  %v3679_v10 = vsel %vm568_vm0, %v610_v27, %v612_v41  ;;  %v821_v18 = vshrl.u32 %v3550_v63, 16 }
 0x103   : > { %981 = vrot.lane.b32.xlu1 %v916_v9, %s2470_s7  ;;  %v1361_v16 = vsel %vm1327_vm4, %v1312_v51, %v727_v12 }
 0x104   : > { %v950_v2 = vpop.permute.xlu0 %949  ;;  %v823_v51 = vor.u32 %v821_v18, %v3589_v61 }
 0x105   : > { %v974_v33 = vpop.permute.xlu1 %973 }
 0x106   : > { %1054 = vrot.lane.b32.xlu0 %v1007_v6, %s2467_s26  ;;  %v1410_v43 = vsel %vm1376_vm5, %v1361_v16, %v974_v33  ;;  %v588_v33 = vrot.slane %v3368_v42, 1  ;;  %v828_v61 = vsel %vm323_vm1, %v823_v51, %v3252_v32 }
 0x107   : > { %1078 = vrot.lane.b32.xlu1 %v1031_v57, %s2467_s26  ;;  %v1288_v57 = vsel %vm1278_vm3, %v1239_v56, %v627_v53 }
 0x108   : > { %v1047_v9 = vpop.permute.xlu0 %1046  ;;  %v1337_v35 = vsel %vm1327_vm4, %v1288_v57, %v703_v59  ;;  %v3705_v57 = vld [vmem:[%s2512_s18 + $0xcc] sm:$0xf] }
 0x109   : > { %v1071_v38 = vpop.permute.xlu1 %1070  ;;  %v1386_v28 = vsel %vm1376_vm5, %v1337_v35, %v950_v2 }
 0x10a   : > { %1109 = vrot.lane.b32.xlu0 %v3486_v11, %s2471_s12  ;;  %v1459_v55 = vsel %vm1425_vm6, %v1410_v43, %v1071_v38  ;;  %v1435_v53 = vsel %vm1425_vm6, %v1386_v28, %v1047_v9  ;;  %v1149_v28 = vshrl.u32 %v3606_v23, 16 }
 0x10b   : > { %1133 = vrot.lane.b32.xlu1 %v3483_v5, %s2471_s12 }
 0x10c   : > { %v1102_v54 = vpop.permute.xlu0 %1101 }
 0x10d   : > { %v1126_v21 = vpop.permute.xlu1 %1125  ;;  %v1484_v6 = vsel %vm1474_vm7, %v1435_v53, %v1102_v54 }
 0x10e   : > { %1189 = vrot.lane.b32.xlu0 %v3648_v37, %s2472_s13  ;;  %v1508_v12 = vsel %vm1474_vm7, %v1459_v55, %v1126_v21  ;;  %v195_v21 = vld [vmem:[%s2512_s18 + $0xc8] sm:$0xf] }
 0x10f   : > { %1213 = vrot.lane.b32.xlu1 %v1148_v31, %s2472_s13  ;;  %v919_v31 = vor.u32 %v917_v49, %v3586_v50  ;;  %v1032_v50 = vrot.slane %v3662_v62, 1  ;;  %v3715_v16 = vcombine.low %v195_v21, %v3705_v57 }
 0x110   : > { %v1182_v24 = vpop.permute.xlu0 %1181 }
 0x111   : > { %v1206_v59 = vpop.permute.xlu1 %1205  ;;  %v1537_v38 = vsel %vm1523_vm8, %v1484_v6, %v1182_v24  ;;  %v1033_v43 = vsel %vm568_vm0, %v1030_v20, %v1032_v50  ;;  %v1153_v55 = vshll.u32 %v3715_v16, 16 }
 0x112   : > { %v1573_v2 = vsel %vm1523_vm8, %v1508_v12, %v1206_v59  ;;  %538 = vrot.lane.b32.xlu0 %v3409_v60, %s2469_s30  ;;  %1805 = vmatmul.mubr.bf16.gmra.mxu0 %v1537_v38  ;;  %v3688_v60 = vsel %vm568_vm0, %v586_v40, %v588_v33  ;;  %v4159_v12 = vrot.slane %v3223_v45, 1 }
 0x113   : > { %562 = vrot.lane.b32.xlu1 %v3402_v58, %s2469_s30  ;;  %1901 = vmatmul.mubr.bf16.gmra.mxu1 %v1573_v2  ;;  %v921_v58 = vshll.u32 %v3662_v62, 16  ;;  %v3736_v6 = vrot.slane %v1153_v55, 1 }
 0x114   : > { %2273 = vmatprep.mubr.msk.bf16.mxu0 %vm1229_vm2, %v3573_v26  ;;  %2285 = vmatprep.mubr.msk.bf16.mxu1 %vm1229_vm2, %v3564_v19  ;;  %v531_v27 = vpop.permute.xlu0 %530  ;;  %v1009_v32 = vsel %vm568_vm0, %v1006_v30, %v4159_v12  ;;  %v4160_v30 = vld [vmem:[#allocation10_spill] sm:$0xff] }
 0x115   : > { %v555_v9 = vpop.permute.xlu1 %554  ;;  %v3700_v56 = vrot.slane %v921_v58, 1  ;;  %v1241_v38 = vsel %vm1229_vm2, %v4160_v30, %v531_v27  ;;  %v4161_v27 = vld [vmem:[#allocation7_spill] sm:$0xff]  ;;  %v1157_v30 = vshrl.u32 %v3715_v16, 16 }
 0x116   : > { %636 = vrot.lane.b32.xlu0 %v3688_v60, %s2468_s27  ;;  %v1265_v2 = vsel %vm1229_vm2, %v2816_v48, %v555_v9 }
 0x117   : > { %660 = vrot.lane.b32.xlu1 %v3679_v10, %s2468_s27  ;;  %v924_v19 = vsel %vm323_vm1, %v919_v31, %v3700_v56 }
 0x118   : > { %v629_v26 = vpop.permute.xlu0 %628 }
 0x119   : > { %v653_v40 = vpop.permute.xlu1 %652  ;;  %v1290_v58 = vsel %vm1278_vm3, %v1241_v38, %v629_v26  ;;  %v3762_v26 = vcombine.low %v3595_v4, %v195_v21  ;;  %v925_v21 = vshrl.u32 %v3662_v62, 16 }
 0x11a   : > { %712 = vrot.lane.b32.xlu0 %v3550_v63, %s2466_s21 }
 0x11b   : > { %736 = vrot.lane.b32.xlu1 %v3544_v29, %s2466_s21  ;;  %v1151_v29 = vor.u32 %v1149_v28, %v3631_v15  ;;  %v1314_v15 = vsel %vm1278_vm3, %v1265_v2, %v653_v40  ;;  %v3759_v40 = vrot.slane %v3483_v5, 1 }
 0x11c   : > { %v705_v35 = vpop.permute.xlu0 %704 }
 0x11d   : > { %v729_v54 = vpop.permute.xlu1 %728  ;;  %v1156_v63 = vsel %vm323_vm1, %v1151_v29, %v3736_v6  ;;  %v1339_v51 = vsel %vm1327_vm4, %v1290_v58, %v705_v35  ;;  %v3778_v4 = vsel %vm568_vm0, %v612_v41, %v3759_v40  ;;  %v927_v41 = vor.u32 %v925_v21, %v3700_v56 }
 0x11e   : > { %959 = vrot.lane.b32.xlu0 %v828_v61, %s2470_s7  ;;  %v1363_v18 = vsel %vm1327_vm4, %v1314_v15, %v729_v54  ;;  %v2229_v56 = vcombine.low %v3592_v34, %v3592_v34 }
 0x11f   : > { %983 = vrot.lane.b32.xlu1 %v924_v19, %s2470_s7 }
 0x120   : > { %v952_v59 = vpop.permute.xlu0 %951  ;;  %v516_v58 = vshll.u32 %v2229_v56, 16 }
 0x121   : > { %v976_v53 = vpop.permute.xlu1 %975  ;;  %v1388_v9 = vsel %vm1376_vm5, %v1339_v51, %v952_v59  ;;  %v4162_v51 = vld [vmem:[#allocation3_spill] sm:$0xff] }
 0x122   : > { %1056 = vrot.lane.b32.xlu0 %v1009_v32, %s2467_s26  ;;  %v1412_v48 = vsel %vm1376_vm5, %v1363_v18, %v976_v53  ;;  %v929_v32 = vshll.u32 %v3762_v26, 16 }
 0x123   : > { %1080 = vrot.lane.b32.xlu1 %v1033_v43, %s2467_s26  ;;  %v590_v43 = vrot.slane %v3486_v11, 1 }
 0x124   : > { %v1049_v24 = vpop.permute.xlu0 %1048  ;;  %v3798_v29 = vrot.slane %v929_v32, 1 }
 0x125   : > { %v1073_v20 = vpop.permute.xlu1 %1072  ;;  %v1437_v54 = vsel %vm1425_vm6, %v1388_v9, %v1049_v24  ;;  %v3808_v24 = vld [vmem:[%s2512_s18 + $0xd0] sm:$0xff]  }
 0x126   : > { %1111 = vrot.lane.b32.xlu0 %v2544_v13, %s2471_s12  ;;  %v1461_v19 = vsel %vm1425_vm6, %v1412_v48, %v1073_v20  ;;  %v1161_v38 = vshll.u32 %v3808_v24, 16 }
 0x127   : > { %1135 = vrot.lane.b32.xlu1 %v3606_v23, %s2471_s12 }
 0x128   : > { %v1104_v31 = vpop.permute.xlu0 %1103  ;;  %v3826_v34 = vrot.slane %v1161_v38, 1 }
 0x129   : > { %v1128_v49 = vpop.permute.xlu1 %1127  ;;  %v1486_v28 = vsel %vm1474_vm7, %v1437_v54, %v1104_v31 }
 0x12a   : > { %1191 = vrot.lane.b32.xlu0 %v4161_v27, %s2472_s13  ;;  %v1510_v61 = vsel %vm1474_vm7, %v1461_v19, %v1128_v49 }
 0x12b   : > { %1215 = vrot.lane.b32.xlu1 %v1156_v63, %s2472_s13 }
 0x12c   : > { %v1184_v55 = vpop.permute.xlu0 %1183 }
 0x12d   : > { %v1208_v35 = vpop.permute.xlu1 %1207  ;;  %v1540_v12 = vsel %vm1523_vm8, %v1486_v28, %v1184_v55  ;;  %v4163_v55 = vld [vmem:[#allocation8_spill] sm:$0xff] }
 0x12e   : > { %v1576_v53 = vsel %vm1523_vm8, %v1510_v61, %v1208_v35  ;;  %540 = vrot.lane.b32.xlu0 %v3530_v0, %s2469_s30  ;;  %1813 = vmatmul.mubr.bf16.gmra.mxu0 %v1540_v12  ;;  %v2254_v12 = vcombine.low %v3705_v57, %v3705_v57 }
 0x12f   : > { %564 = vrot.lane.b32.xlu1 %v3523_v17, %s2469_s30  ;;  %1909 = vmatmul.mubr.bf16.gmra.mxu1 %v1576_v53  ;;  %v3787_v17 = vsel %vm568_vm0, %v588_v33, %v590_v43  ;;  %v616_v53 = vrot.slane %v2229_v56, 1 }
 0x130   : > { %2274 = vmatprep.mubr.msk.bf16.mxu0 %vm1229_vm2, %v3688_v60  ;;  %2286 = vmatprep.mubr.msk.bf16.mxu1 %vm1229_vm2, %v3679_v10  ;;  %v533_v0 = vpop.permute.xlu0 %532  ;;  %v932_v10 = vsel %vm323_vm1, %v927_v41, %v3798_v29  ;;  %v1034_v60 = vrot.slane %v3762_v26, 1 }
 0x131   : > { %v557_v59 = vpop.permute.xlu1 %556  ;;  %v617_v57 = vsel %vm568_vm0, %v3759_v40, %v616_v53  ;;  %v1221_v53 = vrot.slane %v3606_v23, 1 }
 0x132   : > { %638 = vrot.lane.b32.xlu0 %v3787_v17, %s2468_s27  ;;  %v1267_v31 = vsel %vm1229_vm2, %v2924_v39, %v557_v59 }
 0x133   : > { %662 = vrot.lane.b32.xlu1 %v3778_v4, %s2468_s27 }
 0x134   : > { %v631_v33 = vpop.permute.xlu0 %630 }
 0x135   : > { %v655_v20 = vpop.permute.xlu1 %654 }
 0x136   : > { %714 = vrot.lane.b32.xlu0 %v3223_v45, %s2466_s21  ;;  %v1035_v45 = vsel %vm568_vm0, %v1032_v50, %v1034_v60  ;;  %v518_v50 = vrot.slane %v516_v58, 1 }
 0x137   : > { %738 = vrot.lane.b32.xlu1 %v3662_v62, %s2466_s21 }
 0x138   : > { %v707_v63 = vpop.permute.xlu0 %706  ;;  %v519_v35 = vsel %vm323_vm1, %v3629_v44, %v518_v50 }
 0x139   : > { %v731_v2 = vpop.permute.xlu1 %730 }
 0x13a   : > { %961 = vrot.lane.b32.xlu0 %v3294_v14, %s2470_s7  ;;  %v1159_v14 = vor.u32 %v1157_v30, %v3736_v6  ;;  %v1316_v6 = vsel %vm1278_vm3, %v1267_v31, %v655_v20 }
 0x13b   : > { %985 = vrot.lane.b32.xlu1 %v932_v10, %s2470_s7  ;;  %v1365_v27 = vsel %vm1327_vm4, %v1316_v6, %v731_v2  ;;  %v937_v10 = vshll.u32 %v2254_v12, 16  ;;  %v4168_v6 = vld [vmem:[#allocation2_spill] sm:$0xff] }
 0x13c   : > { %v954_v49 = vpop.permute.xlu0 %953  ;;  %v1164_v48 = vsel %vm323_vm1, %v1159_v14, %v3826_v34  ;;  %v3886_v14 = vld [vmem:[%s2512_s18 + $0xd8] ss:$0 sps:$4 sm:$0xff]  }
 0x13d   : > { %v978_v15 = vpop.permute.xlu1 %977  ;;  %v939_v38 = vrot.slane %v937_v10, 1 }
 0x13e   : > { %1058 = vrot.lane.b32.xlu0 %v3310_v52, %s2467_s26  ;;  %v1243_v52 = vsel %vm1229_vm2, %v2929_v8, %v533_v0  ;;  %v1414_v39 = vsel %vm1376_vm5, %v1365_v27, %v978_v15  ;;  %v4166_v15 = vld [vmem:[#allocation13_spill] sm:$0xff] }
 0x13f   : > { %1082 = vrot.lane.b32.xlu1 %v1035_v45, %s2467_s26  ;;  %v1292_v19 = vsel %vm1278_vm3, %v1243_v52, %v631_v33  ;;  %v933_v33 = vshrl.u32 %v3762_v26, 16  ;;  %v4165_v45 = vld [vmem:[#allocation4_spill] sm:$0xff] }
 0x140   : > { %v1051_v62 = vpop.permute.xlu0 %1050  ;;  %v1341_v61 = vsel %vm1327_vm4, %v1292_v19, %v707_v63  ;;  %v4164_v63 = vrot.slane %v2544_v13, 1  ;;  %v837_v30 = vshrl.u32 %v4165_v45, 16  ;;  %v4170_v19 = vrot.slane %v4165_v45, 1 }
 0x141   : > { %v1075_v18 = vpop.permute.xlu1 %1074  ;;  %v1390_v28 = vsel %vm1376_vm5, %v1341_v61, %v954_v49  ;;  %v935_v13 = vor.u32 %v933_v33, %v3798_v29 }
 0x142   : > { %1113 = vrot.lane.b32.xlu0 %v4162_v51, %s2471_s12  ;;  %v1463_v8 = vsel %vm1425_vm6, %v1414_v39, %v1075_v18  ;;  %v1439_v21 = vsel %vm1425_vm6, %v1390_v28, %v1051_v62  ;;  %v3868_v56 = vsel %vm568_vm0, %v590_v43, %v4164_v63  ;;  %v839_v49 = vor.u32 %v837_v30, %v4166_v15  ;;  %v4167_v62 = vld [vmem:[#allocation6_spill] sm:$0xff] }
 0x143   : > { %1137 = vrot.lane.b32.xlu1 %v3715_v16, %s2471_s12  ;;  %v1165_v51 = vshrl.u32 %v3808_v24, 16 }
 0x144   : > { %v1106_v54 = vpop.permute.xlu0 %1105  ;;  %v844_v29 = vsel %vm323_vm1, %v839_v49, %v4167_v62 }
 0x145   : > { %v1130_v9 = vpop.permute.xlu1 %1129  ;;  %v1488_v0 = vsel %vm1474_vm7, %v1439_v21, %v1106_v54 }
 0x146   : > { %1193 = vrot.lane.b32.xlu0 %v4163_v55, %s2472_s13  ;;  %v1512_v32 = vsel %vm1474_vm7, %v1463_v8, %v1130_v9  ;;  %v4169_v9 = vrot.slane %v4168_v6, 1 }
 0x147   : > { %1217 = vrot.lane.b32.xlu1 %v1164_v48, %s2472_s13  ;;  %v1169_v48 = vshll.u32 %v3886_v14, 16 }
 0x148   : > { %v1186_v41 = vpop.permute.xlu0 %1185  ;;  %v1013_v27 = vsel %vm568_vm0, %v4170_v19, %v4169_v9 }
 0x149   : > { %v1210_v59 = vpop.permute.xlu1 %1209  ;;  %v1543_v20 = vsel %vm1523_vm8, %v1488_v0, %v1186_v41 }
 0x14a   : > { %v1579_v44 = vsel %vm1523_vm8, %v1512_v32, %v1210_v59  ;;  %542 = vrot.lane.b32.xlu0 %v3648_v37, %s2469_s30  ;;  %1821 = vmatmul.mubr.bf16.gmra.mxu0 %v1543_v20  ;;  %v4171_v20 = vld [vmem:[#allocation11_spill] sm:$0xff] }
 0x14b   : > { %566 = vrot.lane.b32.xlu1 %v519_v35, %s2469_s30  ;;  %1917 = vmatmul.mubr.bf16.gmra.mxu1 %v1579_v44 }
 0x14c   : > { %2275 = vmatprep.mubr.msk.bf16.mxu0 %vm1229_vm2, %v3787_v17  ;;  %2287 = vmatprep.mubr.msk.bf16.mxu1 %vm1229_vm2, %v3778_v4  ;;  %v535_v37 = vpop.permute.xlu0 %534  ;;  %v940_v4 = vsel %vm323_vm1, %v935_v13, %v939_v38  ;;  %v1036_v17 = vrot.slane %v2254_v12, 1 }
 0x14d   : > { %v559_v2 = vpop.permute.xlu1 %558  ;;  %v1245_v8 = vsel %vm1229_vm2, %v2997_v1, %v535_v37 }
 0x14e   : > { %640 = vrot.lane.b32.xlu0 %v3868_v56, %s2468_s27  ;;  %v1037_v31 = vsel %vm568_vm0, %v1034_v60, %v1036_v17  ;;  %v1171_v60 = vrot.slane %v1169_v48, 1  ;;  %v1269_v35 = vsel %vm1229_vm2, %v2992_v46, %v559_v2 }
 0x14f   : > { %664 = vrot.lane.b32.xlu1 %v617_v57, %s2468_s27 }
 0x150   : > { %v633_v58 = vpop.permute.xlu0 %632 }
 0x151   : > { %v657_v43 = vpop.permute.xlu1 %656  ;;  %v1294_v12 = vsel %vm1278_vm3, %v1245_v8, %v633_v58 }
 0x152   : > { %716 = vrot.lane.b32.xlu0 %v4165_v45, %s2466_s21  ;;  %v1222_v45 = vsel %vm568_vm0, %v3759_v40, %v1221_v53 }
 0x153   : > { %740 = vrot.lane.b32.xlu1 %v3762_v26, %s2466_s21  ;;  %v1167_v26 = vor.u32 %v1165_v51, %v3826_v34  ;;  %v1318_v34 = vsel %vm1278_vm3, %v1269_v35, %v657_v43 }
 0x154   : > { %v709_v50 = vpop.permute.xlu0 %708 }
 0x155   : > { %v733_v18 = vpop.permute.xlu1 %732  ;;  %v1172_v28 = vsel %vm323_vm1, %v1167_v26, %v1171_v60  ;;  %v1343_v46 = vsel %vm1327_vm4, %v1294_v12, %v709_v50  ;;  %v1223_v26 = vrot.slane %v3715_v16, 1 }
 0x156   : > { %963 = vrot.lane.b32.xlu0 %v844_v29, %s2470_s7  ;;  %v1367_v21 = vsel %vm1327_vm4, %v1318_v34, %v733_v18 }
 0x157   : > { %987 = vrot.lane.b32.xlu1 %v940_v4, %s2470_s7 }
 0x158   : > { %v956_v54 = vpop.permute.xlu0 %955 }
 0x159   : > { %v980_v52 = vpop.permute.xlu1 %979  ;;  %v1392_v59 = vsel %vm1376_vm5, %v1343_v46, %v956_v54  ;;  %v1224_v46 = vsel %vm568_vm0, %v1221_v53, %v1223_v26 }
 0x15a   : > { %1060 = vrot.lane.b32.xlu0 %v1013_v27, %s2467_s26 }
 0x15b   : > { %1084 = vrot.lane.b32.xlu1 %v1037_v31, %s2467_s26 }
 0x15c   : > { %v1053_v39 = vpop.permute.xlu0 %1052 }
 0x15d   : > { %v1077_v61 = vpop.permute.xlu1 %1076  ;;  %v1441_v57 = vsel %vm1425_vm6, %v1392_v59, %v1053_v39 }
 0x15e   : > { %1115 = vrot.lane.b32.xlu0 %v2694_v36, %s2471_s12  ;;  %v1416_v36 = vsel %vm1376_vm5, %v1367_v21, %v980_v52 }
 0x15f   : > { %1139 = vrot.lane.b32.xlu1 %v3808_v24, %s2471_s12  ;;  %v1465_v0 = vsel %vm1425_vm6, %v1416_v36, %v1077_v61 }
 0x160   : > { %v1108_v32 = vpop.permute.xlu0 %1107 }
 0x161   : > { %v1132_v55 = vpop.permute.xlu1 %1131  ;;  %v1490_v30 = vsel %vm1474_vm7, %v1441_v57, %v1108_v32 }
 0x162   : > { %v1774_v41 = vpop.f32.mrf.mxu0  ;;  %1195 = vrot.lane.b32.xlu0 %v4171_v20, %s2472_s13  ;;  %v1514_v33 = vsel %vm1474_vm7, %v1465_v0, %v1132_v55 }
 0x163   : > { %1219 = vrot.lane.b32.xlu1 %v1172_v28, %s2472_s13  ;;  %v1870_v1 = vpop.f32.mrf.mxu1  ;;  %v2327_v10 = vpack.c.bf16 %v1774_v41, %v1774_v41 }
 0x164   : > { %v2343_v44 = vpack.c.bf16 %v1870_v1, %v1870_v1  ;;  %v1776_v37 = vpop.f32.mrf.mxu0  ;;  %v1188_v13 = vpop.permute.xlu0 %1187 }
 0x165   : > { %v1212_v2 = vpop.permute.xlu1 %1211  ;;  %v1872_v63 = vpop.f32.mrf.mxu1  ;;  %1997 = vst.msk [vmem:[%s3925_s16] sm:$0xf] %vm1996_vm9, %v2327_v10  ;;  %v1546_v43 = vsel %vm1523_vm8, %v1490_v30, %v1188_v13  ;;  %v4172_v10 = vld [vmem:[#allocation5_spill] sm:$0xff] }
 0x166   : > { %2073 = vst.msk [vmem:[%s3925_s16 + $0x40] sm:$0xf] %vm1996_vm9, %v2343_v44  ;;  %v1582_v38 = vsel %vm1523_vm8, %v1514_v33, %v1212_v2  ;;  %v1777_v49 = vpop.f32.mrf.mxu0  ;;  %1829 = vmatmul.mubr.bf16.gmra.mxu0 %v1546_v43 }
 0x167   : > { %v1873_v15 = vpop.f32.mrf.mxu1  ;;  %1925 = vmatmul.mubr.bf16.gmra.mxu1 %v1582_v38  ;;  %v2328_v40 = vpack.c.bf16 %v1777_v49, %v1777_v49  ;;  %2276 = vmatprep.mubr.msk.bf16.mxu0 %vm1229_vm2, %v3868_v56 }
 0x168   : > { %v2344_v58 = vpack.c.bf16 %v1873_v15, %v1873_v15  ;;  %2288 = vmatprep.mubr.msk.bf16.mxu1 %vm1229_vm2, %v1222_v45  ;;  %v1779_v18 = vpop.f32.mrf.mxu0  ;;  %v537_v62 = vpop.permute.xlu0 %536 }
 0x169   : > { %v561_v4 = vpop.permute.xlu1 %560  ;;  %v1875_v17 = vpop.f32.mrf.mxu1  ;;  %1998 = vst.msk [vmem:[%s3925_s16 + $0x4] sm:$0xf] %vm1996_vm9, %v2328_v40  ;;  %v1247_v56 = vsel %vm1229_vm2, %v3092_v25, %v537_v62  ;;  %v1225_v18 = vrot.slane %v3808_v24, 1 }
 0x16a   : > { %2074 = vst.msk [vmem:[%s3925_s16 + $0x44] sm:$0xf] %vm1996_vm9, %v2344_v58  ;;  %v1271_v19 = vsel %vm1229_vm2, %v3086_v22, %v561_v4 }
 0x16c   : > { %v635_v50 = vpop.permute.xlu0 %634 }
 0x16d   : > { %v659_v29 = vpop.permute.xlu1 %658  ;;  %v1296_v60 = vsel %vm1278_vm3, %v1247_v56, %v635_v50 }
 0x16e   : > { %v1320_v27 = vsel %vm1278_vm3, %v1271_v19, %v659_v29 }
 0x170   : > { %v711_v51 = vpop.permute.xlu0 %710 }
 0x171   : > { %v735_v31 = vpop.permute.xlu1 %734  ;;  %v1345_v35 = vsel %vm1327_vm4, %v1296_v60, %v711_v51  ;;  %v1226_v60 = vsel %vm568_vm0, %v1223_v26, %v1225_v18 }
 0x172   : > { %v1369_v61 = vsel %vm1327_vm4, %v1320_v27, %v735_v31 }
 0x174   : > { %v958_v52 = vpop.permute.xlu0 %957 }
 0x175   : > { %v982_v48 = vpop.permute.xlu1 %981  ;;  %v1394_v22 = vsel %vm1376_vm5, %v1345_v35, %v958_v52 }
 0x176   : > { %v1418_v28 = vsel %vm1376_vm5, %v1369_v61, %v982_v48 }
 0x178   : > { %v1055_v9 = vpop.permute.xlu0 %1054 }
 0x179   : > { %v1079_v6 = vpop.permute.xlu1 %1078  ;;  %v1443_v55 = vsel %vm1425_vm6, %v1394_v22, %v1055_v9 }
 0x17a   : > { %v1467_v34 = vsel %vm1425_vm6, %v1418_v28, %v1079_v6 }
 0x17c   : > { %v1110_v39 = vpop.permute.xlu0 %1109 }
 0x17d   : > { %v1134_v54 = vpop.permute.xlu1 %1133  ;;  %v1492_v36 = vsel %vm1474_vm7, %v1443_v55, %v1110_v39 }
 0x17e   : > { %v1782_v25 = vpop.f32.mrf.mxu0  ;;  %v1516_v12 = vsel %vm1474_vm7, %v1467_v34, %v1134_v54 }
 0x17f   : > { %v1878_v8 = vpop.f32.mrf.mxu1  ;;  %v4173_v25 = vld [vmem:[#allocation9_spill] sm:$0xff] }
 0x180   : > { %v1784_v1 = vpop.f32.mrf.mxu0  ;;  %v1190_v59 = vpop.permute.xlu0 %1189 }
 0x181   : > { %v1214_v21 = vpop.permute.xlu1 %1213  ;;  %v1880_v32 = vpop.f32.mrf.mxu1  ;;  %v1549_v41 = vsel %vm1523_vm8, %v1492_v36, %v1190_v59 }
 0x182   : > { %v1585_v0 = vsel %vm1523_vm8, %v1516_v12, %v1214_v21  ;;  %v1785_v20 = vpop.f32.mrf.mxu0  ;;  %1837 = vmatmul.mubr.bf16.gmra.mxu0 %v1549_v41 }
 0x183   : > { %v1881_v44 = vpop.f32.mrf.mxu1  ;;  %1933 = vmatmul.mubr.bf16.gmra.mxu1 %v1585_v0  ;;  %v2329_v23 = vpack.c.bf16 %v1785_v20, %v1785_v20  ;;  %2277 = vmatprep.mubr.msk.bf16.mxu0 %vm1229_vm2, %v4172_v10 }
 0x184   : > { %v2345_v57 = vpack.c.bf16 %v1881_v44, %v1881_v44  ;;  %2289 = vmatprep.mubr.msk.bf16.mxu1 %vm1229_vm2, %v1224_v46  ;;  %v1787_v2 = vpop.f32.mrf.mxu0  ;;  %v539_v63 = vpop.permute.xlu0 %538 }
 0x185   : > { %v563_v33 = vpop.permute.xlu1 %562  ;;  %v1883_v53 = vpop.f32.mrf.mxu1  ;;  %2007 = vst.msk [vmem:[%s3925_s16 + $0x8] sm:$0xf] %vm1996_vm9, %v2329_v23  ;;  %v1249_v40 = vsel %vm1229_vm2, %v3216_v3, %v539_v63 }
 0x186   : > { %2083 = vst.msk [vmem:[%s3925_s16 + $0x48] sm:$0xf] %vm1996_vm9, %v2345_v57  ;;  %v1273_v58 = vsel %vm1229_vm2, %v3210_v47, %v563_v33  ;;  %v1227_v33 = vrot.slane %v3886_v14, 1 }
 0x188   : > { %v637_v30 = vpop.permute.xlu0 %636 }
 0x189   : > { %v661_v45 = vpop.permute.xlu1 %660  ;;  %v1298_v62 = vsel %vm1278_vm3, %v1249_v40, %v637_v30 }
 0x18a   : > { %v1322_v4 = vsel %vm1278_vm3, %v1273_v58, %v661_v45  ;;  %v1228_v58 = vsel %vm568_vm0, %v1225_v18, %v1227_v33 }
 0x18c   : > { %v713_v13 = vpop.permute.xlu0 %712 }
 0x18d   : > { %v737_v37 = vpop.permute.xlu1 %736  ;;  %v1347_v31 = vsel %vm1327_vm4, %v1298_v62, %v713_v13 }
 0x18e   : > { %v1371_v29 = vsel %vm1327_vm4, %v1322_v4, %v737_v37 }
 0x190   : > { %v960_v43 = vpop.permute.xlu0 %959 }
 0x191   : > { %v984_v38 = vpop.permute.xlu1 %983  ;;  %v1396_v47 = vsel %vm1376_vm5, %v1347_v31, %v960_v43 }
 0x192   : > { %v1420_v51 = vsel %vm1376_vm5, %v1371_v29, %v984_v38 }
 0x194   : > { %v1057_v49 = vpop.permute.xlu0 %1056 }
 0x195   : > { %v1081_v15 = vpop.permute.xlu1 %1080  ;;  %v1445_v9 = vsel %vm1425_vm6, %v1396_v47, %v1057_v49  ;;  %v4174_v47 = vld [vmem:[#allocation12_spill] sm:$0xff] }
 0x196   : > { %v1469_v3 = vsel %vm1425_vm6, %v1420_v51, %v1081_v15 }
 0x198   : > { %v1112_v50 = vpop.permute.xlu0 %1111 }
 0x199   : > { %v1136_v17 = vpop.permute.xlu1 %1135  ;;  %v1494_v61 = vsel %vm1474_vm7, %v1445_v9, %v1112_v50 }
 0x19a   : > { %v1790_v52 = vpop.f32.mrf.mxu0  ;;  %v1518_v19 = vsel %vm1474_vm7, %v1469_v3, %v1136_v17 }
 0x19b   : > { %v1886_v48 = vpop.f32.mrf.mxu1  ;;  %v2330_v56 = vpack.c.bf16 %v1790_v52, %v1790_v52 }
 0x19c   : > { %v2346_v6 = vpack.c.bf16 %v1886_v48, %v1886_v48  ;;  %v1792_v39 = vpop.f32.mrf.mxu0  ;;  %v1192_v35 = vpop.permute.xlu0 %1191 }
 0x19d   : > { %v1216_v27 = vpop.permute.xlu1 %1215  ;;  %v1888_v54 = vpop.f32.mrf.mxu1  ;;  %2008 = vst.msk [vmem:[%s3925_s16 + $0xc] sm:$0xf] %vm1996_vm9, %v2330_v56  ;;  %v1552_v8 = vsel %vm1523_vm8, %v1494_v61, %v1192_v35 }
 0x19e   : > { %2084 = vst.msk [vmem:[%s3925_s16 + $0x4c] sm:$0xf] %vm1996_vm9, %v2346_v6  ;;  %v1588_v28 = vsel %vm1523_vm8, %v1518_v19, %v1216_v27  ;;  %v1793_v34 = vpop.f32.mrf.mxu0  ;;  %1845 = vmatmul.mubr.bf16.gmra.mxu0 %v1552_v8 }
 0x19f   : > { %v1889_v22 = vpop.f32.mrf.mxu1  ;;  %1941 = vmatmul.mubr.bf16.gmra.mxu1 %v1588_v28  ;;  %2278 = vmatprep.mubr.msk.bf16.mxu0 %vm1229_vm2, %v4173_v25 }
 0x1a0   : > { %2290 = vmatprep.mubr.msk.bf16.mxu1 %vm1229_vm2, %v1226_v60  ;;  %v1795_v55 = vpop.f32.mrf.mxu0  ;;  %v541_v12 = vpop.permute.xlu0 %540 }
 0x1a1   : > { %v565_v16 = vpop.permute.xlu1 %564  ;;  %v1891_v26 = vpop.f32.mrf.mxu1  ;;  %v1251_v20 = vsel %vm1229_vm2, %v3368_v42, %v541_v12 }
 0x1a2   : > { %v1275_v44 = vsel %vm1229_vm2, %v3362_v7, %v565_v16 }
 0x1a4   : > { %v639_v32 = vpop.permute.xlu0 %638 }
 0x1a5   : > { %v663_v21 = vpop.permute.xlu1 %662  ;;  %v1300_v53 = vsel %vm1278_vm3, %v1251_v20, %v639_v32 }
 0x1a6   : > { %v1324_v57 = vsel %vm1278_vm3, %v1275_v44, %v663_v21 }
 0x1a8   : > { %v715_v36 = vpop.permute.xlu0 %714 }
 0x1a9   : > { %v739_v46 = vpop.permute.xlu1 %738  ;;  %v1349_v63 = vsel %vm1327_vm4, %v1300_v53, %v715_v36 }
 0x1aa   : > { %v1373_v10 = vsel %vm1327_vm4, %v1324_v57, %v739_v46 }
 0x1ac   : > { %v962_v59 = vpop.permute.xlu0 %961 }
 0x1ad   : > { %v986_v1 = vpop.permute.xlu1 %985  ;;  %v1398_v7 = vsel %vm1376_vm5, %v1349_v63, %v962_v59 }
 0x1ae   : > { %v1422_v45 = vsel %vm1376_vm5, %v1373_v10, %v986_v1 }
 0x1b0   : > { %v1059_v41 = vpop.permute.xlu0 %1058 }
 0x1b1   : > { %v1083_v0 = vpop.permute.xlu1 %1082  ;;  %v1447_v14 = vsel %vm1425_vm6, %v1398_v7, %v1059_v41 }
 0x1b2   : > { %v1471_v42 = vsel %vm1425_vm6, %v1422_v45, %v1083_v0 }
 0x1b4   : > { %v1114_v2 = vpop.permute.xlu0 %1113 }
 0x1b5   : > { %v1138_v23 = vpop.permute.xlu1 %1137  ;;  %v1496_v40 = vsel %vm1474_vm7, %v1447_v14, %v1114_v2 }
 0x1b6   : > { %v1798_v37 = vpop.f32.mrf.mxu0  ;;  %v1520_v38 = vsel %vm1474_vm7, %v1471_v42, %v1138_v23 }
 0x1b7   : > { %v1894_v30 = vpop.f32.mrf.mxu1  ;;  %v2331_v43 = vpack.c.bf16 %v1798_v37, %v1798_v37 }
 0x1b8   : > { %v2347_v13 = vpack.c.bf16 %v1894_v30, %v1894_v30  ;;  %v1800_v4 = vpop.f32.mrf.mxu0  ;;  %v1194_v17 = vpop.permute.xlu0 %1193 }
 0x1b9   : > { %v1218_v15 = vpop.permute.xlu1 %1217  ;;  %v1896_v49 = vpop.f32.mrf.mxu1  ;;  %2016 = vst.msk [vmem:[%s3925_s16 + $0x10] sm:$0xf] %vm1996_vm9, %v2331_v43  ;;  %v1555_v29 = vsel %vm1523_vm8, %v1496_v40, %v1194_v17 }
 0x1ba   : > { %2092 = vst.msk [vmem:[%s3925_s16 + $0x50] sm:$0xf] %vm1996_vm9, %v2347_v13  ;;  %v1591_v62 = vsel %vm1523_vm8, %v1520_v38, %v1218_v15  ;;  %v1801_v31 = vpop.f32.mrf.mxu0  ;;  %1853 = vmatmul.mubr.bf16.gmra.mxu0 %v1555_v29 }
 0x1bb   : > { %v1897_v50 = vpop.f32.mrf.mxu1  ;;  %1949 = vmatmul.mubr.bf16.gmra.mxu1 %v1591_v62  ;;  %v2332_v18 = vpack.c.bf16 %v1801_v31, %v1801_v31  ;;  %2279 = vmatprep.mubr.msk.bf16.mxu0 %vm1229_vm2, %v4174_v47 }
 0x1bc   : > { %v2348_v24 = vpack.c.bf16 %v1897_v50, %v1897_v50  ;;  %2291 = vmatprep.mubr.msk.bf16.mxu1 %vm1229_vm2, %v1228_v58  ;;  %v1803_v3 = vpop.f32.mrf.mxu0  ;;  %v543_v52 = vpop.permute.xlu0 %542 }
 0x1bd   : > { %v567_v51 = vpop.permute.xlu1 %566  ;;  %v1899_v48 = vpop.f32.mrf.mxu1  ;;  %2017 = vst.msk [vmem:[%s3925_s16 + $0x14] sm:$0xf] %vm1996_vm9, %v2332_v18  ;;  %v1253_v35 = vsel %vm1229_vm2, %v3486_v11, %v543_v52 }
 0x1be   : > { %2093 = vst.msk [vmem:[%s3925_s16 + $0x54] sm:$0xf] %vm1996_vm9, %v2348_v24  ;;  %v1277_v39 = vsel %vm1229_vm2, %v3483_v5, %v567_v51 }
 0x1c0   : > { %v641_v9 = vpop.permute.xlu0 %640 }
 0x1c1   : > { %v665_v6 = vpop.permute.xlu1 %664  ;;  %v1302_v22 = vsel %vm1278_vm3, %v1253_v35, %v641_v9 }
 0x1c2   : > { %v1326_v28 = vsel %vm1278_vm3, %v1277_v39, %v665_v6 }
 0x1c4   : > { %v717_v56 = vpop.permute.xlu0 %716 }
 0x1c5   : > { %v741_v19 = vpop.permute.xlu1 %740  ;;  %v1351_v26 = vsel %vm1327_vm4, %v1302_v22, %v717_v56 }
 0x1c6   : > { %v1375_v34 = vsel %vm1327_vm4, %v1326_v28, %v741_v19 }
 0x1c8   : > { %v964_v54 = vpop.permute.xlu0 %963 }
 0x1c9   : > { %v988_v27 = vpop.permute.xlu1 %987  ;;  %v1400_v12 = vsel %vm1376_vm5, %v1351_v26, %v964_v54 }
 0x1ca   : > { %v1424_v25 = vsel %vm1376_vm5, %v1375_v34, %v988_v27 }
 0x1cc   : > { %v1061_v61 = vpop.permute.xlu0 %1060 }
 0x1cd   : > { %v1085_v60 = vpop.permute.xlu1 %1084  ;;  %v1449_v11 = vsel %vm1425_vm6, %v1400_v12, %v1061_v61 }
 0x1ce   : > { %v1473_v5 = vsel %vm1425_vm6, %v1424_v25, %v1085_v60 }
 0x1d0   : > { %v1116_v16 = vpop.permute.xlu0 %1115 }
 0x1d1   : > { %v1140_v8 = vpop.permute.xlu1 %1139  ;;  %v1498_v1 = vsel %vm1474_vm7, %v1449_v11, %v1116_v16 }
 0x1d2   : > { %v1806_v21 = vpop.f32.mrf.mxu0  ;;  %v1522_v32 = vsel %vm1474_vm7, %v1473_v5, %v1140_v8 }
 0x1d3   : > { %v1902_v55 = vpop.f32.mrf.mxu1 }
 0x1d4   : > { %v1808_v59 = vpop.f32.mrf.mxu0  ;;  %v1196_v0 = vpop.permute.xlu0 %1195 }
 0x1d5   : > { %v1220_v46 = vpop.permute.xlu1 %1219  ;;  %v1904_v36 = vpop.f32.mrf.mxu1  ;;  %v1558_v44 = vsel %vm1523_vm8, %v1498_v1, %v1196_v0 }
 0x1d6   : > { %v1594_v41 = vsel %vm1523_vm8, %v1522_v32, %v1220_v46  ;;  %v1809_v57 = vpop.f32.mrf.mxu0  ;;  %1861 = vmatmul.mubr.bf16.gmra.mxu0 %v1558_v44 }
 0x1d7   : > { %v1905_v20 = vpop.f32.mrf.mxu1  ;;  %1957 = vmatmul.mubr.bf16.gmra.mxu1 %v1594_v41  ;;  %v2333_v33 = vpack.c.bf16 %v1809_v57, %v1809_v57 }
 0x1d8   : > { %v2349_v23 = vpack.c.bf16 %v1905_v20, %v1905_v20  ;;  %v1811_v10 = vpop.f32.mrf.mxu0 }
 0x1d9   : > { %v1907_v53 = vpop.f32.mrf.mxu1  ;;  %2026 = vst.msk [vmem:[%s3925_s16 + $0x18] sm:$0xf] %vm1996_vm9, %v2333_v33 }
 0x1da   : > { %2102 = vst.msk [vmem:[%s3925_s16 + $0x58] sm:$0xf] %vm1996_vm9, %v2349_v23 }
 0x1ee   : > { %v1814_v63 = vpop.f32.mrf.mxu0 }
 0x1ef   : > { %v1910_v2 = vpop.f32.mrf.mxu1  ;;  %v2334_v30 = vpack.c.bf16 %v1814_v63, %v1814_v63 }
 0x1f0   : > { %v2350_v45 = vpack.c.bf16 %v1910_v2, %v1910_v2  ;;  %v1816_v42 = vpop.f32.mrf.mxu0 }
 0x1f1   : > { %v1912_v7 = vpop.f32.mrf.mxu1  ;;  %2027 = vst.msk [vmem:[%s3925_s16 + $0x1c] sm:$0xf] %vm1996_vm9, %v2334_v30 }
 0x1f2   : > { %2103 = vst.msk [vmem:[%s3925_s16 + $0x5c] sm:$0xf] %vm1996_vm9, %v2350_v45  ;;  %v1817_v13 = vpop.f32.mrf.mxu0 }
 0x1f3   : > { %v1913_v37 = vpop.f32.mrf.mxu1 }
 0x1f4   : > { %v1819_v38 = vpop.f32.mrf.mxu0 }
 0x1f5   : > { %v1915_v14 = vpop.f32.mrf.mxu1 }
 0x20a   : > { %v1822_v15 = vpop.f32.mrf.mxu0 }
 0x20b   : > { %v1918_v43 = vpop.f32.mrf.mxu1  ;;  %v2335_v58 = vpack.c.bf16 %v1822_v15, %v1822_v15 }
 0x20c   : > { %v2351_v49 = vpack.c.bf16 %v1918_v43, %v1918_v43  ;;  %v1824_v4 = vpop.f32.mrf.mxu0 }
 0x20d   : > { %v1920_v40 = vpop.f32.mrf.mxu1  ;;  %2035 = vst.msk [vmem:[%s3925_s16 + $0x20] sm:$0xf] %vm1996_vm9, %v2335_v58 }
 0x20e   : > { %2111 = vst.msk [vmem:[%s3925_s16 + $0x60] sm:$0xf] %vm1996_vm9, %v2351_v49  ;;  %v1825_v62 = vpop.f32.mrf.mxu0 }
 0x20f   : > { %v1921_v17 = vpop.f32.mrf.mxu1  ;;  %v2336_v50 = vpack.c.bf16 %v1825_v62, %v1825_v62 }
 0x210   : > { %v2352_v29 = vpack.c.bf16 %v1921_v17, %v1921_v17  ;;  %v1827_v24 = vpop.f32.mrf.mxu0 }
 0x211   : > { %v1923_v31 = vpop.f32.mrf.mxu1  ;;  %2036 = vst.msk [vmem:[%s3925_s16 + $0x24] sm:$0xf] %vm1996_vm9, %v2336_v50 }
 0x212   : > { %2112 = vst.msk [vmem:[%s3925_s16 + $0x64] sm:$0xf] %vm1996_vm9, %v2352_v29 }
 0x226   : > { %v1830_v51 = vpop.f32.mrf.mxu0 }
 0x227   : > { %v1926_v18 = vpop.f32.mrf.mxu1 }
 0x228   : > { %v1832_v47 = vpop.f32.mrf.mxu0 }
 0x229   : > { %v1928_v48 = vpop.f32.mrf.mxu1 }
 0x22a   : > { %v1833_v52 = vpop.f32.mrf.mxu0 }
 0x22b   : > { %v1929_v3 = vpop.f32.mrf.mxu1  ;;  %v2337_v9 = vpack.c.bf16 %v1833_v52, %v1833_v52 }
 0x22c   : > { %v2353_v6 = vpack.c.bf16 %v1929_v3, %v1929_v3  ;;  %v1835_v56 = vpop.f32.mrf.mxu0 }
 0x22d   : > { %v1931_v19 = vpop.f32.mrf.mxu1  ;;  %2045 = vst.msk [vmem:[%s3925_s16 + $0x28] sm:$0xf] %vm1996_vm9, %v2337_v9 }
 0x22e   : > { %2121 = vst.msk [vmem:[%s3925_s16 + $0x68] sm:$0xf] %vm1996_vm9, %v2353_v6 }
 0x242   : > { %v1838_v54 = vpop.f32.mrf.mxu0 }
 0x243   : > { %v1934_v27 = vpop.f32.mrf.mxu1  ;;  %v2338_v61 = vpack.c.bf16 %v1838_v54, %v1838_v54 }
 0x244   : > { %v2354_v60 = vpack.c.bf16 %v1934_v27, %v1934_v27  ;;  %v1840_v35 = vpop.f32.mrf.mxu0 }
 0x245   : > { %v1936_v39 = vpop.f32.mrf.mxu1  ;;  %2046 = vst.msk [vmem:[%s3925_s16 + $0x2c] sm:$0xf] %vm1996_vm9, %v2338_v61 }
 0x246   : > { %2122 = vst.msk [vmem:[%s3925_s16 + $0x6c] sm:$0xf] %vm1996_vm9, %v2354_v60  ;;  %v1841_v8 = vpop.f32.mrf.mxu0 }
 0x247   : > { %v1937_v28 = vpop.f32.mrf.mxu1 }
 0x248   : > { %v1843_v34 = vpop.f32.mrf.mxu0 }
 0x249   : > { %v1939_v22 = vpop.f32.mrf.mxu1 }
 0x25e   : > { %v1846_v26 = vpop.f32.mrf.mxu0 }
 0x25f   : > { %v1942_v16 = vpop.f32.mrf.mxu1  ;;  %v2339_v55 = vpack.c.bf16 %v1846_v26, %v1846_v26 }
 0x260   : > { %v2355_v25 = vpack.c.bf16 %v1942_v16, %v1942_v16  ;;  %v1848_v5 = vpop.f32.mrf.mxu0 }
 0x261   : > { %v1944_v12 = vpop.f32.mrf.mxu1  ;;  %2054 = vst.msk [vmem:[%s3925_s16 + $0x30] sm:$0xf] %vm1996_vm9, %v2339_v55 }
 0x262   : > { %2130 = vst.msk [vmem:[%s3925_s16 + $0x70] sm:$0xf] %vm1996_vm9, %v2355_v25  ;;  %v1849_v11 = vpop.f32.mrf.mxu0 }
 0x263   : > { %v1945_v21 = vpop.f32.mrf.mxu1  ;;  %v2340_v46 = vpack.c.bf16 %v1849_v11, %v1849_v11 }
 0x264   : > { %v2356_v32 = vpack.c.bf16 %v1945_v21, %v1945_v21  ;;  %v1851_v1 = vpop.f32.mrf.mxu0 }
 0x265   : > { %v1947_v36 = vpop.f32.mrf.mxu1  ;;  %2055 = vst.msk [vmem:[%s3925_s16 + $0x34] sm:$0xf] %vm1996_vm9, %v2340_v46 }
 0x266   : > { %2131 = vst.msk [vmem:[%s3925_s16 + $0x74] sm:$0xf] %vm1996_vm9, %v2356_v32 }
 0x27a   : > { %v1854_v0 = vpop.f32.mrf.mxu0 }
 0x27b   : > { %v1950_v59 = vpop.f32.mrf.mxu1 }
 0x27c   : > { %v1856_v44 = vpop.f32.mrf.mxu0 }
 0x27d   : > { %v1952_v41 = vpop.f32.mrf.mxu1 }
 0x27e   : > { %v1857_v57 = vpop.f32.mrf.mxu0 }
 0x27f   : > { %v1953_v20 = vpop.f32.mrf.mxu1  ;;  %v2341_v33 = vpack.c.bf16 %v1857_v57, %v1857_v57 }
 0x280   : > { %v2357_v23 = vpack.c.bf16 %v1953_v20, %v1953_v20  ;;  %v1859_v10 = vpop.f32.mrf.mxu0 }
 0x281   : > { %v1955_v53 = vpop.f32.mrf.mxu1  ;;  %2064 = vst.msk [vmem:[%s3925_s16 + $0x38] sm:$0xf] %vm1996_vm9, %v2341_v33 }
 0x282   : > { %2140 = vst.msk [vmem:[%s3925_s16 + $0x78] sm:$0xf] %vm1996_vm9, %v2357_v23 }
 0x296   : > { %v1862_v63 = vpop.f32.mrf.mxu0 }
 0x297   : > { %v1958_v2 = vpop.f32.mrf.mxu1  ;;  %v2342_v30 = vpack.c.bf16 %v1862_v63, %v1862_v63 }
 0x298   : > { %v2358_v45 = vpack.c.bf16 %v1958_v2, %v1958_v2  ;;  %v1864_v42 = vpop.f32.mrf.mxu0 }
 0x299   : > { %v1960_v7 = vpop.f32.mrf.mxu1  ;;  %2065 = vst.msk [vmem:[%s3925_s16 + $0x3c] sm:$0xf] %vm1996_vm9, %v2342_v30 }
 0x29a   : > { %2141 = vst.msk [vmem:[%s3925_s16 + $0x7c] sm:$0xf] %vm1996_vm9, %v2358_v45  ;;  %v1865_v13 = vpop.f32.mrf.mxu0 }
 0x29b   : > { %v1961_v37 = vpop.f32.mrf.mxu1 }
 0x29c   : > { %v1867_v38 = vpop.f32.mrf.mxu0 }
 0x29d   : > { %v1963_v14 = vpop.f32.mrf.mxu1 }
 0x29e PF: > { %s12_s9 = sadd.s32 1, %s2463_s9  }
 0x29f   : > { %p9_p4 = scmp.ge.s32.totalorder %s12_s9, 4  }
 0x2a1   :  { %11 = sbr.rel (!%p9_p4) target bundleno = 1 (0x1), region = 58 }

// kernel: basic_block.23
= control target key start
LH: loop header
LB: loop body
LE: loop exit
PB: predicated region body
PF: predicated region fallthrough
CT: control target
= control target key end

     0   :  { %s543_s18 = smov 0   ;;  %s578_s0 = inlined_call_operand.vmem [shape: bf16[64,128], index: 0, kind: input, shape index: {}]   ;;  %s579_s1 = inlined_call_operand.vmem [shape: bf16[64,128], index: 1, kind: input, shape index: {}]   ;;  %s580_s2 = inlined_call_operand.vmem [shape: bf16[64,128], index: 2, kind: input, shape index: {}]   ;;  %s581_s3 = inlined_call_operand.vmem [shape: f32[1,128], index: 3, kind: input, shape index: {}]   ;;  %s582_s4 = inlined_call_operand.vmem [shape: f32[1,128], index: 4, kind: input, shape index: {}]   ;;  %s583_s5 = inlined_call_operand.vmem [shape: bf16[64,128], index: 5, kind: output, shape index: {}]  }
   0x1 LB: > { %s434_s19 = sadd.s32 4294967295, %s511_s18   ;;  %p438_p0 = scmp.ge.s32.totalorder %s511_s18, 1  ;;  %s511_s18 = sphi %s543_s18, %s15_s18  }
   0x2   : > { %p210_p1 = scmp.lt.s32.totalorder %s511_s18, 3 }
   0x4   : > { %p211_p2 = pnand %p438_p0, %p210_p1 }
   0x5   : > { %s439_s20 = sshll.u32 (!%p211_p2), %s434_s19, 2 }
   0x6   : > { %214 = sbr.rel (%p211_p2) target bundleno = 33 (0x21), region = 40  ;;  %p249_p3 = scmp.lt.s32.totalorder (!%p211_p2), %s439_s20, 7 }
   0xb   : > { %s585_s20 = smov (!%p249_p3, %s439_s20), 7  ;;  %v447_v12 = vld [vmem:[%s581_s3] ss:$0 sm:$0xff] }
   0xc   : > { %s551_s21 = sshll.u32 %s585_s20, 2  ;;  %v448_v19 = vld [vmem:[%s582_s4] ss:$0 sm:$0xff] }
   0xd   : > { %s252_s24 = scalar_lea.vmem %s578_s0, %s551_s21  ;;  %s258_s27 = scalar_lea.vmem %s579_s1, %s551_s21 }
   0xe   : > { %v460_v0 = vld [vmem:[%s252_s24] sm:$0xff]   ;;  %v493_v1 = vld [vmem:[%s252_s24 + $0x8] sm:$0xff]   ;;  %s264_s30 = scalar_lea.vmem %s580_s2, %s551_s21  ;;  %s270_s12 = scalar_lea.vmem %s583_s5, %s551_s21 }
   0xf   : > { %v468_v2 = vld [vmem:[%s258_s27] sm:$0xff]   ;;  %v461_v3 = vunpack.c.l.bf16 %v460_v0  ;;  %v462_v4 = vunpack.c.h.bf16 %v460_v0  ;;  %v465_v5 = vunpack.c.l.bf16 %v493_v1  ;;  %v466_v6 = vunpack.c.h.bf16 %v493_v1  ;;  %v494_v7 = vld [vmem:[%s258_s27 + $0x8] sm:$0xff]  }
  0x10   : > { %v469_v8 = vunpack.c.l.bf16 %v468_v2  ;;  %v470_v9 = vunpack.c.h.bf16 %v468_v2  ;;  %v473_v10 = vunpack.c.l.bf16 %v494_v7  ;;  %v474_v11 = vunpack.c.h.bf16 %v494_v7  ;;  %v476_v17 = vld [vmem:[%s264_s30] sm:$0xff]   ;;  %v495_v18 = vld [vmem:[%s264_s30 + $0x8] sm:$0xff]  }
  0x11   : > { %v477_v24 = vunpack.c.l.bf16 %v476_v17  ;;  %v478_v25 = vunpack.c.h.bf16 %v476_v17  ;;  %v481_v26 = vunpack.c.l.bf16 %v495_v18  ;;  %v482_v27 = vunpack.c.h.bf16 %v495_v18 }
  0x12   : > { %v288_v13 = vadd.f32 %v469_v8, %v461_v3  ;;  %v289_v14 = vadd.f32 %v470_v9, %v462_v4  ;;  %v290_v15 = vadd.f32 %v473_v10, %v465_v5  ;;  %v291_v16 = vadd.f32 %v474_v11, %v466_v6 }
  0x14   : > { %v299_v20 = vmul.f32 %v447_v12, %v288_v13  ;;  %v300_v21 = vmul.f32 %v447_v12, %v289_v14  ;;  %v301_v22 = vmul.f32 %v447_v12, %v290_v15  ;;  %v302_v23 = vmul.f32 %v447_v12, %v291_v16 }
  0x16   : > { %v310_v28 = vadd.f32 %v448_v19, %v299_v20  ;;  %v311_v29 = vadd.f32 %v448_v19, %v300_v21  ;;  %v312_v30 = vadd.f32 %v448_v19, %v301_v22  ;;  %v313_v31 = vadd.f32 %v448_v19, %v302_v23 }
  0x18   : > { %v314_v32 = vmax.f32 %v310_v28, 0.0  ;;  %v315_v33 = vmax.f32 %v311_v29, 0.0  ;;  %v316_v34 = vmax.f32 %v312_v30, 0.0  ;;  %v317_v35 = vmax.f32 %v313_v31, 0.0 }
  0x1a   : > { %v326_v36 = vadd.f32 %v477_v24, %v314_v32  ;;  %v327_v37 = vadd.f32 %v478_v25, %v315_v33  ;;  %v328_v38 = vadd.f32 %v481_v26, %v316_v34  ;;  %v329_v39 = vadd.f32 %v482_v27, %v317_v35 }
  0x1c   : > { %v330_v40 = vmax.f32 %v326_v36, 0.0  ;;  %v331_v41 = vmax.f32 %v327_v37, 0.0  ;;  %v332_v42 = vmax.f32 %v328_v38, 0.0  ;;  %v333_v43 = vmax.f32 %v329_v39, 0.0 }
  0x1e   : > { %v486_v44 = vpack.c.bf16 %v331_v41, %v330_v40  ;;  %v491_v45 = vpack.c.bf16 %v333_v43, %v332_v42 }
  0x20   : > { %487 = vst [vmem:[%s270_s12] sm:$0xff] %v486_v44   ;;  %496 = vst [vmem:[%s270_s12 + $0x8] sm:$0xff] %v491_v45  }
  0x21 PF: > { %s15_s18 = sadd.s32 1, %s511_s18  }
  0x22   : > { %p12_p4 = scmp.ge.s32.totalorder %s15_s18, 4  }
  0x24   :  { %14 = sbr.rel (!%p12_p4) target bundleno = 1 (0x1), region = 76 }

</bundles_post_ra>
